<compile_context>
chip_gen: v6e
topology: v6e:2x2x1
jax: 0.10.0
libtpu: 0.0.40
codegen_flags: <defaults>
</compile_context>

<pallas_src>
import functools

import jax
import jax.numpy as jnp
from jax.experimental import pallas as pl
from jax.experimental.pallas import tpu as pltpu


def _round_up(x, m):
    return ((x + m - 1) // m) * m


# ----------------------------------------------------------------------------
# Pallas kernel factory: N fused 3-layer pointwise-MLP heads, channels-major.
# Shared fused layer 1:
#   z1_all = relu(W1_all^T @ x + g1_all)         (g1_all = per-batch bias,
#                                                  global feature already folded)
# Per head h (static sublane slice of z1_all):
#   z2 = relu(W2_h^T @ z1_h + b2_h)
#   y  = W3_h^T @ z2 + b3_h ; final_h in {sigmoid, log_softmax, l2norm, none}
#   store y as (C_out_pad, tm)  -> lane-dense (tm lanes)
# ----------------------------------------------------------------------------
def _make_multihead_kernel(finals, h1_sizes):
    n = len(finals)
    offs, o = [], 0
    for s in h1_sizes:
        offs.append(o)
        o += s
    offs = tuple(offs)

    def kernel(*refs):
        x_ref, w1_ref, g1_ref = refs[0], refs[1], refs[2]
        prm = refs[3:3 + 4 * n]
        out_refs = refs[3 + 4 * n:]

        xb = x_ref[0]                                       # (C_local, tm) bf16
        # fused layer 1 for all heads: one wide MXU matmul
        z1 = jnp.dot(w1_ref[...], xb, preferred_element_type=jnp.float32)
        z1 = z1 + g1_ref[0]                                 # (+ per-batch global bias)
        z1b = jnp.maximum(z1, 0.0).astype(jnp.bfloat16)     # relu, one cast for all heads

        for h, final in enumerate(finals):
            w2, b2, w3, b3 = prm[4 * h: 4 * h + 4]
            z1h = z1b[offs[h]: offs[h] + h1_sizes[h], :]    # static sublane slice

            z2 = jnp.dot(w2[...], z1h, preferred_element_type=jnp.float32) + b2[...]
            z2 = jnp.maximum(z2, 0.0).astype(jnp.bfloat16)
            y = jnp.dot(w3[...], z2, preferred_element_type=jnp.float32) + b3[...]

            if final == "sigmoid":
                # EUP path: exp + approx reciprocal (no VPU divide)
                y = pl.reciprocal(1.0 + jnp.exp(-y), approx=True)
            elif final == "log_softmax":
                # softmax over the channel (sublane) axis
                m = jnp.max(y, axis=0, keepdims=True)
                zc = y - m
                y = zc - jnp.log(jnp.sum(jnp.exp(zc), axis=0, keepdims=True))
            elif final == "l2norm":
                ss = jnp.sum(y * y, axis=0, keepdims=True)
                y = y * jax.lax.rsqrt(jnp.maximum(ss, 1e-24))
            # else: no final activation

            out_refs[h][0] = y.astype(out_refs[h].dtype)

    return kernel


# ----------------------------------------------------------------------------
# Wrapper: run all heads sharing one per-row (channels-major) input in a single
# pallas_call.
#   x_cm        : [B, C_local, rows]  channels-major features (f32 -> bf16 here)
#   global_feat : [B, 512]            broadcast global feature (folded via W1 split)
#   chains      : list of per-head param dicts (arrays only; see _make_head_chain)
#   finals      : final-activation name per head (static)
#   out_dims    : true output channel count per head (static Python ints)
# Returns list of [B, out_dim, rows] f32 arrays (already in torch layout).
# ----------------------------------------------------------------------------
def run_heads(x_cm, global_feat, chains, finals, out_dims, tm_max=512):
    B, c_local, rows = x_cm.shape

    rows128 = _round_up(rows, 128)          # lane granule
    tm = min(tm_max, rows128)               # always a multiple of 128
    rows_pad = _round_up(rows128, tm)

    x_b = x_cm.astype(jnp.bfloat16)
    if rows_pad != rows:
        x_b = jnp.pad(x_b, ((0, 0), (0, 0), (0, rows_pad - rows)))

    # ---- fuse layer 1 across heads (one wide matmul in-kernel, one [512, H1sum]
    #      matmul in the wrapper for the global-feature contribution) ----
    w1lT_all = jnp.concatenate([c["w1lT"] for c in chains], axis=0)   # [H1sum, C_local] bf16
    w1g_all = jnp.concatenate([c["w1g"] for c in chains], axis=1)     # [512, H1sum] f32
    b1_all = jnp.concatenate([c["b1"] for c in chains], axis=0)       # [H1sum] f32
    g1_all = (global_feat.astype(jnp.float32) @ w1g_all + b1_all[None, :])[:, :, None]
    h1_sizes = tuple(int(c["w1lT"].shape[0]) for c in chains)
    h1_sum = sum(h1_sizes)

    grid = (B, rows_pad // tm)
    x_map = lambda b, i: (b, 0, i)
    g_map = lambda b, i: (b, 0, 0)
    w_map = lambda b, i: (0, 0)
    o_map = lambda b, i: (b, 0, i)

    args = [x_b, w1lT_all, g1_all]
    in_specs = [
        pl.BlockSpec((1, c_local, tm), x_map),
        pl.BlockSpec(w1lT_all.shape, w_map),
        pl.BlockSpec((1, h1_sum, 1), g_map),
    ]
    out_shapes, out_specs = [], []
    for c in chains:
        co_pad = int(c["w3T"].shape[0])
        args += [c["w2T"], c["b2T"], c["w3T"], c["b3T"]]
        in_specs += [
            pl.BlockSpec(c["w2T"].shape, w_map),
            pl.BlockSpec(c["b2T"].shape, w_map),
            pl.BlockSpec(c["w3T"].shape, w_map),
            pl.BlockSpec(c["b3T"].shape, w_map),
        ]
        out_shapes.append(jax.ShapeDtypeStruct((B, co_pad, rows_pad), jnp.float32))
        out_specs.append(pl.BlockSpec((1, co_pad, tm), o_map))

    kernel = _make_multihead_kernel(tuple(finals), h1_sizes)

    outs = pl.pallas_call(
        kernel,
        out_shape=tuple(out_shapes),
        grid=grid,
        in_specs=in_specs,
        out_specs=tuple(out_specs),
        compiler_params=pltpu.CompilerParams(
            dimension_semantics=("parallel", "parallel")),
    )(*args)

    # static slices only (out_dims / rows are Python ints)
    return [o[:, :od, :rows] for o, od in zip(outs, out_dims)]


# ----------------------------------------------------------------------------
# Parameter construction (deterministic synthetic weights); BN folded into the
# weight columns, W1 split into local/global parts, all matmul weights stored
# pre-transposed (channels-major orientation) in bf16.
# ----------------------------------------------------------------------------
def _fold_conv_bn(key, cin, cout, conv_bias=False, bn=True, eps=1e-5):
    kw, kb = jax.random.split(key)
    w = jax.random.normal(kw, (cin, cout), jnp.float32) * 0.05
    cb = (jax.random.normal(kb, (cout,), jnp.float32) * 0.05
          if conv_bias else jnp.zeros((cout,), jnp.float32))
    if bn:
        gamma = jnp.ones((cout,), jnp.float32)
        beta = jnp.zeros((cout,), jnp.float32)
        mean = jnp.zeros((cout,), jnp.float32)
        var = jnp.ones((cout,), jnp.float32)
        s = gamma / jnp.sqrt(var + eps)
        w = w * s[None, :]                       # fold BN scale into weight cols
        b = beta - mean * s + cb * s
    else:
        b = cb
    return w, b


def _make_head_chain(key, c_local, c_global, h1, h2, out,
                     conv_bias=False, pad_bias=0.0):
    k1, k2, k3 = jax.random.split(key, 3)
    w1, b1 = _fold_conv_bn(k1, c_local + c_global, h1, conv_bias=conv_bias, bn=True)
    w2, b2 = _fold_conv_bn(k2, h1, h2, conv_bias=conv_bias, bn=True)
    w3, b3 = _fold_conv_bn(k3, h2, out, conv_bias=conv_bias, bn=False)

    # pad final output channels to a sublane-aligned count (zero weights; bias
    # pad is -1e9 for log_softmax heads so padded channels contribute ~0).
    out_pad = _round_up(out, 8)
    if out_pad != out:
        w3 = jnp.pad(w3, ((0, 0), (0, out_pad - out)))
        b3 = jnp.pad(b3, ((0, out_pad - out),), constant_values=pad_bias)

    return {
        "w1lT": w1[:c_local].T.astype(jnp.bfloat16),   # [H1, C_local]
        "w1g": w1[c_local:],                           # [C_global, H1] f32 (wrapper matmul)
        "b1": b1,                                      # [H1] f32
        "w2T": w2.T.astype(jnp.bfloat16),              # [H2, H1]
        "b2T": b2.reshape(h2, 1),                      # [H2, 1] f32
        "w3T": w3.T.astype(jnp.bfloat16),              # [out_pad, H2]
        "b3T": b3.reshape(out_pad, 1),                 # [out_pad, 1] f32
    }


def init_params(key, fine_wh):
    keys = jax.random.split(key, 16)
    ki = iter(keys)
    p = {}

    # backbone stubs (TODO(synk): real PointMamba / ImageEncoder not available)
    p["stub_pw"] = jax.random.normal(next(ki), (3, 128), jnp.float32) * 0.1
    p["stub_gpc"] = jax.random.normal(next(ki), (3, 512), jnp.float32) * 0.1
    p["stub_px"] = jax.random.normal(next(ki), (3, 64), jnp.float32) * 0.1
    p["stub_gimg"] = jax.random.normal(next(ki), (3, 512), jnp.float32) * 0.1

    # img_score_head: (64+512)->128->64->1, no conv bias, BN+ReLU x2, Sigmoid
    p["img_score"] = _make_head_chain(next(ki), 64, 512, 128, 64, 1)
    # img_feature_layer: (64+512)->128->64->64, no conv bias, BN+ReLU x2
    p["img_feat"] = _make_head_chain(next(ki), 64, 512, 128, 64, 64)
    # pc_score_head: (128+512)->128->64->1, no conv bias, BN+ReLU x2, Sigmoid
    p["pc_score"] = _make_head_chain(next(ki), 128, 512, 128, 64, 1)
    # pc_classifier: (128+512)->512->256->fine_wh, conv bias, BN+ReLU x2,
    #                Dropout(eval=id), log_softmax over channels
    p["pc_cla"] = _make_head_chain(next(ki), 128, 512, 512, 256, fine_wh,
                                   conv_bias=True, pad_bias=-1e9)
    # pc_feature_layer: (128+512)->256->128->64, no conv bias, BN+ReLU x2
    p["pc_feat"] = _make_head_chain(next(ki), 128, 512, 256, 128, 64)
    return p


# ----------------------------------------------------------------------------
# Forward pass (fine_wh is bound statically via functools.partial, NOT traced)
# ----------------------------------------------------------------------------
def mamba_i2p_cla_forward(pc, intensity, sn, img, params, *, fine_wh):
    del intensity, sn  # not consumed by the reference forward either
    B, _, N = pc.shape
    _, Ci, H, W = img.shape

    # --- backbone stubs (plain JAX glue; TODO(synk): real backbones missing) ---
    point_wise_feat = jnp.tanh(jnp.einsum("bcn,cd->bdn", pc, params["stub_pw"]))        # [B,128,N]
    global_pc_feat = jnp.max(
        jnp.tanh(jnp.einsum("bcn,cd->bdn", pc, params["stub_gpc"])), axis=-1)           # [B,512]
    Hp, Wp = H // 4, W // 4
    img_ds = img.reshape(B, Ci, Hp, 4, Wp, 4).mean(axis=(3, 5))                         # [B,3,Hp,Wp]
    pixel_wise_feat = jnp.tanh(jnp.einsum("bchw,cd->bdhw", img_ds, params["stub_px"]))  # [B,64,Hp,Wp]
    global_img_feat = jnp.tanh(img.mean(axis=(2, 3)) @ params["stub_gimg"])             # [B,512]

    # channels-major flats (no transposes anywhere; the 512-wide global
    # broadcast is handled via the fused W1 split inside run_heads).
    pw_cm = point_wise_feat                                  # [B,128,N]
    px_cm = pixel_wise_feat.reshape(B, 64, Hp * Wp)          # [B,64,Hp*Wp]

    # --- fused Pallas head kernels (one call per shared input) ---
    pc_score, pc_cla_scores, point_wise_out = run_heads(
        pw_cm, global_img_feat,
        [params["pc_score"], params["pc_cla"], params["pc_feat"]],
        ["sigmoid", "log_softmax", "l2norm"],
        [1, fine_wh, 64])
    img_score, pixel_wise_out = run_heads(
        px_cm, global_pc_feat,
        [params["img_score"], params["img_feat"]],
        ["sigmoid", "l2norm"],
        [1, 64])

    # outputs are already in torch layout (B, C, spatial) — no post-transposes
    return (
        pixel_wise_out,     # [B,64,Hp*Wp]
        point_wise_out,     # [B,64,N]
        img_score,          # [B,1,Hp*Wp]
        pc_score,           # [B,1,N]
        pc_cla_scores,      # [B,fine_wh,N]
    )


# ----------------------------------------------------------------------------
if __name__ == "__main__":
    # opt: img_H=16, img_W=16, img_fine_resolution_scale=4 -> fine grid 4x4=16 classes
    img_H, img_W, fine_scale = 16, 16, 4
    H_fine = int(round(img_H / fine_scale))
    W_fine = int(round(img_W / fine_scale))
    fine_wh = W_fine * H_fine  # 16

    B, N = 2, 128

    key = jax.random.PRNGKey(0)
    k_pc, k_int, k_sn, k_img, k_par = jax.random.split(key, 5)

    pc = jax.random.normal(k_pc, (B, 3, N), jnp.float32)
    intensity = jax.random.normal(k_int, (B, 1, N), jnp.float32)
    sn = jax.random.normal(k_sn, (B, 3, N), jnp.float32)
    img = jax.random.normal(k_img, (B, 3, img_H, img_W), jnp.float32)

    params = init_params(k_par, fine_wh)

    fwd = jax.jit(functools.partial(mamba_i2p_cla_forward, fine_wh=fine_wh))
    outs = fwd(pc, intensity, sn, img, params)
    outs = jax.block_until_ready(outs)

    pix_feat, pt_feat, img_sc, pc_sc, pc_cla = outs
    assert pix_feat.shape == (B, 64, (img_H // 4) * (img_W // 4))
    assert pt_feat.shape == (B, 64, N)
    assert img_sc.shape == (B, 1, (img_H // 4) * (img_W // 4))
    assert pc_sc.shape == (B, 1, N)
    assert pc_cla.shape == (B, fine_wh, N)
    # sanity: log_softmax over channel dim sums to 1 after exp
    assert jnp.allclose(jnp.exp(pc_cla).sum(axis=1), 1.0, atol=1e-3)
    # sanity: L2-normalized features have unit norm over channels
    assert jnp.allclose(jnp.sum(pt_feat * pt_feat, axis=1), 1.0, atol=1e-3)
    # sanity: sigmoid scores in (0, 1)
    assert bool(jnp.all((pc_sc > 0) & (pc_sc < 1)))

    print("KERNEL_OK")
</pallas_src>

<mosaic_0001>
module attributes {stable_mosaic.version = 11 : i64} {
  func.func @kernel(%arg0: i32, %arg1: i32, %arg2: memref<1x128x128xbf16, #tpu.memory_space<vmem>>, %arg3: memref<896x128xbf16, #tpu.memory_space<vmem>>, %arg4: memref<1x896x1xf32, #tpu.memory_space<vmem>>, %arg5: memref<64x128xbf16, #tpu.memory_space<vmem>>, %arg6: memref<64x1xf32, #tpu.memory_space<vmem>>, %arg7: memref<8x64xbf16, #tpu.memory_space<vmem>>, %arg8: memref<8x1xf32, #tpu.memory_space<vmem>>, %arg9: memref<256x512xbf16, #tpu.memory_space<vmem>>, %arg10: memref<256x1xf32, #tpu.memory_space<vmem>>, %arg11: memref<16x256xbf16, #tpu.memory_space<vmem>>, %arg12: memref<16x1xf32, #tpu.memory_space<vmem>>, %arg13: memref<128x256xbf16, #tpu.memory_space<vmem>>, %arg14: memref<128x1xf32, #tpu.memory_space<vmem>>, %arg15: memref<64x128xbf16, #tpu.memory_space<vmem>>, %arg16: memref<64x1xf32, #tpu.memory_space<vmem>>, %arg17: memref<1x8x128xf32, #tpu.memory_space<vmem>>, %arg18: memref<1x16x128xf32, #tpu.memory_space<vmem>>, %arg19: memref<1x64x128xf32, #tpu.memory_space<vmem>>) attributes {dimension_semantics = [#tpu.dimension_semantics<parallel>, #tpu.dimension_semantics<parallel>], iteration_bounds = array<i64: 2, 1>, scalar_prefetch = 0 : i64, scratch_operands = 0 : i64, tpu.core_type = #tpu.core_type<tc>, window_params = [{transform_indices = @transform_0, window_bounds = array<i64: 1, 128, 128>}, {pipeline_mode = #tpu.pipeline_mode<synchronous>, transform_indices = @transform_1, window_bounds = array<i64: 896, 128>}, {transform_indices = @transform_2, window_bounds = array<i64: 1, 896, 1>}, {pipeline_mode = #tpu.pipeline_mode<synchronous>, transform_indices = @transform_3, window_bounds = array<i64: 64, 128>}, {pipeline_mode = #tpu.pipeline_mode<synchronous>, transform_indices = @transform_4, window_bounds = array<i64: 64, 1>}, {pipeline_mode = #tpu.pipeline_mode<synchronous>, transform_indices = @transform_5, window_bounds = array<i64: 8, 64>}, {pipeline_mode = #tpu.pipeline_mode<synchronous>, transform_indices = @transform_6, window_bounds = array<i64: 8, 1>}, {pipeline_mode = #tpu.pipeline_mode<synchronous>, transform_indices = @transform_7, window_bounds = array<i64: 256, 512>}, {pipeline_mode = #tpu.pipeline_mode<synchronous>, transform_indices = @transform_8, window_bounds = array<i64: 256, 1>}, {pipeline_mode = #tpu.pipeline_mode<synchronous>, transform_indices = @transform_9, window_bounds = array<i64: 16, 256>}, {pipeline_mode = #tpu.pipeline_mode<synchronous>, transform_indices = @transform_10, window_bounds = array<i64: 16, 1>}, {pipeline_mode = #tpu.pipeline_mode<synchronous>, transform_indices = @transform_11, window_bounds = array<i64: 128, 256>}, {pipeline_mode = #tpu.pipeline_mode<synchronous>, transform_indices = @transform_12, window_bounds = array<i64: 128, 1>}, {pipeline_mode = #tpu.pipeline_mode<synchronous>, transform_indices = @transform_13, window_bounds = array<i64: 64, 128>}, {pipeline_mode = #tpu.pipeline_mode<synchronous>, transform_indices = @transform_14, window_bounds = array<i64: 64, 1>}, {transform_indices = @transform_15, window_bounds = array<i64: 1, 8, 128>}, {transform_indices = @transform_16, window_bounds = array<i64: 1, 16, 128>}, {transform_indices = @transform_17, window_bounds = array<i64: 1, 64, 128>}]} {
    %c0 = arith.constant 0 : index
    %c0_0 = arith.constant 0 : index
    %c0_1 = arith.constant 0 : index
    %0 = vector.load %arg2[%c0, %c0_0, %c0_1] : memref<1x128x128xbf16, #tpu.memory_space<vmem>>, vector<1x128x128xbf16>
    %1 = vector.shape_cast %0 : vector<1x128x128xbf16> to vector<128x128xbf16>
    %c0_2 = arith.constant 0 : index
    %c0_3 = arith.constant 0 : index
    %2 = vector.load %arg3[%c0_2, %c0_3] : memref<896x128xbf16, #tpu.memory_space<vmem>>, vector<896x128xbf16>
    %cst = arith.constant dense<0.000000e+00> : vector<896x128xf32>
    %3 = tpu.matmul %2, %1, %cst {dimension_numbers = #tpu.dot_dimension_numbers<[1], [0], [0], [1], [0, 0, 1, 1], [], []>} : vector<896x128xbf16>, vector<128x128xbf16>, vector<896x128xf32> -> vector<896x128xf32>
    %c0_4 = arith.constant 0 : index
    %c0_5 = arith.constant 0 : index
    %c0_6 = arith.constant 0 : index
    %4 = vector.load %arg4[%c0_4, %c0_5, %c0_6] : memref<1x896x1xf32, #tpu.memory_space<vmem>>, vector<1x896x1xf32>
    %5 = vector.shape_cast %4 : vector<1x896x1xf32> to vector<896x1xf32>
    %6 = vector.broadcast %5 : vector<896x1xf32> to vector<896x128xf32>
    %7 = arith.addf %3, %6 : vector<896x128xf32>
    %cst_7 = arith.constant 0.000000e+00 : f32
    %8 = vector.broadcast %cst_7 : f32 to vector<896x128xf32>
    %9 = arith.maximumf %7, %8 : vector<896x128xf32>
    %10 = arith.truncf %9 : vector<896x128xf32> to vector<896x128xbf16>
    %11 = vector.extract_strided_slice %10 {offsets = [0, 0], sizes = [128, 128], strides = [1, 1]} : vector<896x128xbf16> to vector<128x128xbf16>
    %c0_8 = arith.constant 0 : index
    %c0_9 = arith.constant 0 : index
    %12 = vector.load %arg5[%c0_8, %c0_9] : memref<64x128xbf16, #tpu.memory_space<vmem>>, vector<64x128xbf16>
    %cst_10 = arith.constant dense<0.000000e+00> : vector<64x128xf32>
    %13 = tpu.matmul %12, %11, %cst_10 {dimension_numbers = #tpu.dot_dimension_numbers<[1], [0], [0], [1], [0, 0, 1, 1], [], []>} : vector<64x128xbf16>, vector<128x128xbf16>, vector<64x128xf32> -> vector<64x128xf32>
    %c0_11 = arith.constant 0 : index
    %c0_12 = arith.constant 0 : index
    %14 = vector.load %arg6[%c0_11, %c0_12] : memref<64x1xf32, #tpu.memory_space<vmem>>, vector<64x1xf32>
    %15 = vector.broadcast %14 : vector<64x1xf32> to vector<64x128xf32>
    %16 = arith.addf %13, %15 : vector<64x128xf32>
    %cst_13 = arith.constant 0.000000e+00 : f32
    %17 = vector.broadcast %cst_13 : f32 to vector<64x128xf32>
    %18 = arith.maximumf %16, %17 : vector<64x128xf32>
    %19 = arith.truncf %18 : vector<64x128xf32> to vector<64x128xbf16>
    %c0_14 = arith.constant 0 : index
    %c0_15 = arith.constant 0 : index
    %20 = vector.load %arg7[%c0_14, %c0_15] : memref<8x64xbf16, #tpu.memory_space<vmem>>, vector<8x64xbf16>
    %cst_16 = arith.constant dense<0.000000e+00> : vector<8x128xf32>
    %21 = tpu.matmul %20, %19, %cst_16 {dimension_numbers = #tpu.dot_dimension_numbers<[1], [0], [0], [1], [0, 0, 1, 1], [], []>} : vector<8x64xbf16>, vector<64x128xbf16>, vector<8x128xf32> -> vector<8x128xf32>
    %c0_17 = arith.constant 0 : index
    %c0_18 = arith.constant 0 : index
    %22 = vector.load %arg8[%c0_17, %c0_18] : memref<8x1xf32, #tpu.memory_space<vmem>>, vector<8x1xf32>
    %23 = vector.broadcast %22 : vector<8x1xf32> to vector<8x128xf32>
    %24 = arith.addf %21, %23 : vector<8x128xf32>
    %cst_19 = arith.constant 0.000000e+00 : f32
    %25 = vector.broadcast %cst_19 : f32 to vector<8x128xf32>
    %26 = arith.subf %25, %24 : vector<8x128xf32>
    %27 = math.exp %26 : vector<8x128xf32>
    %cst_20 = arith.constant 1.000000e+00 : f32
    %28 = vector.broadcast %cst_20 : f32 to vector<8x128xf32>
    %29 = arith.addf %28, %27 : vector<8x128xf32>
    %30 = tpu.reciprocal %29 {approx = true} : vector<8x128xf32> -> vector<8x128xf32>
    %c0_21 = arith.constant 0 : index
    %c0_22 = arith.constant 0 : index
    %c0_23 = arith.constant 0 : index
    %31 = vector.load %arg17[%c0_21, %c0_22, %c0_23] : memref<1x8x128xf32, #tpu.memory_space<vmem>>, vector<1x8x128xf32>
    %32 = vector.shape_cast %31 : vector<1x8x128xf32> to vector<8x128xf32>
    %33 = vector.shape_cast %30 : vector<8x128xf32> to vector<1x8x128xf32>
    tpu.vector_store %arg17[%c0_21, %c0_22, %c0_23], %33 {strides = array<i32>} : memref<1x8x128xf32, #tpu.memory_space<vmem>>, vector<1x8x128xf32>,
    %34 = vector.extract_strided_slice %10 {offsets = [128, 0], sizes = [512, 128], strides = [1, 1]} : vector<896x128xbf16> to vector<512x128xbf16>
    %c0_24 = arith.constant 0 : index
    %c0_25 = arith.constant 0 : index
    %35 = vector.load %arg9[%c0_24, %c0_25] : memref<256x512xbf16, #tpu.memory_space<vmem>>, vector<256x512xbf16>
    %cst_26 = arith.constant dense<0.000000e+00> : vector<256x128xf32>
    %36 = tpu.matmul %35, %34, %cst_26 {dimension_numbers = #tpu.dot_dimension_numbers<[1], [0], [0], [1], [0, 0, 1, 1], [], []>} : vector<256x512xbf16>, vector<512x128xbf16>, vector<256x128xf32> -> vector<256x128xf32>
    %c0_27 = arith.constant 0 : index
    %c0_28 = arith.constant 0 : index
    %37 = vector.load %arg10[%c0_27, %c0_28] : memref<256x1xf32, #tpu.memory_space<vmem>>, vector<256x1xf32>
    %38 = vector.broadcast %37 : vector<256x1xf32> to vector<256x128xf32>
    %39 = arith.addf %36, %38 : vector<256x128xf32>
    %cst_29 = arith.constant 0.000000e+00 : f32
    %40 = vector.broadcast %cst_29 : f32 to vector<256x128xf32>
    %41 = arith.maximumf %39, %40 : vector<256x128xf32>
    %42 = arith.truncf %41 : vector<256x128xf32> to vector<256x128xbf16>
    %c0_30 = arith.constant 0 : index
    %c0_31 = arith.constant 0 : index
    %43 = vector.load %arg11[%c0_30, %c0_31] : memref<16x256xbf16, #tpu.memory_space<vmem>>, vector<16x256xbf16>
    %cst_32 = arith.constant dense<0.000000e+00> : vector<16x128xf32>
    %44 = tpu.matmul %43, %42, %cst_32 {dimension_numbers = #tpu.dot_dimension_numbers<[1], [0], [0], [1], [0, 0, 1, 1], [], []>} : vector<16x256xbf16>, vector<256x128xbf16>, vector<16x128xf32> -> vector<16x128xf32>
    %c0_33 = arith.constant 0 : index
    %c0_34 = arith.constant 0 : index
    %45 = vector.load %arg12[%c0_33, %c0_34] : memref<16x1xf32, #tpu.memory_space<vmem>>, vector<16x1xf32>
    %46 = vector.broadcast %45 : vector<16x1xf32> to vector<16x128xf32>
    %47 = arith.addf %44, %46 : vector<16x128xf32>
    %cst_35 = arith.constant dense<0xFF800000> : vector<128xf32>
    %48 = vector.multi_reduction <maximumf>, %47, %cst_35 [0] : vector<16x128xf32> to vector<128xf32>
    %49 = vector.shape_cast %48 : vector<128xf32> to vector<1x128xf32>
    %50 = vector.broadcast %49 : vector<1x128xf32> to vector<16x128xf32>
    %51 = arith.subf %47, %50 : vector<16x128xf32>
    %52 = math.exp %51 : vector<16x128xf32>
    %cst_36 = arith.constant dense<0.000000e+00> : vector<128xf32>
    %53 = vector.multi_reduction <add>, %52, %cst_36 [0] : vector<16x128xf32> to vector<128xf32>
    %54 = vector.shape_cast %53 : vector<128xf32> to vector<1x128xf32>
    %55 = math.log %54 : vector<1x128xf32>
    %56 = vector.broadcast %55 : vector<1x128xf32> to vector<16x128xf32>
    %57 = arith.subf %51, %56 : vector<16x128xf32>
    %c0_37 = arith.constant 0 : index
    %c0_38 = arith.constant 0 : index
    %c0_39 = arith.constant 0 : index
    %58 = vector.load %arg18[%c0_37, %c0_38, %c0_39] : memref<1x16x128xf32, #tpu.memory_space<vmem>>, vector<1x16x128xf32>
    %59 = vector.shape_cast %58 : vector<1x16x128xf32> to vector<16x128xf32>
    %60 = vector.shape_cast %57 : vector<16x128xf32> to vector<1x16x128xf32>
    tpu.vector_store %arg18[%c0_37, %c0_38, %c0_39], %60 {strides = array<i32>} : memref<1x16x128xf32, #tpu.memory_space<vmem>>, vector<1x16x128xf32>,
    %61 = vector.extract_strided_slice %10 {offsets = [640, 0], sizes = [256, 128], strides = [1, 1]} : vector<896x128xbf16> to vector<256x128xbf16>
    %c0_40 = arith.constant 0 : index
    %c0_41 = arith.constant 0 : index
    %62 = vector.load %arg13[%c0_40, %c0_41] : memref<128x256xbf16, #tpu.memory_space<vmem>>, vector<128x256xbf16>
    %cst_42 = arith.constant dense<0.000000e+00> : vector<128x128xf32>
    %63 = tpu.matmul %62, %61, %cst_42 {dimension_numbers = #tpu.dot_dimension_numbers<[1], [0], [0], [1], [0, 0, 1, 1], [], []>} : vector<128x256xbf16>, vector<256x128xbf16>, vector<128x128xf32> -> vector<128x128xf32>
    %c0_43 = arith.constant 0 : index
    %c0_44 = arith.constant 0 : index
    %64 = vector.load %arg14[%c0_43, %c0_44] : memref<128x1xf32, #tpu.memory_space<vmem>>, vector<128x1xf32>
    %65 = vector.broadcast %64 : vector<128x1xf32> to vector<128x128xf32>
    %66 = arith.addf %63, %65 : vector<128x128xf32>
    %cst_45 = arith.constant 0.000000e+00 : f32
    %67 = vector.broadcast %cst_45 : f32 to vector<128x128xf32>
    %68 = arith.maximumf %66, %67 : vector<128x128xf32>
    %69 = arith.truncf %68 : vector<128x128xf32> to vector<128x128xbf16>
    %c0_46 = arith.constant 0 : index
    %c0_47 = arith.constant 0 : index
    %70 = vector.load %arg15[%c0_46, %c0_47] : memref<64x128xbf16, #tpu.memory_space<vmem>>, vector<64x128xbf16>
    %cst_48 = arith.constant dense<0.000000e+00> : vector<64x128xf32>
    %71 = tpu.matmul %70, %69, %cst_48 {dimension_numbers = #tpu.dot_dimension_numbers<[1], [0], [0], [1], [0, 0, 1, 1], [], []>} : vector<64x128xbf16>, vector<128x128xbf16>, vector<64x128xf32> -> vector<64x128xf32>
    %c0_49 = arith.constant 0 : index
    %c0_50 = arith.constant 0 : index
    %72 = vector.load %arg16[%c0_49, %c0_50] : memref<64x1xf32, #tpu.memory_space<vmem>>, vector<64x1xf32>
    %73 = vector.broadcast %72 : vector<64x1xf32> to vector<64x128xf32>
    %74 = arith.addf %71, %73 : vector<64x128xf32>
    %75 = arith.mulf %74, %74 : vector<64x128xf32>
    %cst_51 = arith.constant dense<0.000000e+00> : vector<128xf32>
    %76 = vector.multi_reduction <add>, %75, %cst_51 [0] : vector<64x128xf32> to vector<128xf32>
    %77 = vector.shape_cast %76 : vector<128xf32> to vector<1x128xf32>
    %cst_52 = arith.constant 1.000000e-24 : f32
    %78 = vector.broadcast %cst_52 : f32 to vector<1x128xf32>
    %79 = arith.maximumf %77, %78 : vector<1x128xf32>
    %80 = math.rsqrt %79 : vector<1x128xf32>
    %81 = vector.broadcast %80 : vector<1x128xf32> to vector<64x128xf32>
    %82 = arith.mulf %74, %81 : vector<64x128xf32>
    %c0_53 = arith.constant 0 : index
    %c0_54 = arith.constant 0 : index
    %c0_55 = arith.constant 0 : index
    %83 = vector.load %arg19[%c0_53, %c0_54, %c0_55] : memref<1x64x128xf32, #tpu.memory_space<vmem>>, vector<1x64x128xf32>
    %84 = vector.shape_cast %83 : vector<1x64x128xf32> to vector<64x128xf32>
    %85 = vector.shape_cast %82 : vector<64x128xf32> to vector<1x64x128xf32>
    tpu.vector_store %arg19[%c0_53, %c0_54, %c0_55], %85 {strides = array<i32>} : memref<1x64x128xf32, #tpu.memory_space<vmem>>, vector<1x64x128xf32>,
    return
  }
  func.func @transform_0(%arg0: i32, %arg1: i32) -> (i32, i32, i32) {
    %c0_i32 = arith.constant 0 : i32
    %c0_i32_0 = arith.constant 0 : i32
    return %arg0, %c0_i32, %arg1 : i32, i32, i32
  }
  func.func @transform_1(%arg0: i32, %arg1: i32) -> (i32, i32) {
    %c0_i32 = arith.constant 0 : i32
    %c0_i32_0 = arith.constant 0 : i32
    %c0_i32_1 = arith.constant 0 : i32
    return %c0_i32, %c0_i32_0 : i32, i32
  }
  func.func @transform_2(%arg0: i32, %arg1: i32) -> (i32, i32, i32) {
    %c0_i32 = arith.constant 0 : i32
    %c0_i32_0 = arith.constant 0 : i32
    %c0_i32_1 = arith.constant 0 : i32
    return %arg0, %c0_i32, %c0_i32_0 : i32, i32, i32
  }
  func.func @transform_3(%arg0: i32, %arg1: i32) -> (i32, i32) {
    %c0_i32 = arith.constant 0 : i32
    %c0_i32_0 = arith.constant 0 : i32
    %c0_i32_1 = arith.constant 0 : i32
    return %c0_i32, %c0_i32_0 : i32, i32
  }
  func.func @transform_4(%arg0: i32, %arg1: i32) -> (i32, i32) {
    %c0_i32 = arith.constant 0 : i32
    %c0_i32_0 = arith.constant 0 : i32
    %c0_i32_1 = arith.constant 0 : i32
    return %c0_i32, %c0_i32_0 : i32, i32
  }
  func.func @transform_5(%arg0: i32, %arg1: i32) -> (i32, i32) {
    %c0_i32 = arith.constant 0 : i32
    %c0_i32_0 = arith.constant 0 : i32
    %c0_i32_1 = arith.constant 0 : i32
    return %c0_i32, %c0_i32_0 : i32, i32
  }
  func.func @transform_6(%arg0: i32, %arg1: i32) -> (i32, i32) {
    %c0_i32 = arith.constant 0 : i32
    %c0_i32_0 = arith.constant 0 : i32
    %c0_i32_1 = arith.constant 0 : i32
    return %c0_i32, %c0_i32_0 : i32, i32
  }
  func.func @transform_7(%arg0: i32, %arg1: i32) -> (i32, i32) {
    %c0_i32 = arith.constant 0 : i32
    %c0_i32_0 = arith.constant 0 : i32
    %c0_i32_1 = arith.constant 0 : i32
    return %c0_i32, %c0_i32_0 : i32, i32
  }
  func.func @transform_8(%arg0: i32, %arg1: i32) -> (i32, i32) {
    %c0_i32 = arith.constant 0 : i32
    %c0_i32_0 = arith.constant 0 : i32
    %c0_i32_1 = arith.constant 0 : i32
    return %c0_i32, %c0_i32_0 : i32, i32
  }
  func.func @transform_9(%arg0: i32, %arg1: i32) -> (i32, i32) {
    %c0_i32 = arith.constant 0 : i32
    %c0_i32_0 = arith.constant 0 : i32
    %c0_i32_1 = arith.constant 0 : i32
    return %c0_i32, %c0_i32_0 : i32, i32
  }
  func.func @transform_10(%arg0: i32, %arg1: i32) -> (i32, i32) {
    %c0_i32 = arith.constant 0 : i32
    %c0_i32_0 = arith.constant 0 : i32
    %c0_i32_1 = arith.constant 0 : i32
    return %c0_i32, %c0_i32_0 : i32, i32
  }
  func.func @transform_11(%arg0: i32, %arg1: i32) -> (i32, i32) {
    %c0_i32 = arith.constant 0 : i32
    %c0_i32_0 = arith.constant 0 : i32
    %c0_i32_1 = arith.constant 0 : i32
    return %c0_i32, %c0_i32_0 : i32, i32
  }
  func.func @transform_12(%arg0: i32, %arg1: i32) -> (i32, i32) {
    %c0_i32 = arith.constant 0 : i32
    %c0_i32_0 = arith.constant 0 : i32
    %c0_i32_1 = arith.constant 0 : i32
    return %c0_i32, %c0_i32_0 : i32, i32
  }
  func.func @transform_13(%arg0: i32, %arg1: i32) -> (i32, i32) {
    %c0_i32 = arith.constant 0 : i32
    %c0_i32_0 = arith.constant 0 : i32
    %c0_i32_1 = arith.constant 0 : i32
    return %c0_i32, %c0_i32_0 : i32, i32
  }
  func.func @transform_14(%arg0: i32, %arg1: i32) -> (i32, i32) {
    %c0_i32 = arith.constant 0 : i32
    %c0_i32_0 = arith.constant 0 : i32
    %c0_i32_1 = arith.constant 0 : i32
    return %c0_i32, %c0_i32_0 : i32, i32
  }
  func.func @transform_15(%arg0: i32, %arg1: i32) -> (i32, i32, i32) {
    %c0_i32 = arith.constant 0 : i32
    %c0_i32_0 = arith.constant 0 : i32
    return %arg0, %c0_i32, %arg1 : i32, i32, i32
  }
  func.func @transform_16(%arg0: i32, %arg1: i32) -> (i32, i32, i32) {
    %c0_i32 = arith.constant 0 : i32
    %c0_i32_0 = arith.constant 0 : i32
    return %arg0, %c0_i32, %arg1 : i32, i32, i32
  }
  func.func @transform_17(%arg0: i32, %arg1: i32) -> (i32, i32, i32) {
    %c0_i32 = arith.constant 0 : i32
    %c0_i32_0 = arith.constant 0 : i32
    return %arg0, %c0_i32, %arg1 : i32, i32, i32
  }
}

module attributes {stable_mosaic.version = 11 : i64} {
  func.func @kernel(%arg0: i32, %arg1: i32, %arg2: memref<1x64x128xbf16, #tpu.memory_space<vmem>>, %arg3: memref<256x64xbf16, #tpu.memory_space<vmem>>, %arg4: memref<1x256x1xf32, #tpu.memory_space<vmem>>, %arg5: memref<64x128xbf16, #tpu.memory_space<vmem>>, %arg6: memref<64x1xf32, #tpu.memory_space<vmem>>, %arg7: memref<8x64xbf16, #tpu.memory_space<vmem>>, %arg8: memref<8x1xf32, #tpu.memory_space<vmem>>, %arg9: memref<64x128xbf16, #tpu.memory_space<vmem>>, %arg10: memref<64x1xf32, #tpu.memory_space<vmem>>, %arg11: memref<64x64xbf16, #tpu.memory_space<vmem>>, %arg12: memref<64x1xf32, #tpu.memory_space<vmem>>, %arg13: memref<1x8x128xf32, #tpu.memory_space<vmem>>, %arg14: memref<1x64x128xf32, #tpu.memory_space<vmem>>) attributes {dimension_semantics = [#tpu.dimension_semantics<parallel>, #tpu.dimension_semantics<parallel>], iteration_bounds = array<i64: 2, 1>, scalar_prefetch = 0 : i64, scratch_operands = 0 : i64, tpu.core_type = #tpu.core_type<tc>, window_params = [{transform_indices = @transform_0, window_bounds = array<i64: 1, 64, 128>}, {pipeline_mode = #tpu.pipeline_mode<synchronous>, transform_indices = @transform_1, window_bounds = array<i64: 256, 64>}, {transform_indices = @transform_2, window_bounds = array<i64: 1, 256, 1>}, {pipeline_mode = #tpu.pipeline_mode<synchronous>, transform_indices = @transform_3, window_bounds = array<i64: 64, 128>}, {pipeline_mode = #tpu.pipeline_mode<synchronous>, transform_indices = @transform_4, window_bounds = array<i64: 64, 1>}, {pipeline_mode = #tpu.pipeline_mode<synchronous>, transform_indices = @transform_5, window_bounds = array<i64: 8, 64>}, {pipeline_mode = #tpu.pipeline_mode<synchronous>, transform_indices = @transform_6, window_bounds = array<i64: 8, 1>}, {pipeline_mode = #tpu.pipeline_mode<synchronous>, transform_indices = @transform_7, window_bounds = array<i64: 64, 128>}, {pipeline_mode = #tpu.pipeline_mode<synchronous>, transform_indices = @transform_8, window_bounds = array<i64: 64, 1>}, {pipeline_mode = #tpu.pipeline_mode<synchronous>, transform_indices = @transform_9, window_bounds = array<i64: 64, 64>}, {pipeline_mode = #tpu.pipeline_mode<synchronous>, transform_indices = @transform_10, window_bounds = array<i64: 64, 1>}, {transform_indices = @transform_11, window_bounds = array<i64: 1, 8, 128>}, {transform_indices = @transform_12, window_bounds = array<i64: 1, 64, 128>}]} {
    %c0 = arith.constant 0 : index
    %c0_0 = arith.constant 0 : index
    %c0_1 = arith.constant 0 : index
    %0 = vector.load %arg2[%c0, %c0_0, %c0_1] : memref<1x64x128xbf16, #tpu.memory_space<vmem>>, vector<1x64x128xbf16>
    %1 = vector.shape_cast %0 : vector<1x64x128xbf16> to vector<64x128xbf16>
    %c0_2 = arith.constant 0 : index
    %c0_3 = arith.constant 0 : index
    %2 = vector.load %arg3[%c0_2, %c0_3] : memref<256x64xbf16, #tpu.memory_space<vmem>>, vector<256x64xbf16>
    %cst = arith.constant dense<0.000000e+00> : vector<256x128xf32>
    %3 = tpu.matmul %2, %1, %cst {dimension_numbers = #tpu.dot_dimension_numbers<[1], [0], [0], [1], [0, 0, 1, 1], [], []>} : vector<256x64xbf16>, vector<64x128xbf16>, vector<256x128xf32> -> vector<256x128xf32>
    %c0_4 = arith.constant 0 : index
    %c0_5 = arith.constant 0 : index
    %c0_6 = arith.constant 0 : index
    %4 = vector.load %arg4[%c0_4, %c0_5, %c0_6] : memref<1x256x1xf32, #tpu.memory_space<vmem>>, vector<1x256x1xf32>
    %5 = vector.shape_cast %4 : vector<1x256x1xf32> to vector<256x1xf32>
    %6 = vector.broadcast %5 : vector<256x1xf32> to vector<256x128xf32>
    %7 = arith.addf %3, %6 : vector<256x128xf32>
    %cst_7 = arith.constant 0.000000e+00 : f32
    %8 = vector.broadcast %cst_7 : f32 to vector<256x128xf32>
    %9 = arith.maximumf %7, %8 : vector<256x128xf32>
    %10 = arith.truncf %9 : vector<256x128xf32> to vector<256x128xbf16>
    %11 = vector.extract_strided_slice %10 {offsets = [0, 0], sizes = [128, 128], strides = [1, 1]} : vector<256x128xbf16> to vector<128x128xbf16>
    %c0_8 = arith.constant 0 : index
    %c0_9 = arith.constant 0 : index
    %12 = vector.load %arg5[%c0_8, %c0_9] : memref<64x128xbf16, #tpu.memory_space<vmem>>, vector<64x128xbf16>
    %cst_10 = arith.constant dense<0.000000e+00> : vector<64x128xf32>
    %13 = tpu.matmul %12, %11, %cst_10 {dimension_numbers = #tpu.dot_dimension_numbers<[1], [0], [0], [1], [0, 0, 1, 1], [], []>} : vector<64x128xbf16>, vector<128x128xbf16>, vector<64x128xf32> -> vector<64x128xf32>
    %c0_11 = arith.constant 0 : index
    %c0_12 = arith.constant 0 : index
    %14 = vector.load %arg6[%c0_11, %c0_12] : memref<64x1xf32, #tpu.memory_space<vmem>>, vector<64x1xf32>
    %15 = vector.broadcast %14 : vector<64x1xf32> to vector<64x128xf32>
    %16 = arith.addf %13, %15 : vector<64x128xf32>
    %cst_13 = arith.constant 0.000000e+00 : f32
    %17 = vector.broadcast %cst_13 : f32 to vector<64x128xf32>
    %18 = arith.maximumf %16, %17 : vector<64x128xf32>
    %19 = arith.truncf %18 : vector<64x128xf32> to vector<64x128xbf16>
    %c0_14 = arith.constant 0 : index
    %c0_15 = arith.constant 0 : index
    %20 = vector.load %arg7[%c0_14, %c0_15] : memref<8x64xbf16, #tpu.memory_space<vmem>>, vector<8x64xbf16>
    %cst_16 = arith.constant dense<0.000000e+00> : vector<8x128xf32>
    %21 = tpu.matmul %20, %19, %cst_16 {dimension_numbers = #tpu.dot_dimension_numbers<[1], [0], [0], [1], [0, 0, 1, 1], [], []>} : vector<8x64xbf16>, vector<64x128xbf16>, vector<8x128xf32> -> vector<8x128xf32>
    %c0_17 = arith.constant 0 : index
    %c0_18 = arith.constant 0 : index
    %22 = vector.load %arg8[%c0_17, %c0_18] : memref<8x1xf32, #tpu.memory_space<vmem>>, vector<8x1xf32>
    %23 = vector.broadcast %22 : vector<8x1xf32> to vector<8x128xf32>
    %24 = arith.addf %21, %23 : vector<8x128xf32>
    %cst_19 = arith.constant 0.000000e+00 : f32
    %25 = vector.broadcast %cst_19 : f32 to vector<8x128xf32>
    %26 = arith.subf %25, %24 : vector<8x128xf32>
    %27 = math.exp %26 : vector<8x128xf32>
    %cst_20 = arith.constant 1.000000e+00 : f32
    %28 = vector.broadcast %cst_20 : f32 to vector<8x128xf32>
    %29 = arith.addf %28, %27 : vector<8x128xf32>
    %30 = tpu.reciprocal %29 {approx = true} : vector<8x128xf32> -> vector<8x128xf32>
    %c0_21 = arith.constant 0 : index
    %c0_22 = arith.constant 0 : index
    %c0_23 = arith.constant 0 : index
    %31 = vector.load %arg13[%c0_21, %c0_22, %c0_23] : memref<1x8x128xf32, #tpu.memory_space<vmem>>, vector<1x8x128xf32>
    %32 = vector.shape_cast %31 : vector<1x8x128xf32> to vector<8x128xf32>
    %33 = vector.shape_cast %30 : vector<8x128xf32> to vector<1x8x128xf32>
    tpu.vector_store %arg13[%c0_21, %c0_22, %c0_23], %33 {strides = array<i32>} : memref<1x8x128xf32, #tpu.memory_space<vmem>>, vector<1x8x128xf32>,
    %34 = vector.extract_strided_slice %10 {offsets = [128, 0], sizes = [128, 128], strides = [1, 1]} : vector<256x128xbf16> to vector<128x128xbf16>
    %c0_24 = arith.constant 0 : index
    %c0_25 = arith.constant 0 : index
    %35 = vector.load %arg9[%c0_24, %c0_25] : memref<64x128xbf16, #tpu.memory_space<vmem>>, vector<64x128xbf16>
    %cst_26 = arith.constant dense<0.000000e+00> : vector<64x128xf32>
    %36 = tpu.matmul %35, %34, %cst_26 {dimension_numbers = #tpu.dot_dimension_numbers<[1], [0], [0], [1], [0, 0, 1, 1], [], []>} : vector<64x128xbf16>, vector<128x128xbf16>, vector<64x128xf32> -> vector<64x128xf32>
    %c0_27 = arith.constant 0 : index
    %c0_28 = arith.constant 0 : index
    %37 = vector.load %arg10[%c0_27, %c0_28] : memref<64x1xf32, #tpu.memory_space<vmem>>, vector<64x1xf32>
    %38 = vector.broadcast %37 : vector<64x1xf32> to vector<64x128xf32>
    %39 = arith.addf %36, %38 : vector<64x128xf32>
    %cst_29 = arith.constant 0.000000e+00 : f32
    %40 = vector.broadcast %cst_29 : f32 to vector<64x128xf32>
    %41 = arith.maximumf %39, %40 : vector<64x128xf32>
    %42 = arith.truncf %41 : vector<64x128xf32> to vector<64x128xbf16>
    %c0_30 = arith.constant 0 : index
    %c0_31 = arith.constant 0 : index
    %43 = vector.load %arg11[%c0_30, %c0_31] : memref<64x64xbf16, #tpu.memory_space<vmem>>, vector<64x64xbf16>
    %cst_32 = arith.constant dense<0.000000e+00> : vector<64x128xf32>
    %44 = tpu.matmul %43, %42, %cst_32 {dimension_numbers = #tpu.dot_dimension_numbers<[1], [0], [0], [1], [0, 0, 1, 1], [], []>} : vector<64x64xbf16>, vector<64x128xbf16>, vector<64x128xf32> -> vector<64x128xf32>
    %c0_33 = arith.constant 0 : index
    %c0_34 = arith.constant 0 : index
    %45 = vector.load %arg12[%c0_33, %c0_34] : memref<64x1xf32, #tpu.memory_space<vmem>>, vector<64x1xf32>
    %46 = vector.broadcast %45 : vector<64x1xf32> to vector<64x128xf32>
    %47 = arith.addf %44, %46 : vector<64x128xf32>
    %48 = arith.mulf %47, %47 : vector<64x128xf32>
    %cst_35 = arith.constant dense<0.000000e+00> : vector<128xf32>
    %49 = vector.multi_reduction <add>, %48, %cst_35 [0] : vector<64x128xf32> to vector<128xf32>
    %50 = vector.shape_cast %49 : vector<128xf32> to vector<1x128xf32>
    %cst_36 = arith.constant 1.000000e-24 : f32
    %51 = vector.broadcast %cst_36 : f32 to vector<1x128xf32>
    %52 = arith.maximumf %50, %51 : vector<1x128xf32>
    %53 = math.rsqrt %52 : vector<1x128xf32>
    %54 = vector.broadcast %53 : vector<1x128xf32> to vector<64x128xf32>
    %55 = arith.mulf %47, %54 : vector<64x128xf32>
    %c0_37 = arith.constant 0 : index
    %c0_38 = arith.constant 0 : index
    %c0_39 = arith.constant 0 : index
    %56 = vector.load %arg14[%c0_37, %c0_38, %c0_39] : memref<1x64x128xf32, #tpu.memory_space<vmem>>, vector<1x64x128xf32>
    %57 = vector.shape_cast %56 : vector<1x64x128xf32> to vector<64x128xf32>
    %58 = vector.shape_cast %55 : vector<64x128xf32> to vector<1x64x128xf32>
    tpu.vector_store %arg14[%c0_37, %c0_38, %c0_39], %58 {strides = array<i32>} : memref<1x64x128xf32, #tpu.memory_space<vmem>>, vector<1x64x128xf32>,
    return
  }
  func.func @transform_0(%arg0: i32, %arg1: i32) -> (i32, i32, i32) {
    %c0_i32 = arith.constant 0 : i32
    %c0_i32_0 = arith.constant 0 : i32
    return %arg0, %c0_i32, %arg1 : i32, i32, i32
  }
  func.func @transform_1(%arg0: i32, %arg1: i32) -> (i32, i32) {
    %c0_i32 = arith.constant 0 : i32
    %c0_i32_0 = arith.constant 0 : i32
    %c0_i32_1 = arith.constant 0 : i32
    return %c0_i32, %c0_i32_0 : i32, i32
  }
  func.func @transform_2(%arg0: i32, %arg1: i32) -> (i32, i32, i32) {
    %c0_i32 = arith.constant 0 : i32
    %c0_i32_0 = arith.constant 0 : i32
    %c0_i32_1 = arith.constant 0 : i32
    return %arg0, %c0_i32, %c0_i32_0 : i32, i32, i32
  }
  func.func @transform_3(%arg0: i32, %arg1: i32) -> (i32, i32) {
    %c0_i32 = arith.constant 0 : i32
    %c0_i32_0 = arith.constant 0 : i32
    %c0_i32_1 = arith.constant 0 : i32
    return %c0_i32, %c0_i32_0 : i32, i32
  }
  func.func @transform_4(%arg0: i32, %arg1: i32) -> (i32, i32) {
    %c0_i32 = arith.constant 0 : i32
    %c0_i32_0 = arith.constant 0 : i32
    %c0_i32_1 = arith.constant 0 : i32
    return %c0_i32, %c0_i32_0 : i32, i32
  }
  func.func @transform_5(%arg0: i32, %arg1: i32) -> (i32, i32) {
    %c0_i32 = arith.constant 0 : i32
    %c0_i32_0 = arith.constant 0 : i32
    %c0_i32_1 = arith.constant 0 : i32
    return %c0_i32, %c0_i32_0 : i32, i32
  }
  func.func @transform_6(%arg0: i32, %arg1: i32) -> (i32, i32) {
    %c0_i32 = arith.constant 0 : i32
    %c0_i32_0 = arith.constant 0 : i32
    %c0_i32_1 = arith.constant 0 : i32
    return %c0_i32, %c0_i32_0 : i32, i32
  }
  func.func @transform_7(%arg0: i32, %arg1: i32) -> (i32, i32) {
    %c0_i32 = arith.constant 0 : i32
    %c0_i32_0 = arith.constant 0 : i32
    %c0_i32_1 = arith.constant 0 : i32
    return %c0_i32, %c0_i32_0 : i32, i32
  }
  func.func @transform_8(%arg0: i32, %arg1: i32) -> (i32, i32) {
    %c0_i32 = arith.constant 0 : i32
    %c0_i32_0 = arith.constant 0 : i32
    %c0_i32_1 = arith.constant 0 : i32
    return %c0_i32, %c0_i32_0 : i32, i32
  }
  func.func @transform_9(%arg0: i32, %arg1: i32) -> (i32, i32) {
    %c0_i32 = arith.constant 0 : i32
    %c0_i32_0 = arith.constant 0 : i32
    %c0_i32_1 = arith.constant 0 : i32
    return %c0_i32, %c0_i32_0 : i32, i32
  }
  func.func @transform_10(%arg0: i32, %arg1: i32) -> (i32, i32) {
    %c0_i32 = arith.constant 0 : i32
    %c0_i32_0 = arith.constant 0 : i32
    %c0_i32_1 = arith.constant 0 : i32
    return %c0_i32, %c0_i32_0 : i32, i32
  }
  func.func @transform_11(%arg0: i32, %arg1: i32) -> (i32, i32, i32) {
    %c0_i32 = arith.constant 0 : i32
    %c0_i32_0 = arith.constant 0 : i32
    return %arg0, %c0_i32, %arg1 : i32, i32, i32
  }
  func.func @transform_12(%arg0: i32, %arg1: i32) -> (i32, i32, i32) {
    %c0_i32 = arith.constant 0 : i32
    %c0_i32_0 = arith.constant 0 : i32
    return %arg0, %c0_i32, %arg1 : i32, i32, i32
  }
}

</mosaic_0001>

<bundles_post_ra>
// kernel: mamba_i2p_cla_forward.3
= control target key start
LH: loop header
LB: loop body
LE: loop exit
PB: predicated region body
PF: predicated region fallthrough
CT: control target
= control target key end

     0   :  { %s2179_s21 = smov 0   ;;  %s2181_s22 = smov 0   ;;  %s2495_s0 = inlined_call_operand.vmem [shape: bf16[2,64,128], index: 0, kind: input, shape index: {}]   ;;  %s2496_s1 = inlined_call_operand.vmem [shape: bf16[256,64], index: 1, kind: input, shape index: {}]   ;;  %s2497_s2 = inlined_call_operand.vmem [shape: f32[2,256,1], index: 2, kind: input, shape index: {}]   ;;  %s2498_s3 = inlined_call_operand.vmem [shape: bf16[64,128], index: 3, kind: input, shape index: {}]   ;;  %s2499_s4 = inlined_call_operand.vmem [shape: f32[64,1], index: 4, kind: input, shape index: {}]   ;;  %s2500_s5 = inlined_call_operand.vmem [shape: bf16[8,64], index: 5, kind: input, shape index: {}]   ;;  %s2501_s6 = inlined_call_operand.vmem [shape: f32[8,1], index: 6, kind: input, shape index: {}]   ;;  %s2502_s7 = inlined_call_operand.vmem [shape: bf16[64,128], index: 7, kind: input, shape index: {}]   ;;  %s2503_s8 = inlined_call_operand.vmem [shape: f32[64,1], index: 8, kind: input, shape index: {}]   ;;  %s2504_s9 = inlined_call_operand.vmem [shape: bf16[64,64], index: 9, kind: input, shape index: {}]   ;;  %s2505_s10 = inlined_call_operand.vmem [shape: f32[64,1], index: 10, kind: input, shape index: {}]   ;;  %s2506_s11 = inlined_call_operand.vmem [shape: f32[2,8,128], index: 11, kind: output, shape index: {0}]   ;;  %s2507_s12 = inlined_call_operand.vmem [shape: f32[2,64,128], index: 12, kind: output, shape index: {1}]  }
   0x1   :  { %s2183_s23 = smov 0  }
   0x2 LB: > { %s35_s24 = sadd.s32 1, %s2105_s22  ;;  %p1781_p0 = scmp.ge.s32.totalorder %s2109_s23, 1  ;;  %s2109_s23 = sphi %s2183_s23, %s23_s23   ;;  %s2105_s22 = sphi %s2181_s22, %s2509_s22   ;;  %s2101_s21 = sphi %s2179_s21, %s2508_s21  }
   0x3   : > { %p37_p1 = scmp.ge.s32.totalorder %s35_s24, 2  ;;  %p396_p2 = scmp.lt.s32.totalorder %s2109_s23, 3 }
   0x5   : > { %s2511_s24 = smov (%p37_p1, %s35_s24), 0  ;;  %p397_p3 = pnand %p1781_p0, %p396_p2 }
   0x6   : > { %p456_p4 = scmp.lt.s32.totalorder (!%p397_p3), %s2101_s21, 1 }
   0x7   : > { %400 = sbr.rel (%p397_p3) target bundleno = 801 (0x321), region = 64 }
   0xc   : > { %v2053_v0 = vld [vmem:[%s2496_s1] sm:$0xff]   ;;  %vm821_vm0 = vcmask 523264   ;;  %s2513_s21 = smov (!%p456_p4, %s2101_s21), 1  ;;  %v2111_v1 = vmov 0   ;;  %v2054_v12 = vld [vmem:[%s2496_s1 + $0x8] sm:$0xff]   ;;  %v2055_v15 = vld [vmem:[%s2496_s1 + $0x10] sm:$0xff]  }
   0xd   : > { %1912 = vmatprep.mubr.msk.bf16.mxu0 %vm821_vm0, %v2053_v0  ;;  %2047 = vset.pattern.permute.xlu0 %v2111_v1  ;;  %s1844_s27 = sshll.u32 %s2513_s21, 5  ;;  %s1845_s28 = sshll.u32 %s2513_s21, 8  ;;  %v2056_v18 = vld [vmem:[%s2496_s1 + $0x18] sm:$0xff]   ;;  %v2057_v21 = vld [vmem:[%s2496_s1 + $0x20] sm:$0xff]   ;;  %v2058_v24 = vld [vmem:[%s2496_s1 + $0x28] sm:$0xff]   ;;  %vm2113_vm1 = vmmov 0  }
   0xe   : > { %2048 = vset.pattern.permute.xlu1 %v2111_v1  ;;  %s463_s13 = scalar_lea.vmem %s2495_s0, %s1844_s27  ;;  %s2211_s16 = scalar_lea.vmem %s2497_s2, %s1845_s28  ;;  %v2059_v27 = vld [vmem:[%s2496_s1 + $0x30] sm:$0xff]   ;;  %v2060_v30 = vld [vmem:[%s2496_s1 + $0x38] sm:$0xff]   ;;  %v2061_v33 = vld [vmem:[%s2496_s1 + $0x40] sm:$0xff]  }
   0xf   : > { %v2049_v2 = vld [vmem:[%s463_s13 + $0x18] sm:$0xff]   ;;  %v2050_v3 = vld [vmem:[%s463_s13 + $0x10] sm:$0xff]   ;;  %v2051_v4 = vld [vmem:[%s463_s13 + $0x8] sm:$0xff]   ;;  %s1786_s30 = sshll.u32 %s2513_s21, 3  ;;  %s1846_s17 = sshll.u32 %s2513_s21, 6 }
  0x10   : > { %1904 = vmatprep.subr.bf16.mxu0 %v2049_v2  ;;  %v539_v5 = vld [vmem:[%s2211_s16 + $0x70] sm:$0xff]  ;;  %v537_v6 = vld [vmem:[%s2211_s16 + $0x60] sm:$0xff]  ;;  %v540_v7 = vld [vmem:[%s2211_s16 + $0x78] sm:$0xff]  ;;  %s475_s15 = scalar_lea.vmem %s2506_s11, %s1786_s30  ;;  %s483_s20 = scalar_lea.vmem %s2507_s12, %s1846_s17 }
  0x11   : > { %1905 = vmatpush3.bf16.msra.mxu0 %v2049_v2  ;;  %629 = vperm.xlu0 %2047, %v539_v5   ;;  %v538_v8 = vld [vmem:[%s2211_s16 + $0x68] sm:$0xff]  ;;  %v2052_v9 = vld [vmem:[%s463_s13] sm:$0xff]   ;;  %v535_v10 = vld [vmem:[%s2211_s16 + $0x50] sm:$0xff] }
  0x12   : > { %1906 = vmatprep.subr.bf16.mxu0 %v2050_v3  ;;  %619 = vperm.xlu1 %2048, %v537_v6   ;;  %v536_v11 = vld [vmem:[%s2211_s16 + $0x58] sm:$0xff]  ;;  %v533_v13 = vld [vmem:[%s2211_s16 + $0x40] sm:$0xff]  ;;  %v534_v14 = vld [vmem:[%s2211_s16 + $0x48] sm:$0xff] }
  0x13   : > { %v555_v16 = vld [vmem:[%s2211_s16 + $0xf0] sm:$0xff]  ;;  %v556_v17 = vld [vmem:[%s2211_s16 + $0xf8] sm:$0xff]  ;;  %v553_v22 = vld [vmem:[%s2211_s16 + $0xe0] sm:$0xff] }
  0x14   : > { %v531_v19 = vld [vmem:[%s2211_s16 + $0x30] sm:$0xff]  ;;  %v532_v20 = vld [vmem:[%s2211_s16 + $0x38] sm:$0xff]  ;;  %v554_v23 = vld [vmem:[%s2211_s16 + $0xe8] sm:$0xff] }
  0x15   : > { %1907 = vmatpush3.bf16.msra.mxu0 %v2050_v3  ;;  %634 = vperm.xlu0 %2047, %v540_v7   ;;  %v529_v25 = vld [vmem:[%s2211_s16 + $0x20] sm:$0xff]  ;;  %v530_v26 = vld [vmem:[%s2211_s16 + $0x28] sm:$0xff]  ;;  %v551_v28 = vld [vmem:[%s2211_s16 + $0xd0] sm:$0xff] }
  0x16   : > { %1908 = vmatprep.subr.bf16.mxu0 %v2051_v4  ;;  %624 = vperm.xlu1 %2048, %v538_v8   ;;  %v552_v29 = vld [vmem:[%s2211_s16 + $0xd8] sm:$0xff]  ;;  %v527_v31 = vld [vmem:[%s2211_s16 + $0x10] sm:$0xff]  ;;  %v549_v34 = vld [vmem:[%s2211_s16 + $0xc0] sm:$0xff] }
  0x17   : > { %v528_v32 = vld [vmem:[%s2211_s16 + $0x18] sm:$0xff]  ;;  %v550_v35 = vld [vmem:[%s2211_s16 + $0xc8] sm:$0xff]  ;;  %v525_v37 = vld [vmem:[%s2211_s16] sm:$0xff] }
  0x18   : > { %v2062_v36 = vld [vmem:[%s2496_s1 + $0x48] sm:$0xff]   ;;  %v2063_v39 = vld [vmem:[%s2496_s1 + $0x50] sm:$0xff]   ;;  %v548_v41 = vld [vmem:[%s2211_s16 + $0xb8] sm:$0xff] }
  0x19   : > { %1909 = vmatpush3.bf16.msra.mxu0 %v2051_v4  ;;  %609 = vperm.xlu0 %2047, %v535_v10   ;;  %v526_v38 = vld [vmem:[%s2211_s16 + $0x8] sm:$0xff]  ;;  %v547_v40 = vld [vmem:[%s2211_s16 + $0xb0] sm:$0xff]  ;;  %v2064_v42 = vld [vmem:[%s2496_s1 + $0x58] sm:$0xff]  }
  0x1a   : > { %1910 = vmatprep.subr.bf16.mxu0 %v2052_v9  ;;  %614 = vperm.xlu1 %2048, %v536_v11   ;;  %v545_v43 = vld [vmem:[%s2211_s16 + $0xa0] sm:$0xff]  ;;  %v546_v44 = vld [vmem:[%s2211_s16 + $0xa8] sm:$0xff]  ;;  %v543_v46 = vld [vmem:[%s2211_s16 + $0x90] sm:$0xff] }
  0x1b   : > { %v2065_v45 = vld [vmem:[%s2496_s1 + $0x60] sm:$0xff]   ;;  %v544_v47 = vld [vmem:[%s2211_s16 + $0x98] sm:$0xff]  ;;  %v2066_v48 = vld [vmem:[%s2496_s1 + $0x68] sm:$0xff]  }
  0x1c   : > { %v541_v49 = vld [vmem:[%s2211_s16 + $0x80] sm:$0xff]  ;;  %v542_v50 = vld [vmem:[%s2211_s16 + $0x88] sm:$0xff]  ;;  %v2067_v51 = vld [vmem:[%s2496_s1 + $0x70] sm:$0xff]  }
  0x1d   : > { %1911 = vmatpush3.bf16.msra.mxu0 %v2052_v9  ;;  %599 = vperm.xlu0 %2047, %v533_v13   ;;  %v1093_v52 = vld [vmem:[%s2499_s4 + $0x30] sm:$0xff]  ;;  %v1094_v53 = vld [vmem:[%s2499_s4 + $0x38] sm:$0xff]  ;;  %v1091_v55 = vld [vmem:[%s2499_s4 + $0x20] sm:$0xff] }
  0x1e   : > { %604 = vperm.xlu1 %2048, %v534_v14   ;;  %v2068_v54 = vld [vmem:[%s2496_s1 + $0x78] sm:$0xff]   ;;  %v1092_v56 = vld [vmem:[%s2499_s4 + $0x28] sm:$0xff]  ;;  %v1089_v57 = vld [vmem:[%s2499_s4 + $0x10] sm:$0xff] }
  0x1f   : > { %v1090_v58 = vld [vmem:[%s2499_s4 + $0x18] sm:$0xff]  ;;  %v1087_v59 = vld [vmem:[%s2499_s4] sm:$0xff]  ;;  %v1088_v60 = vld [vmem:[%s2499_s4 + $0x8] sm:$0xff] }
  0x20   : > { %1913 = vmatmul.mubr.msk.bf16.vlgmr.msra.gmra.mxu0 %vm821_vm0, %v2054_v12  ;;  %v1306_v61 = vld [vmem:[%s2503_s8 + $0x30] sm:$0xff]  ;;  %v1307_v62 = vld [vmem:[%s2503_s8 + $0x38] sm:$0xff]  ;;  %v1304_v63 = vld [vmem:[%s2503_s8 + $0x20] sm:$0xff] }
  0x21   : > { %1916 = vmatprep.mubr.msk.bf16.mxu0 %vm821_vm0, %v2055_v15  ;;  %709 = vperm.xlu0 %2047, %v555_v16   ;;  %v1305_v0 = vld [vmem:[%s2503_s8 + $0x28] sm:$0xff]  ;;  %v1302_v1 = vld [vmem:[%s2503_s8 + $0x10] sm:$0xff]  ;;  %v1303_v2 = vld [vmem:[%s2503_s8 + $0x18] sm:$0xff] }
  0x22   : > { %714 = vperm.xlu1 %2048, %v556_v17   ;;  %v1300_v3 = vld [vmem:[%s2503_s8] sm:$0xff]  ;;  %v1301_v4 = vld [vmem:[%s2503_s8 + $0x8] sm:$0xff]  ;;  %v1459_v7 = vld [vmem:[%s2505_s10 + $0x10] sm:$0xff] }
  0x23   : > { %v1457_v5 = vld [vmem:[%s2505_s10] sm:$0xff]  ;;  %v1458_v6 = vld [vmem:[%s2505_s10 + $0x8] sm:$0xff]  ;;  %v1460_v8 = vld [vmem:[%s2505_s10 + $0x18] sm:$0xff] }
  0x24   : > { %v1461_v9 = vld [vmem:[%s2505_s10 + $0x20] sm:$0xff]  ;;  %v1462_v10 = vld [vmem:[%s2505_s10 + $0x28] sm:$0xff]  ;;  %v1463_v11 = vld [vmem:[%s2505_s10 + $0x30] sm:$0xff] }
  0x25   : > { %589 = vperm.xlu0 %2047, %v531_v19   ;;  %v1237_v12 = vld [vmem:[%s2501_s6] sm:$0xff]  ;;  %v1464_v13 = vld [vmem:[%s2505_s10 + $0x38] sm:$0xff] }
  0x26   : > { %594 = vperm.xlu1 %2048, %v532_v20   ;;  %v2069_v14 = vld [vmem:[%s2498_s3] sm:$0xff]  }
  0x27   : > { %1960 = vmatprep.mubr.bf16.mxu1 %v2069_v14  ;;  %v2073_v15 = vld [vmem:[%s2502_s7] sm:$0xff]  }
  0x28   : > { %1917 = vmatmul.mubr.msk.bf16.gmra.mxu0 %vm821_vm0, %v2056_v18 }
  0x29   : > { %1920 = vmatprep.mubr.msk.bf16.mxu0 %vm821_vm0, %v2057_v21  ;;  %699 = vperm.xlu0 %2047, %v553_v22  }
  0x2a   : > { %704 = vperm.xlu1 %2048, %v554_v23  }
  0x2d   : > { %579 = vperm.xlu0 %2047, %v529_v25  }
  0x2e   : > { %584 = vperm.xlu1 %2048, %v530_v26  }
  0x30   : > { %1921 = vmatmul.mubr.msk.bf16.gmra.mxu0 %vm821_vm0, %v2058_v24 }
  0x31   : > { %1924 = vmatprep.mubr.msk.bf16.mxu0 %vm821_vm0, %v2059_v27  ;;  %689 = vperm.xlu0 %2047, %v551_v28  }
  0x32   : > { %694 = vperm.xlu1 %2048, %v552_v29  }
  0x35   : > { %569 = vperm.xlu0 %2047, %v527_v31  }
  0x36   : > { %574 = vperm.xlu1 %2048, %v528_v32  }
  0x38   : > { %1925 = vmatmul.mubr.msk.bf16.gmra.mxu0 %vm821_vm0, %v2060_v30 }
  0x39   : > { %1928 = vmatprep.mubr.msk.bf16.mxu0 %vm821_vm0, %v2061_v33  ;;  %679 = vperm.xlu0 %2047, %v549_v34  }
  0x3a   : > { %684 = vperm.xlu1 %2048, %v550_v35  }
  0x3d   : > { %559 = vperm.xlu0 %2047, %v525_v37  }
  0x3e   : > { %564 = vperm.xlu1 %2048, %v526_v38  }
  0x40   : > { %1929 = vmatmul.mubr.msk.bf16.gmra.mxu0 %vm821_vm0, %v2062_v36 }
  0x41   : > { %1932 = vmatprep.mubr.msk.bf16.mxu0 %vm821_vm0, %v2063_v39  ;;  %669 = vperm.xlu0 %2047, %v547_v40  }
  0x42   : > { %674 = vperm.xlu1 %2048, %v548_v41  }
  0x45   : > { %659 = vperm.xlu0 %2047, %v545_v43  }
  0x46   : > { %664 = vperm.xlu1 %2048, %v546_v44  }
  0x48   : > { %1933 = vmatmul.mubr.msk.bf16.gmra.mxu0 %vm821_vm0, %v2064_v42 }
  0x49   : > { %1936 = vmatprep.mubr.msk.bf16.mxu0 %vm821_vm0, %v2065_v45  ;;  %649 = vperm.xlu0 %2047, %v543_v46  }
  0x4a   : > { %654 = vperm.xlu1 %2048, %v544_v47  }
  0x4d   : > { %639 = vperm.xlu0 %2047, %v541_v49  }
  0x4e   : > { %644 = vperm.xlu1 %2048, %v542_v50  }
  0x50   : > { %1937 = vmatmul.mubr.msk.bf16.gmra.mxu0 %vm821_vm0, %v2066_v48 }
  0x51   : > { %1940 = vmatprep.mubr.msk.bf16.mxu0 %vm821_vm0, %v2067_v51  ;;  %1127 = vperm.xlu0 %2047, %v1093_v52  }
  0x52   : > { %1132 = vperm.xlu1 %2048, %v1094_v53  }
  0x55   : > { %1117 = vperm.xlu0 %2047, %v1091_v55  }
  0x56   : > { %1122 = vperm.xlu1 %2048, %v1092_v56  }
  0x58   : > { %1941 = vmatmul.mubr.msk.bf16.gmra.mxu0 %vm821_vm0, %v2068_v54 }
  0x59   : > { %1107 = vperm.xlu0 %2047, %v1089_v57   ;;  %1996 = vmatprep.mubr.bf16.mxu0 %v2073_v15 }
  0x5a   : > { %1112 = vperm.xlu1 %2048, %v1090_v58  }
  0x5d   : > { %1097 = vperm.xlu0 %2047, %v1087_v59  }
  0x5e   : > { %1102 = vperm.xlu1 %2048, %v1088_v60  }
  0x61   : > { %1340 = vperm.xlu0 %2047, %v1306_v61  }
  0x62   : > { %1345 = vperm.xlu1 %2048, %v1307_v62  }
  0x65   : > { %1330 = vperm.xlu0 %2047, %v1304_v63  }
  0x66   : > { %1335 = vperm.xlu1 %2048, %v1305_v0  }
  0x69   : > { %1320 = vperm.xlu0 %2047, %v1302_v1  }
  0x6a   : > { %1325 = vperm.xlu1 %2048, %v1303_v2  }
  0x6d   : > { %1310 = vperm.xlu0 %2047, %v1300_v3  }
  0x6e   : > { %1315 = vperm.xlu1 %2048, %v1301_v4  }
  0x71   : > { %1467 = vperm.xlu0 %2047, %v1457_v5  }
  0x72   : > { %1472 = vperm.xlu1 %2048, %v1458_v6  }
  0x75   : > { %1477 = vperm.xlu0 %2047, %v1459_v7  }
  0x76   : > { %1482 = vperm.xlu1 %2048, %v1460_v8  }
  0x79   : > { %1487 = vperm.xlu0 %2047, %v1461_v9  }
  0x7a   : > { %1492 = vperm.xlu1 %2048, %v1462_v10  }
  0x7d   : > { %1497 = vperm.xlu0 %2047, %v1463_v11  }
  0x7e   : > { %1240 = vperm.xlu1 %2048, %v1237_v12  }
  0x81   : > { %1502 = vperm.xlu0 %2047, %v1464_v13  }
  0x8c   : > { %v630_v17 = vpop.permute.xlu0 %629 }
  0x8d   : > { %v620_v16 = vpop.permute.xlu1 %619 }
  0x90   : > { %v635_v19 = vpop.permute.xlu0 %634 }
  0x91   : > { %v625_v18 = vpop.permute.xlu1 %624 }
  0x94   : > { %v610_v21 = vpop.permute.xlu0 %609 }
  0x95   : > { %v615_v20 = vpop.permute.xlu1 %614 }
  0x98   : > { %v600_v25 = vpop.permute.xlu0 %599 }
  0x99   : > { %v605_v23 = vpop.permute.xlu1 %604 }
  0x9c   : > { %v2396_v30 = vpop.permute.xlu0 %709 }
  0x9d   : > { %v2394_v28 = vpop.permute.xlu1 %714 }
  0xa0   : > { %v590_v35 = vpop.permute.xlu0 %589 }
  0xa1   : > { %v595_v33 = vpop.permute.xlu1 %594 }
  0xa4   : > { %v2400_v40 = vpop.permute.xlu0 %699 }
  0xa5   : > { %v2398_v38 = vpop.permute.xlu1 %704 }
  0xa8   : > { %v580_v46 = vpop.permute.xlu0 %579 }
  0xa9   : > { %v585_v43 = vpop.permute.xlu1 %584 }
  0xac   : > { %v2406_v61 = vpop.permute.xlu0 %689 }
  0xad   : > { %v2402_v55 = vpop.permute.xlu1 %694 }
  0xb0   : > { %v570_v10 = vpop.permute.xlu0 %569 }
  0xb1   : > { %v575_v5 = vpop.permute.xlu1 %574 }
  0xe0   : > { %v2386_v22 = vpop.f32.mrf.mxu0 }
  0xe2   : > { %v2388_v24 = vpop.f32.mrf.mxu0 }
  0xe4   : > { %v2390_v26 = vpop.f32.mrf.mxu0 }
  0xe6   : > { %v2392_v27 = vpop.f32.mrf.mxu0 }
  0xe8   : > { %v1918_v29 = vpop.f32.mrf.mxu0 }
  0xe9   : > { %v929_v12 = vadd.f32 %v1918_v29, %v590_v35 }
  0xea   : > { %v920_v31 = vpop.f32.mrf.mxu0 }
  0xec   : > { %v1919_v32 = vpop.f32.mrf.mxu0 }
  0xed   : > { %v932_v7 = vadd.f32 %v1919_v32, %v595_v33  ;;  %v916_v32 = vadd.f32 %v2390_v26, %v575_v5 }
  0xee   : > { %v923_v34 = vpop.f32.mrf.mxu0 }
  0xef   : > { %v1038_v15 = vmax.f32 %v932_v7, 0.0 }
  0xf0   : > { %v1922_v36 = vpop.f32.mrf.mxu0 }
  0xf1   : > { %v945_v57 = vadd.f32 %v1922_v36, %v610_v21  ;;  %v921_v21 = vadd.f32 %v920_v31, %v580_v46  ;;  %v913_v36 = vadd.f32 %v2386_v22, %v570_v10 }
  0xf2   : > { %v936_v37 = vpop.f32.mrf.mxu0 }
  0xf3   : > { %v1041_v3 = vmax.f32 %v945_v57, 0.0  ;;  %v937_v4 = vadd.f32 %v936_v37, %v600_v25 }
  0xf4   : > { %v1923_v39 = vpop.f32.mrf.mxu0 }
  0xf5   : > { %v948_v51 = vadd.f32 %v1923_v39, %v615_v20  ;;  %v1039_v13 = vmax.f32 %v937_v4, 0.0  ;;  %v1037_v20 = vmax.f32 %v929_v12, 0.0 }
  0xf6   : > { %v939_v41 = vpop.f32.mrf.mxu0 }
  0xf7   : > { %v1042_v63 = vmax.f32 %v948_v51, 0.0  ;;  %v940_v0 = vadd.f32 %v939_v41, %v605_v23  ;;  %v680_v23 = vpop.permute.xlu0 %679  ;;  %v1066_v29 = vpack.c.bf16 %v1038_v15, %v1037_v20  ;;  %v1034_v41 = vmax.f32 %v916_v32, 0.0 }
  0xf8   : > { %v1926_v42 = vpop.f32.mrf.mxu0 }
  0xf9   : > { %v961_v45 = vadd.f32 %v1926_v42, %v630_v17  ;;  %v1068_v8 = vpack.c.bf16 %v1042_v63, %v1041_v3  ;;  %v1040_v9 = vmax.f32 %v940_v0, 0.0  ;;  %v2070_v63 = vld [vmem:[%s2498_s3 + $0x8] sm:$0xff]  }
  0xfa   : > { %v952_v44 = vpop.f32.mrf.mxu0 }
  0xfb   : > { %v953_v48 = vadd.f32 %v952_v44, %v620_v16  ;;  %v1045_v52 = vmax.f32 %v961_v45, 0.0  ;;  %v924_v16 = vadd.f32 %v923_v34, %v585_v43  ;;  %v1067_v17 = vpack.c.bf16 %v1040_v9, %v1039_v13  ;;  %v560_v43 = vpop.permute.xlu0 %559 }
  0xfc   : > { %v1927_v47 = vpop.f32.mrf.mxu0  ;;  %v1035_v34 = vmax.f32 %v921_v21, 0.0  ;;  %v1033_v45 = vmax.f32 %v913_v36, 0.0  ;;  %v905_v26 = vadd.f32 %v2388_v24, %v560_v43 }
  0xfd   : > { %v964_v49 = vadd.f32 %v1927_v47, %v635_v19  ;;  %v1043_v58 = vmax.f32 %v953_v48, 0.0  ;;  %v1036_v33 = vmax.f32 %v924_v16, 0.0 }
  0xfe   : > { %v955_v50 = vpop.f32.mrf.mxu0  ;;  %v1064_v47 = vpack.c.bf16 %v1034_v41, %v1033_v45  ;;  %v1031_v22 = vmax.f32 %v905_v26, 0.0  ;;  %v2112_v26 = vmov 0.0  }
  0xff   : > { %v1046_v53 = vmax.f32 %v964_v49, 0.0  ;;  %v956_v54 = vadd.f32 %v955_v50, %v625_v18  ;;  %v685_v18 = vpop.permute.xlu1 %684  ;;  %v1065_v31 = vpack.c.bf16 %v1036_v33, %v1035_v34 }
 0x100   : > { %v2404_v56 = vpop.f32.mrf.mxu0 }
 0x101   : > { %v1044_v59 = vmax.f32 %v956_v54, 0.0  ;;  %v1070_v60 = vpack.c.bf16 %v1046_v53, %v1045_v52 }
 0x102   : > { %v2408_v62 = vpop.f32.mrf.mxu0 }
 0x103   : > { %v1069_v1 = vpack.c.bf16 %v1044_v59, %v1043_v58  ;;  %1944 = vmatprep.subr.bf16.mxu1 %v1070_v60  ;;  %v565_v37 = vpop.permute.xlu1 %564 }
 0x104   : > { %v2410_v2 = vpop.f32.mrf.mxu0  ;;  %1945 = vmatpush3.bf16.msra.mxu1 %v1070_v60  ;;  %v908_v42 = vadd.f32 %v2392_v27, %v565_v37 }
 0x105   : > { %1946 = vmatprep.subr.bf16.mxu1 %v1069_v1 }
 0x106   : > { %v2412_v6 = vpop.f32.mrf.mxu0  ;;  %v1032_v48 = vmax.f32 %v908_v42, 0.0 }
 0x107   : > { %v675_v0 = vpop.permute.xlu1 %674 }
 0x108   : > { %v2414_v11 = vpop.f32.mrf.mxu0  ;;  %1947 = vmatpush3.bf16.msra.mxu1 %v1069_v1  ;;  %v1063_v51 = vpack.c.bf16 %v1032_v48, %v1031_v22 }
 0x109   : > { %1948 = vmatprep.subr.bf16.mxu1 %v1068_v8 }
 0x10a   : > { %v2416_v14 = vpop.f32.mrf.mxu0 }
 0x10b   : > { %v665_v9 = vpop.permute.xlu1 %664 }
 0x10c   : > { %v2418_v19 = vpop.f32.mrf.mxu0  ;;  %1949 = vmatpush3.bf16.msra.mxu1 %v1068_v8 }
 0x10d   : > { %1950 = vmatprep.subr.bf16.mxu1 %v1067_v17  ;;  %v996_v10 = vadd.f32 %v2418_v19, %v675_v0 }
 0x10e   : > { %v2420_v25 = vpop.f32.mrf.mxu0 }
 0x10f   : > { %v988_v20 = vadd.f32 %v2420_v25, %v665_v9 }
 0x110   : > { %v1938_v35 = vpop.f32.mrf.mxu0  ;;  %1951 = vmatpush3.bf16.msra.mxu1 %v1067_v17 }
 0x111   : > { %1952 = vmatprep.subr.bf16.mxu1 %v1066_v29  ;;  %v1052_v36 = vmax.f32 %v988_v20, 0.0 }
 0x112   : > { %v1000_v39 = vpop.f32.mrf.mxu0 }
 0x113   : > { %v1001_v8 = vadd.f32 %v1000_v39, %v680_v23  ;;  %v655_v23 = vpop.permute.xlu1 %654 }
 0x114   : > { %v1939_v44 = vpop.f32.mrf.mxu0  ;;  %1953 = vmatpush3.bf16.msra.mxu1 %v1066_v29  ;;  %v980_v33 = vadd.f32 %v2410_v2, %v655_v23 }
 0x115   : > { %1954 = vmatprep.subr.bf16.mxu1 %v1065_v31  ;;  %v1012_v57 = vadd.f32 %v1939_v44, %v2402_v55  ;;  %v670_v55 = vpop.permute.xlu0 %669  ;;  %v1055_v17 = vmax.f32 %v1001_v8, 0.0 }
 0x116   : > { %v1003_v46 = vpop.f32.mrf.mxu0  ;;  %v993_v16 = vadd.f32 %v2414_v11, %v670_v55  ;;  %v1050_v25 = vmax.f32 %v980_v33, 0.0 }
 0x117   : > { %v1058_v4 = vmax.f32 %v1012_v57, 0.0  ;;  %v1004_v5 = vadd.f32 %v1003_v46, %v685_v18  ;;  %v1054_v18 = vmax.f32 %v996_v10, 0.0  ;;  %v645_v37 = vpop.permute.xlu1 %644 }
 0x118   : > { %v1942_v49 = vpop.f32.mrf.mxu0  ;;  %1955 = vmatpush3.bf16.msra.mxu1 %v1065_v31  ;;  %v1053_v19 = vmax.f32 %v993_v16, 0.0  ;;  %v972_v39 = vadd.f32 %v2412_v6, %v645_v37  ;;  %v2075_v6 = vld [vmem:[%s2502_s7 + $0x10] sm:$0xff]  }
 0x119   : > { %1956 = vmatprep.subr.bf16.mxu1 %v1064_v47  ;;  %v1025_v52 = vadd.f32 %v1942_v49, %v2396_v30  ;;  %v2071_v30 = vld [vmem:[%s2498_s3 + $0x10] sm:$0xff]   ;;  %v1056_v13 = vmax.f32 %v1004_v5, 0.0  ;;  %v660_v15 = vpop.permute.xlu0 %659 }
 0x11a   : > { %v1016_v50 = vpop.f32.mrf.mxu0  ;;  %v985_v32 = vadd.f32 %v2416_v14, %v660_v15  ;;  %v1048_v2 = vmax.f32 %v972_v39, 0.0 }
 0x11b   : > { %v1017_v53 = vadd.f32 %v1016_v50, %v2400_v40  ;;  %v1061_v58 = vmax.f32 %v1025_v52, 0.0  ;;  %v1075_v21 = vpack.c.bf16 %v1056_v13, %v1055_v17  ;;  %v1236_v17 = vld [vmem:[%s2500_s5] sm:$0xf] }
 0x11c   : > { %v1943_v27 = vpop.f32.mrf.mxu0  ;;  %1957 = vmatpush3.bf16.msra.mxu1 %v1064_v47  ;;  %v1051_v34 = vmax.f32 %v985_v32, 0.0  ;;  %v1133_v47 = vpop.permute.xlu1 %1132 }
 0x11d   : > { %v1028_v54 = vadd.f32 %v1943_v27, %v2394_v28  ;;  %1958 = vmatprep.subr.bf16.mxu1 %v1063_v51  ;;  %v1009_v28 = vadd.f32 %v1938_v35, %v2406_v61  ;;  %v1059_v40 = vmax.f32 %v1017_v53, 0.0  ;;  %v2072_v61 = vld [vmem:[%s2498_s3 + $0x18] sm:$0xff]   ;;  %v650_v29 = vpop.permute.xlu0 %649  ;;  %v1074_v35 = vpack.c.bf16 %v1054_v18, %v1053_v19  ;;  %v2077_v18 = vld [vmem:[%s2504_s9] sm:$0xff]  }
 0x11e   : > { %v1019_v24 = vpop.f32.mrf.mxu0  ;;  %v977_v11 = vadd.f32 %v2404_v56, %v650_v29  ;;  %v1073_v41 = vpack.c.bf16 %v1052_v36, %v1051_v34  ;;  %v2074_v56 = vld [vmem:[%s2502_s7 + $0x8] sm:$0xff]  }
 0x11f   : > { %v1062_v59 = vmax.f32 %v1028_v54, 0.0  ;;  %v1020_v60 = vadd.f32 %v1019_v24, %v2398_v38  ;;  %v1057_v38 = vmax.f32 %v1009_v28, 0.0 }
 0x120   : > { %1959 = vmatpush3.bf16.msra.mxu1 %v1063_v51  ;;  %v1049_v31 = vmax.f32 %v977_v11, 0.0  ;;  %v1123_v51 = vpop.permute.xlu1 %1122 }
 0x121   : > { %v1078_v1 = vpack.c.bf16 %v1062_v59, %v1061_v58  ;;  %v1060_v3 = vmax.f32 %v1020_v60, 0.0  ;;  %v1076_v12 = vpack.c.bf16 %v1058_v4, %v1057_v38  ;;  %v640_v42 = vpop.permute.xlu0 %639  ;;  %1968 = vmatprep.subr.bf16.mxu1 %v2112_v26 }
 0x122   : > { %v969_v14 = vadd.f32 %v2408_v62, %v640_v42  ;;  %v1072_v43 = vpack.c.bf16 %v1050_v25, %v1049_v31  ;;  %v2076_v62 = vld [vmem:[%s2502_s7 + $0x18] sm:$0xff]  }
 0x123   : > { %v1077_v7 = vpack.c.bf16 %v1060_v3, %v1059_v40  ;;  %1961 = vmatmul.mubr.bf16.vlgmr.msra.gmra.mxu1 %v2070_v63  ;;  %1980 = vmatprep.subr.bf16.mxu0 %v1078_v1 }
 0x124   : > { %1981 = vmatpush3.bf16.msra.mxu0 %v1078_v1  ;;  %1964 = vmatprep.mubr.bf16.mxu1 %v2071_v30  ;;  %v1047_v44 = vmax.f32 %v969_v14, 0.0  ;;  %v1113_v58 = vpop.permute.xlu1 %1112 }
 0x125   : > { %1982 = vmatprep.subr.bf16.mxu0 %v1077_v7  ;;  %v1128_v49 = vpop.permute.xlu0 %1127 }
 0x126   : > { %v1071_v45 = vpack.c.bf16 %v1048_v2, %v1047_v44 }
 0x128   : > { %1983 = vmatpush3.bf16.msra.mxu0 %v1077_v7  ;;  %v1103_v5 = vpop.permute.xlu1 %1102 }
 0x129   : > { %1984 = vmatprep.subr.bf16.mxu0 %v1076_v12  ;;  %v1118_v27 = vpop.permute.xlu0 %1117 }
 0x12b   : > { %1965 = vmatmul.mubr.bf16.gmra.mxu1 %v2072_v61 }
 0x12c   : > { %1985 = vmatpush3.bf16.msra.mxu0 %v1076_v12  ;;  %1976 = vmatprep.mubr.msk.bf16.mxu1 %vm2113_vm1, %v2112_v26  ;;  %v1346_v20 = vpop.permute.xlu1 %1345 }
 0x12d   : > { %1986 = vmatprep.subr.bf16.mxu0 %v1075_v21  ;;  %v1108_v28 = vpop.permute.xlu0 %1107 }
 0x130   : > { %1987 = vmatpush3.bf16.msra.mxu0 %v1075_v21  ;;  %v1336_v29 = vpop.permute.xlu1 %1335 }
 0x131   : > { %1988 = vmatprep.subr.bf16.mxu0 %v1074_v35  ;;  %v1098_v9 = vpop.permute.xlu0 %1097 }
 0x134   : > { %1989 = vmatpush3.bf16.msra.mxu0 %v1074_v35  ;;  %v1326_v37 = vpop.permute.xlu1 %1325 }
 0x135   : > { %1990 = vmatprep.subr.bf16.mxu0 %v1073_v41  ;;  %v1341_v23 = vpop.permute.xlu0 %1340 }
 0x138   : > { %1991 = vmatpush3.bf16.msra.mxu0 %v1073_v41 }
 0x139   : > { %1992 = vmatprep.subr.bf16.mxu0 %v1072_v43  ;;  %v1331_v35 = vpop.permute.xlu0 %1330 }
 0x13c   : > { %1993 = vmatpush3.bf16.msra.mxu0 %v1072_v43 }
 0x13d   : > { %1994 = vmatprep.subr.bf16.mxu0 %v1071_v45  ;;  %v1321_v42 = vpop.permute.xlu0 %1320 }
 0x140   : > { %1995 = vmatpush3.bf16.msra.mxu0 %v1071_v45 }
 0x143   : > { %1997 = vmatmul.mubr.bf16.vlgmr.msra.gmra.mxu0 %v2074_v56 }
 0x144   : > { %2000 = vmatprep.mubr.bf16.mxu0 %v2075_v6 }
 0x14b   : > { %2001 = vmatmul.mubr.bf16.gmra.mxu0 %v2076_v62 }
 0x1e3   : > { %v1962_v46 = vpop.f32.mrf.mxu1 }
 0x1e4   : > { %v1202_v55 = vadd.f32 %v1962_v46, %v1108_v28 }
 0x1e5   : > { %v1193_v48 = vpop.f32.mrf.mxu1 }
 0x1e6   : > { %v1226_v10 = vmax.f32 %v1202_v55, 0.0  ;;  %v1194_v12 = vadd.f32 %v1193_v48, %v1098_v9 }
 0x1e7   : > { %v1963_v22 = vpop.f32.mrf.mxu1 }
 0x1e8   : > { %v1205_v40 = vadd.f32 %v1963_v22, %v1113_v58  ;;  %v1224_v15 = vmax.f32 %v1194_v12, 0.0 }
 0x1e9   : > { %v1196_v50 = vpop.f32.mrf.mxu1 }
 0x1ea   : > { %v1227_v7 = vmax.f32 %v1205_v40, 0.0  ;;  %v1197_v38 = vadd.f32 %v1196_v50, %v1103_v5 }
 0x1eb   : > { %v1966_v52 = vpop.f32.mrf.mxu1 }
 0x1ec   : > { %v1218_v54 = vadd.f32 %v1966_v52, %v1128_v49  ;;  %v1233_v13 = vpack.c.bf16 %v1227_v7, %v1226_v10  ;;  %v1225_v61 = vmax.f32 %v1197_v38, 0.0  ;;  %v1311_v49 = vpop.permute.xlu0 %1310 }
 0x1ed   : > { %v1209_v53 = vpop.f32.mrf.mxu1 }
 0x1ee   : > { %v1230_v60 = vmax.f32 %v1218_v54, 0.0  ;;  %v1210_v63 = vadd.f32 %v1209_v53, %v1118_v27  ;;  %v1232_v16 = vpack.c.bf16 %v1225_v61, %v1224_v15  ;;  %v2078_v54 = vld [vmem:[%s2504_s9 + $0x8] sm:$0xff]  }
 0x1ef   : > { %v1967_v24 = vpop.f32.mrf.mxu1 }
 0x1f0   : > { %v1221_v57 = vadd.f32 %v1967_v24, %v1133_v47  ;;  %v1228_v4 = vmax.f32 %v1210_v63, 0.0  ;;  %v2079_v24 = vld [vmem:[%s2504_s9 + $0x10] sm:$0xff]   ;;  %v1468_v7 = vpop.permute.xlu0 %1467 }
 0x1f1   : > { %v1212_v59 = vpop.f32.mrf.mxu1 }
 0x1f2   : > { %v1231_v0 = vmax.f32 %v1221_v57, 0.0  ;;  %v1213_v30 = vadd.f32 %v1212_v59, %v1123_v51  ;;  %v2080_v57 = vld [vmem:[%s2504_s9 + $0x18] sm:$0xff]  }
 0x1f4   : > { %v1235_v1 = vpack.c.bf16 %v1231_v0, %v1230_v60  ;;  %v1229_v3 = vmax.f32 %v1213_v30, 0.0  ;;  %v1478_v38 = vpop.permute.xlu0 %1477 }
 0x1f6   : > { %1969 = vmatpush3.bf16.msra.mxu1 %v1235_v1  ;;  %v1234_v8 = vpack.c.bf16 %v1229_v3, %v1228_v4 }
 0x1f7   : > { %1970 = vmatprep.subr.bf16.mxu1 %v2112_v26 }
 0x1f8   : > { %v1488_v12 = vpop.permute.xlu0 %1487 }
 0x1fa   : > { %1971 = vmatpush3.bf16.msra.mxu1 %v1234_v8 }
 0x1fb   : > { %1972 = vmatprep.subr.bf16.mxu1 %v2112_v26 }
 0x1fe   : > { %1973 = vmatpush3.bf16.msra.mxu1 %v1233_v13 }
 0x1ff   : > { %1974 = vmatprep.subr.bf16.mxu1 %v2112_v26  ;;  %v1316_v26 = vpop.permute.xlu1 %1315 }
 0x202   : > { %1975 = vmatpush3.bf16.msra.mxu1 %v1232_v16 }
 0x203   : > { %v1998_v21 = vpop.f32.mrf.mxu0  ;;  %v1473_v58 = vpop.permute.xlu1 %1472 }
 0x204   : > { %v1415_v45 = vadd.f32 %v1998_v21, %v1321_v42 }
 0x205   : > { %1977 = vmatmul.mubr.msk.bf16.vlgmr.msra.gmra.mxu1 %vm821_vm0, %v1236_v17  ;;  %v1406_v19 = vpop.f32.mrf.mxu0 }
 0x206   : > { %2012 = vmatprep.mubr.msk.bf16.mxu1 %vm821_vm0, %v2077_v18  ;;  %v1439_v22 = vmax.f32 %v1415_v45, 0.0  ;;  %v1407_v50 = vadd.f32 %v1406_v19, %v1311_v49  ;;  %v1498_v19 = vpop.permute.xlu0 %1497 }
 0x207   : > { %v1999_v32 = vpop.f32.mrf.mxu0  ;;  %v1483_v59 = vpop.permute.xlu1 %1482 }
 0x208   : > { %v1418_v14 = vadd.f32 %v1999_v32, %v1326_v37  ;;  %v1437_v27 = vmax.f32 %v1407_v50, 0.0 }
 0x209   : > { %v1409_v33 = vpop.f32.mrf.mxu0 }
 0x20a   : > { %v1440_v46 = vmax.f32 %v1418_v14, 0.0  ;;  %v1410_v47 = vadd.f32 %v1409_v33, %v1316_v26 }
 0x20b   : > { %v2002_v36 = vpop.f32.mrf.mxu0  ;;  %v1493_v60 = vpop.permute.xlu1 %1492 }
 0x20c   : > { %v1431_v34 = vadd.f32 %v2002_v36, %v1341_v23  ;;  %v1446_v51 = vpack.c.bf16 %v1440_v46, %v1439_v22  ;;  %v1438_v52 = vmax.f32 %v1410_v47, 0.0 }
 0x20d   : > { %v1422_v11 = vpop.f32.mrf.mxu0 }
 0x20e   : > { %v1423_v39 = vadd.f32 %v1422_v11, %v1331_v35  ;;  %v1443_v43 = vmax.f32 %v1431_v34, 0.0  ;;  %v1445_v53 = vpack.c.bf16 %v1438_v52, %v1437_v27 }
 0x20f   : > { %v2003_v25 = vpop.f32.mrf.mxu0  ;;  %v1241_v63 = vpop.permute.xlu1 %1240 }
 0x210   : > { %v1434_v41 = vadd.f32 %v2003_v25, %v1346_v20  ;;  %v1441_v56 = vmax.f32 %v1423_v39, 0.0 }
 0x211   : > { %v1425_v31 = vpop.f32.mrf.mxu0 }
 0x212   : > { %v1444_v2 = vmax.f32 %v1434_v41, 0.0  ;;  %v1426_v44 = vadd.f32 %v1425_v31, %v1336_v29  ;;  %v1503_v31 = vpop.permute.xlu0 %1502 }
 0x214   : > { %v1448_v6 = vpack.c.bf16 %v1444_v2, %v1443_v43  ;;  %v1442_v62 = vmax.f32 %v1426_v44, 0.0 }
 0x216   : > { %v1447_v48 = vpack.c.bf16 %v1442_v62, %v1441_v56  ;;  %2004 = vmatprep.subr.bf16.mxu1 %v1448_v6 }
 0x217   : > { %2005 = vmatpush3.bf16.msra.mxu1 %v1448_v6 }
 0x218   : > { %2006 = vmatprep.subr.bf16.mxu1 %v1447_v48 }
 0x21b   : > { %2007 = vmatpush3.bf16.msra.mxu1 %v1447_v48 }
 0x21c   : > { %2008 = vmatprep.subr.bf16.mxu1 %v1446_v51 }
 0x21f   : > { %2009 = vmatpush3.bf16.msra.mxu1 %v1446_v51 }
 0x220   : > { %2010 = vmatprep.subr.bf16.mxu1 %v1445_v53 }
 0x223   : > { %2011 = vmatpush3.bf16.msra.mxu1 %v1445_v53 }
 0x226   : > { %2013 = vmatmul.mubr.msk.bf16.vlgmr.msra.gmra.mxu1 %vm821_vm0, %v2078_v54 }
 0x227   : > { %2016 = vmatprep.mubr.msk.bf16.mxu1 %vm821_vm0, %v2079_v24 }
 0x22e   : > { %2017 = vmatmul.mubr.msk.bf16.gmra.mxu1 %vm821_vm0, %v2080_v57 }
 0x2c5   : > { %v1280_v0 = vpop.f32.mrf.mxu1 }
 0x2c6   : > { %v1281_v30 = vadd.f32 %v1280_v0, %v1241_v63 }
 0x2c7   : > { %v1978_v28 = vpop.f32.mrf.mxu1 }
 0x2c8   : > { %v1286_v40 = vsub.f32 0.0, %v1281_v30 }
 0x2c9   : > { %v1283_v1 = vpop.f32.mrf.mxu1 }
 0x2ca   : > { %v1287_v3 = vmul.f32 1.442695, %v1286_v40 }
 0x2cb   : > { %v1979_v55 = vpop.f32.mrf.mxu1 }
 0x2cc   : > { %2081 = vpow2.f32 %v1287_v3 }
 0x2d9   : > { %v2082_v4 = vpop.eup %2081 }
 0x2da   : > { %v1289_v5 = vadd.f32 1.0, %v2082_v4 }
 0x2dc   : > { %2083 = vrcp.f32 %v1289_v5 }
 0x2e6   : > { %v2014_v8 = vpop.f32.mrf.mxu1 }
 0x2e7   : > { %v1580_v16 = vadd.f32 %v2014_v8, %v1478_v38 }
 0x2e8   : > { %v1571_v9 = vpop.f32.mrf.mxu1 }
 0x2e9   : > { %v2084_v10 = vpop.eup %2083  ;;  %v1572_v61 = vadd.f32 %v1571_v9, %v1468_v7  ;;  %v1604_v29 = vmul.f32 %v1580_v16, %v1580_v16 }
 0x2ea   : > { %1291 = vst [vmem:[%s475_s15] sm:$0xff] %v2084_v10  ;;  %v2015_v13 = vpop.f32.mrf.mxu1 }
 0x2eb   : > { %v1602_v20 = vmul.f32 %v1572_v61, %v1572_v61  ;;  %v1583_v21 = vadd.f32 %v2015_v13, %v1483_v59 }
 0x2ec   : > { %v1574_v15 = vpop.f32.mrf.mxu1 }
 0x2ed   : > { %v1575_v17 = vadd.f32 %v1574_v15, %v1473_v58  ;;  %v1605_v11 = vmul.f32 %v1583_v21, %v1583_v21 }
 0x2ee   : > { %v2018_v18 = vpop.f32.mrf.mxu1 }
 0x2ef   : > { %v1603_v23 = vmul.f32 %v1575_v17, %v1575_v17  ;;  %v1596_v25 = vadd.f32 %v2018_v18, %v1498_v19 }
 0x2f0   : > { %v1587_v32 = vpop.f32.mrf.mxu1 }
 0x2f1   : > { %v1610_v33 = vadd.f32 %v1603_v23, %v1602_v20  ;;  %v1588_v35 = vadd.f32 %v1587_v32, %v1488_v12  ;;  %v1608_v44 = vmul.f32 %v1596_v25, %v1596_v25 }
 0x2f2   : > { %v2019_v36 = vpop.f32.mrf.mxu1 }
 0x2f3   : > { %v1611_v34 = vadd.f32 %v1610_v33, %v1604_v29  ;;  %v1606_v39 = vmul.f32 %v1588_v35, %v1588_v35  ;;  %v1599_v43 = vadd.f32 %v2019_v36, %v1503_v31 }
 0x2f4   : > { %v1590_v37 = vpop.f32.mrf.mxu1 }
 0x2f5   : > { %v1612_v41 = vadd.f32 %v1611_v34, %v1605_v11  ;;  %v1591_v42 = vadd.f32 %v1590_v37, %v1493_v60  ;;  %v1609_v56 = vmul.f32 %v1599_v43, %v1599_v43 }
 0x2f7   : > { %v1613_v14 = vadd.f32 %v1612_v41, %v1606_v39  ;;  %v1607_v2 = vmul.f32 %v1591_v42, %v1591_v42 }
 0x2f9   : > { %v1614_v45 = vadd.f32 %v1613_v14, %v1607_v2 }
 0x2fb   : > { %v1615_v6 = vadd.f32 %v1614_v45, %v1608_v44 }
 0x2fd   : > { %v1616_v62 = vadd.f32 %v1615_v6, %v1609_v56 }
 0x2ff   : > { %v1617_v26 = vrot.slane %v1616_v62, 4 }
 0x301   : > { %v1618_v46 = vadd.f32 %v1617_v26, %v1616_v62 }
 0x303   : > { %v1619_v47 = vrot.slane %v1618_v46, 2 }
 0x305   : > { %v1620_v48 = vadd.f32 %v1619_v47, %v1618_v46 }
 0x307   : > { %v1621_v49 = vrot.slane %v1620_v48, 1 }
 0x309   : > { %v1622_v22 = vadd.f32 %v1621_v49, %v1620_v48 }
 0x30b   : > { %v1623_v50 = vmax.f32 %v1622_v22, 1e-24 }
 0x30d   : > { %2085 = vrsqrt.f32 %v1623_v50 }
 0x31a   : > { %v2086_v51 = vpop.eup %2085 }
 0x31b   : > { %v1625_v52 = vmul.f32 %v2086_v51, %v1572_v61  ;;  %v1626_v27 = vmul.f32 %v2086_v51, %v1575_v17  ;;  %v1627_v53 = vmul.f32 %v2086_v51, %v1580_v16  ;;  %v1628_v54 = vmul.f32 %v2086_v51, %v1583_v21 }
 0x31c   : > { %v1629_v24 = vmul.f32 %v2086_v51, %v1588_v35  ;;  %v1630_v57 = vmul.f32 %v2086_v51, %v1591_v42  ;;  %v1631_v58 = vmul.f32 %v2086_v51, %v1596_v25  ;;  %v1632_v59 = vmul.f32 %v2086_v51, %v1599_v43 }
 0x31d   : > { %1633 = vst [vmem:[%s483_s20] sm:$0xff] %v1625_v52  ;;  %1634 = vst [vmem:[%s483_s20 + $0x8] sm:$0xff] %v1626_v27 }
 0x31e   : > { %1635 = vst [vmem:[%s483_s20 + $0x10] sm:$0xff] %v1627_v53  ;;  %1636 = vst [vmem:[%s483_s20 + $0x18] sm:$0xff] %v1628_v54 }
 0x31f   : > { %1637 = vst [vmem:[%s483_s20 + $0x20] sm:$0xff] %v1629_v24  ;;  %1638 = vst [vmem:[%s483_s20 + $0x28] sm:$0xff] %v1630_v57 }
 0x320   : > { %1639 = vst [vmem:[%s483_s20 + $0x30] sm:$0xff] %v1631_v58  ;;  %1640 = vst [vmem:[%s483_s20 + $0x38] sm:$0xff] %v1632_v59 }
 0x321 PF: > { %s23_s23 = sadd.s32 1, %s2109_s23   ;;  %s2508_s21 = smov %s2105_s22 }
 0x322   : > { %p20_p5 = scmp.ge.s32.totalorder %s23_s23, 4   ;;  %s2509_s22 = smov %s2511_s24 }
 0x324   :  { %22 = sbr.rel (!%p20_p5) target bundleno = 2 (0x2), region = 109 }

// kernel: mamba_i2p_cla_forward.2
= control target key start
LH: loop header
LB: loop body
LE: loop exit
PB: predicated region body
PF: predicated region fallthrough
CT: control target
= control target key end

     0   :  { %s7482_s0 = inlined_call_operand.vmem [shape: bf16[2,128,128], index: 0, kind: input, shape index: {}]   ;;  %s7483_s1 = inlined_call_operand.vmem [shape: bf16[896,128], index: 1, kind: input, shape index: {}]   ;;  %s7484_s2 = inlined_call_operand.vmem [shape: f32[2,896,1], index: 2, kind: input, shape index: {}]   ;;  %s7485_s3 = inlined_call_operand.vmem [shape: bf16[64,128], index: 3, kind: input, shape index: {}]   ;;  %s7486_s4 = inlined_call_operand.vmem [shape: f32[64,1], index: 4, kind: input, shape index: {}]   ;;  %s7487_s5 = inlined_call_operand.vmem [shape: bf16[8,64], index: 5, kind: input, shape index: {}]   ;;  %s7488_s6 = inlined_call_operand.vmem [shape: f32[8,1], index: 6, kind: input, shape index: {}]   ;;  %s7489_s7 = inlined_call_operand.vmem [shape: bf16[256,512], index: 7, kind: input, shape index: {}]   ;;  %s7490_s8 = inlined_call_operand.vmem [shape: f32[256,1], index: 8, kind: input, shape index: {}]   ;;  %s7491_s9 = inlined_call_operand.vmem [shape: bf16[16,256], index: 9, kind: input, shape index: {}]   ;;  %s7492_s10 = inlined_call_operand.vmem [shape: f32[16,1], index: 10, kind: input, shape index: {}]   ;;  %s7493_s11 = inlined_call_operand.vmem [shape: bf16[128,256], index: 11, kind: input, shape index: {}]   ;;  %s7494_s12 = inlined_call_operand.vmem [shape: f32[128,1], index: 12, kind: input, shape index: {}]   ;;  %s7495_s13 = inlined_call_operand.vmem [shape: bf16[64,128], index: 13, kind: input, shape index: {}]   ;;  %s7496_s14 = inlined_call_operand.vmem [shape: f32[64,1], index: 14, kind: input, shape index: {}]   ;;  %s7497_s15 = inlined_call_operand.vmem [shape: f32[2,8,128], index: 15, kind: output, shape index: {0}]   ;;  %s7498_s16 = inlined_call_operand.hbm [shape: f32[2,16,128], index: 16, kind: output, shape index: {1}]   ;;  %s7499_s17 = inlined_call_operand.hbm [shape: f32[2,64,128], index: 17, kind: output, shape index: {2}]  }
   0x1   :  { %7511 = sst [smem:[#allocation134_spill]] %s7482_s0 }
   0x2   :  { %7512 = sst [smem:[#allocation135_spill]] %s7483_s1 }
   0x3   :  { %7513 = sst [smem:[#allocation136_spill]] %s7484_s2 }
   0x4   :  { %23 = vsyncpa [#allocation3], 0 }
   0x5   :  { %25 = vsyncpa [#allocation3 + $0x1], 0 }
   0x6   :  { %26 = vsyncpa [#allocation5], 0 }
   0x7   :  { %28 = vsyncpa [#allocation5 + $0x1], 0  ;;  %s5655_s24 = smov 0   ;;  %s5657_s25 = smov 0  }
   0x8   :  { %s5659_s26 = smov 0   ;;  %s5661_s27 = smov 0  }
   0x9   :  { %s5663_s28 = smov 0   ;;  %s5665_s29 = smov 0  }
   0xa LB: > { %7514 = sst [smem:[#allocation8_spill]] %s5536_s24  ;;  %s4407_s0 = sadd.s32 4294967295, %s5556_s29   ;;  %s5556_s29 = sphi %s5665_s29, %s34_s29   ;;  %s5552_s28 = sphi %s5663_s28, %s7793_s28   ;;  %s5548_s27 = sphi %s5661_s27, %s7792_s27   ;;  %s5544_s26 = sphi %s5659_s26, %s7791_s26   ;;  %s5540_s25 = sphi %s5657_s25, %s7795_s25   ;;  %s5536_s24 = sphi %s5655_s24, %s7794_s24  }
   0xb   : > { %7515 = sst [smem:[#allocation9_spill]] %s5544_s26  ;;  %s4408_s30 = sadd.s32 4294967294, %s5556_s29  }
   0xc   : > { %7516 = sst [smem:[#allocation10_spill]] %s5552_s28  ;;  %s46_s18 = sadd.s32 1, %s5552_s28 }
   0xd   : > { %7517 = sst [smem:[#allocation11_spill]] %s5556_s29  ;;  %s410_s19 = sadd.s32 1, %s5544_s26 }
   0xe   : > { %p48_p0 = scmp.ge.s32.totalorder %s46_s18, 2  ;;  %p420_p1 = scmp.ne.s32.totalorder %s5544_s26, %s5540_s25 }
   0xf   : > { %p421_p2 = scmp.eq.s32.totalorder %s4407_s0, 1  ;;  %p426_p3 = scmp.ne.s32.totalorder %s5540_s25, %s5536_s24 }
  0x10   : > { %s7797_s18 = smov (%p48_p0, %s46_s18), 0  ;;  %p427_p5 = scmp.eq.s32.totalorder %s4408_s30, 1 }
  0x11   : > { %7518 = sst [smem:[#allocation12_spill]] %s7797_s18  ;;  %p5695_p4 = por %p421_p2, %p420_p1 }
  0x12   : > { %s405_s20 = ssub.s32 %s5552_s28, %s7797_s18  ;;  %p4411_p6 = scmp.ge.s32.totalorder %s5556_s29, 1 }
  0x13   : > { %p408_p7 = scmp.eq.s32.totalorder %s405_s20, 0  ;;  %p5702_p8 = por %p427_p5, %p426_p3 }
  0x14   : > { %p531_p9 = scmp.lt.s32.totalorder %s5556_s29, 3 }
  0x15   : > { %s7520_s21 = scalar_select %p5702_p8, 1, 0 }
  0x16   : > { %s5708_s22 = scalar_select %p408_p7, %s5544_s26, %s410_s19  }
  0x17   : > { %7521 = sst [smem:[#allocation13_spill]] %s7520_s21  ;;  %p532_p10 = pnand %p4411_p6, %p531_p9 }
  0x18   : > { %7522 = sst [smem:[#allocation14_spill]] %s5708_s22 }
  0x19   : > { %535 = sbr.rel (%p532_p10) target bundleno = 1667 (0x683), region = 80 }
  0x1e   : > { %p603_p11 = scmp.lt.s32.totalorder %s5548_s27, 1  ;;  %v5558_v0 = vmov 0   ;;  %s7523_s30 = sld [smem:[#allocation135_spill]]  ;;  %v2472_v26 = vld [vmem:[%s7486_s4 + $0x38] sm:$0xff]  ;;  %v2471_v27 = vld [vmem:[%s7486_s4 + $0x30] sm:$0xff]  ;;  %v2470_v30 = vld [vmem:[%s7486_s4 + $0x28] sm:$0xff] }
  0x1f   : > { %5242 = vset.pattern.permute.xlu1 %v5558_v0  ;;  %5241 = vset.pattern.permute.xlu0 %v5558_v0  ;;  %s7524_s26 = sld [smem:[#allocation134_spill]]  ;;  %v2469_v31 = vld [vmem:[%s7486_s4 + $0x20] sm:$0xff]  ;;  %v2468_v32 = vld [vmem:[%s7486_s4 + $0x18] sm:$0xff]  ;;  %v2467_v33 = vld [vmem:[%s7486_s4 + $0x10] sm:$0xff]  ;;  %vm5560_vm0 = vmmov 0   ;;  %vm2621_vm1 = vcmask 523264  }
  0x20   : > { %s5715_s20 = scalar_select %p603_p11, %s5548_s27, 1  ;;  %v2466_v36 = vld [vmem:[%s7486_s4 + $0x8] sm:$0xff]  ;;  %v2465_v37 = vld [vmem:[%s7486_s4] sm:$0xff] }
  0x21   : > { %s7525_s2 = sld [smem:[#allocation136_spill]]  ;;  %s5561_s29 = smov [#allocation2]  }
  0x22   : > { %s5175_s18 = smul.u32 896, %s5715_s20  ;;  %s4581_s19 = sshll.u32 %s5715_s20, 6 }
  0x24   : > { %v5251_v1 = vld [vmem:[%s7523_s30] sm:$0xff]   ;;  %v5252_v28 = vld [vmem:[%s7523_s30 + $0x8] sm:$0xff]   ;;  %v5253_v29 = vld [vmem:[%s7523_s30 + $0x10] sm:$0xff]  }
  0x25   : > { %5003 = vmatprep.mubr.bf16.mxu0 %v5251_v1  ;;  %s5722_s21 = scalar_lea.vmem %s7524_s26, %s4581_s19  ;;  %v5254_v34 = vld [vmem:[%s7523_s30 + $0x18] sm:$0xff]   ;;  %v5255_v35 = vld [vmem:[%s7523_s30 + $0x20] sm:$0xff]   ;;  %v5256_v40 = vld [vmem:[%s7523_s30 + $0x28] sm:$0xff]   ;;  %s4417_s26 = sshll.u32 %s5715_s20, 3 }
  0x26   : > { %v5243_v2 = vld [vmem:[%s5722_s21 + $0x38] sm:$0xff]   ;;  %v5244_v7 = vld [vmem:[%s5722_s21 + $0x30] sm:$0xff]   ;;  %v5245_v8 = vld [vmem:[%s5722_s21 + $0x28] sm:$0xff]   ;;  %s7353_s20 = sand.u32 1, %s5540_s25  }
  0x27   : > { %s5727_s23 = scalar_lea.vmem %s7525_s2, %s5175_s18  ;;  %4987 = vmatprep.subr.bf16.mxu0 %v5243_v2  ;;  %v5246_v11 = vld [vmem:[%s5722_s21 + $0x20] sm:$0xff]   ;;  %v5247_v14 = vld [vmem:[%s5722_s21 + $0x18] sm:$0xff]   ;;  %v5248_v17 = vld [vmem:[%s5722_s21 + $0x10] sm:$0xff]   ;;  %s622_s18 = scalar_lea.vmem %s7497_s15, %s4417_s26 }
  0x28   : > { %v766_v3 = vld [vmem:[%s5727_s23 + $0x70] sm:$0xff]  ;;  %v764_v4 = vld [vmem:[%s5727_s23 + $0x60] sm:$0xff]  ;;  %v767_v5 = vld [vmem:[%s5727_s23 + $0x78] sm:$0xff]  ;;  %4988 = vmatpush3.bf16.msra.mxu0 %v5243_v2  ;;  %s4412_s19 = sshll.u32 %s7353_s20, 4  ;;  %s4582_s2 = sshll.u32 %s5548_s27, 8 }
  0x29   : > { %936 = vperm.xlu0 %5241, %v766_v3   ;;  %926 = vperm.xlu1 %5242, %v764_v4   ;;  %v765_v6 = vld [vmem:[%s5727_s23 + $0x68] sm:$0xff]  ;;  %v763_v9 = vld [vmem:[%s5727_s23 + $0x58] sm:$0xff]  ;;  %v762_v10 = vld [vmem:[%s5727_s23 + $0x50] sm:$0xff] }
  0x2a   : > { %4989 = vmatprep.subr.bf16.mxu0 %v5244_v7  ;;  %v761_v12 = vld [vmem:[%s5727_s23 + $0x48] sm:$0xff]  ;;  %v760_v13 = vld [vmem:[%s5727_s23 + $0x40] sm:$0xff]  ;;  %v759_v15 = vld [vmem:[%s5727_s23 + $0x38] sm:$0xff] }
  0x2b   : > { %v758_v16 = vld [vmem:[%s5727_s23 + $0x30] sm:$0xff]  ;;  %v757_v18 = vld [vmem:[%s5727_s23 + $0x28] sm:$0xff]  ;;  %v756_v19 = vld [vmem:[%s5727_s23 + $0x20] sm:$0xff] }
  0x2c   : > { %4990 = vmatpush3.bf16.msra.mxu0 %v5244_v7  ;;  %v5249_v20 = vld [vmem:[%s5722_s21 + $0x8] sm:$0xff]   ;;  %v755_v21 = vld [vmem:[%s5727_s23 + $0x18] sm:$0xff]  ;;  %v754_v22 = vld [vmem:[%s5727_s23 + $0x10] sm:$0xff] }
  0x2d   : > { %941 = vperm.xlu0 %5241, %v767_v5   ;;  %931 = vperm.xlu1 %5242, %v765_v6   ;;  %v5250_v23 = vld [vmem:[%s5722_s21] sm:$0xff]   ;;  %v753_v24 = vld [vmem:[%s5727_s23 + $0x8] sm:$0xff]  ;;  %v799_v38 = vld [vmem:[%s5727_s23 + $0x178] sm:$0xff] }
  0x2e   : > { %4991 = vmatprep.subr.bf16.mxu0 %v5245_v8  ;;  %v752_v25 = vld [vmem:[%s5727_s23] sm:$0xff]  ;;  %v798_v39 = vld [vmem:[%s5727_s23 + $0x170] sm:$0xff]  ;;  %v783_v42 = vld [vmem:[%s5727_s23 + $0xf8] sm:$0xff] }
  0x2f   : > { %v5257_v41 = vld [vmem:[%s7523_s30 + $0x30] sm:$0xff]   ;;  %v797_v44 = vld [vmem:[%s5727_s23 + $0x168] sm:$0xff]  ;;  %v796_v45 = vld [vmem:[%s5727_s23 + $0x160] sm:$0xff] }
  0x30   : > { %4992 = vmatpush3.bf16.msra.mxu0 %v5245_v8  ;;  %v782_v43 = vld [vmem:[%s5727_s23 + $0xf0] sm:$0xff]  ;;  %v5258_v46 = vld [vmem:[%s7523_s30 + $0x38] sm:$0xff]   ;;  %v5259_v47 = vld [vmem:[%s7523_s30 + $0x40] sm:$0xff]  }
  0x31   : > { %921 = vperm.xlu1 %5242, %v763_v9   ;;  %916 = vperm.xlu0 %5241, %v762_v10   ;;  %v781_v48 = vld [vmem:[%s5727_s23 + $0xe8] sm:$0xff]  ;;  %v780_v49 = vld [vmem:[%s5727_s23 + $0xe0] sm:$0xff]  ;;  %v795_v50 = vld [vmem:[%s5727_s23 + $0x158] sm:$0xff] }
  0x32   : > { %4993 = vmatprep.subr.bf16.mxu0 %v5246_v11  ;;  %v794_v51 = vld [vmem:[%s5727_s23 + $0x150] sm:$0xff]  ;;  %v5260_v52 = vld [vmem:[%s7523_s30 + $0x48] sm:$0xff]   ;;  %v779_v54 = vld [vmem:[%s5727_s23 + $0xd8] sm:$0xff] }
  0x33   : > { %v5261_v53 = vld [vmem:[%s7523_s30 + $0x50] sm:$0xff]   ;;  %v793_v56 = vld [vmem:[%s5727_s23 + $0x148] sm:$0xff]  ;;  %v792_v57 = vld [vmem:[%s5727_s23 + $0x140] sm:$0xff] }
  0x34   : > { %4994 = vmatpush3.bf16.msra.mxu0 %v5246_v11  ;;  %v778_v55 = vld [vmem:[%s5727_s23 + $0xd0] sm:$0xff]  ;;  %v5262_v58 = vld [vmem:[%s7523_s30 + $0x58] sm:$0xff]   ;;  %v5263_v59 = vld [vmem:[%s7523_s30 + $0x60] sm:$0xff]  }
  0x35   : > { %911 = vperm.xlu1 %5242, %v761_v12   ;;  %906 = vperm.xlu0 %5241, %v760_v13   ;;  %v777_v60 = vld [vmem:[%s5727_s23 + $0xc8] sm:$0xff]  ;;  %v776_v61 = vld [vmem:[%s5727_s23 + $0xc0] sm:$0xff]  ;;  %v791_v62 = vld [vmem:[%s5727_s23 + $0x138] sm:$0xff] }
  0x36   : > { %4995 = vmatprep.subr.bf16.mxu0 %v5247_v14  ;;  %v790_v63 = vld [vmem:[%s5727_s23 + $0x130] sm:$0xff]  ;;  %v5264_v0 = vld [vmem:[%s7523_s30 + $0x68] sm:$0xff]   ;;  %v775_v2 = vld [vmem:[%s5727_s23 + $0xb8] sm:$0xff] }
  0x37   : > { %v5265_v1 = vld [vmem:[%s7523_s30 + $0x70] sm:$0xff]   ;;  %v789_v4 = vld [vmem:[%s5727_s23 + $0x128] sm:$0xff]  ;;  %v788_v5 = vld [vmem:[%s5727_s23 + $0x120] sm:$0xff] }
  0x38   : > { %4996 = vmatpush3.bf16.msra.mxu0 %v5247_v14  ;;  %v774_v3 = vld [vmem:[%s5727_s23 + $0xb0] sm:$0xff]  ;;  %v5266_v6 = vld [vmem:[%s7523_s30 + $0x78] sm:$0xff]   ;;  %v5267_v7 = vld [vmem:[%s7523_s30 + $0x80] sm:$0xff]  }
  0x39   : > { %901 = vperm.xlu1 %5242, %v759_v15   ;;  %896 = vperm.xlu0 %5241, %v758_v16   ;;  %v773_v8 = vld [vmem:[%s5727_s23 + $0xa8] sm:$0xff]  ;;  %v772_v9 = vld [vmem:[%s5727_s23 + $0xa0] sm:$0xff]  ;;  %v787_v10 = vld [vmem:[%s5727_s23 + $0x118] sm:$0xff] }
  0x3a   : > { %4997 = vmatprep.subr.bf16.mxu0 %v5248_v17  ;;  %v786_v11 = vld [vmem:[%s5727_s23 + $0x110] sm:$0xff]  ;;  %v5268_v12 = vld [vmem:[%s7523_s30 + $0x88] sm:$0xff]   ;;  %v771_v14 = vld [vmem:[%s5727_s23 + $0x98] sm:$0xff] }
  0x3b   : > { %v5269_v13 = vld [vmem:[%s7523_s30 + $0x90] sm:$0xff]   ;;  %v785_v16 = vld [vmem:[%s5727_s23 + $0x108] sm:$0xff] }
  0x3c   : > { %4998 = vmatpush3.bf16.msra.mxu0 %v5248_v17  ;;  %v770_v15 = vld [vmem:[%s5727_s23 + $0x90] sm:$0xff]  ;;  %v784_v17 = vld [vmem:[%s5727_s23 + $0x100] sm:$0xff] }
  0x3d   : > { %891 = vperm.xlu1 %5242, %v757_v18   ;;  %886 = vperm.xlu0 %5241, %v756_v19   ;;  %v5270_v18 = vld [vmem:[%s7523_s30 + $0x98] sm:$0xff]   ;;  %v5271_v19 = vld [vmem:[%s7523_s30 + $0xa0] sm:$0xff]  }
  0x3e   : > { %4999 = vmatprep.subr.bf16.mxu0 %v5249_v20 }
  0x40   : > { %5000 = vmatpush3.bf16.msra.mxu0 %v5249_v20  ;;  %v769_v20 = vld [vmem:[%s5727_s23 + $0x88] sm:$0xff] }
  0x41   : > { %881 = vperm.xlu1 %5242, %v755_v21   ;;  %876 = vperm.xlu0 %5241, %v754_v22   ;;  %v768_v21 = vld [vmem:[%s5727_s23 + $0x80] sm:$0xff]  ;;  %v831_v22 = vld [vmem:[%s5727_s23 + $0x278] sm:$0xff] }
  0x42   : > { %5001 = vmatprep.subr.bf16.mxu0 %v5250_v23 }
  0x44   : > { %5002 = vmatpush3.bf16.msra.mxu0 %v5250_v23  ;;  %v830_v23 = vld [vmem:[%s5727_s23 + $0x270] sm:$0xff] }
  0x45   : > { %871 = vperm.xlu1 %5242, %v753_v24   ;;  %866 = vperm.xlu0 %5241, %v752_v25   ;;  %v5272_v24 = vld [vmem:[%s7523_s30 + $0xa8] sm:$0xff]   ;;  %v5273_v25 = vld [vmem:[%s7523_s30 + $0xb0] sm:$0xff]  }
  0x47   : > { %5004 = vmatmul.mubr.bf16.vlgmr.msra.gmra.mxu0 %v5252_v28  ;;  %v829_v28 = vld [vmem:[%s5727_s23 + $0x268] sm:$0xff] }
  0x48   : > { %5007 = vmatprep.mubr.bf16.mxu0 %v5253_v29  ;;  %v828_v29 = vld [vmem:[%s5727_s23 + $0x260] sm:$0xff] }
  0x49   : > { %2510 = vperm.xlu1 %5242, %v2472_v26   ;;  %2505 = vperm.xlu0 %5241, %v2471_v27   ;;  %v815_v26 = vld [vmem:[%s5727_s23 + $0x1f8] sm:$0xff]  ;;  %v814_v27 = vld [vmem:[%s5727_s23 + $0x1f0] sm:$0xff] }
  0x4d   : > { %2500 = vperm.xlu1 %5242, %v2470_v30   ;;  %2495 = vperm.xlu0 %5241, %v2469_v31   ;;  %v5274_v30 = vld [vmem:[%s7523_s30 + $0xb8] sm:$0xff]   ;;  %v5275_v31 = vld [vmem:[%s7523_s30 + $0xc0] sm:$0xff]  }
  0x4f   : > { %5008 = vmatmul.mubr.bf16.gmra.mxu0 %v5254_v34 }
  0x50   : > { %5011 = vmatprep.mubr.bf16.mxu0 %v5255_v35 }
  0x51   : > { %2490 = vperm.xlu1 %5242, %v2468_v32   ;;  %2485 = vperm.xlu0 %5241, %v2467_v33   ;;  %v813_v32 = vld [vmem:[%s5727_s23 + $0x1e8] sm:$0xff]  ;;  %v812_v33 = vld [vmem:[%s5727_s23 + $0x1e0] sm:$0xff] }
  0x55   : > { %2480 = vperm.xlu1 %5242, %v2466_v36   ;;  %2475 = vperm.xlu0 %5241, %v2465_v37   ;;  %v827_v36 = vld [vmem:[%s5727_s23 + $0x258] sm:$0xff]  ;;  %v826_v37 = vld [vmem:[%s5727_s23 + $0x250] sm:$0xff] }
  0x57   : > { %5012 = vmatmul.mubr.bf16.gmra.mxu0 %v5256_v40 }
  0x58   : > { %5015 = vmatprep.mubr.bf16.mxu0 %v5257_v41 }
  0x59   : > { %1101 = vperm.xlu1 %5242, %v799_v38   ;;  %1096 = vperm.xlu0 %5241, %v798_v39   ;;  %v5276_v38 = vld [vmem:[%s7523_s30 + $0xc8] sm:$0xff]   ;;  %v5277_v39 = vld [vmem:[%s7523_s30 + $0xd0] sm:$0xff]  }
  0x5d   : > { %1021 = vperm.xlu1 %5242, %v783_v42   ;;  %1016 = vperm.xlu0 %5241, %v782_v43   ;;  %v811_v42 = vld [vmem:[%s5727_s23 + $0x1d8] sm:$0xff]  ;;  %v810_v43 = vld [vmem:[%s5727_s23 + $0x1d0] sm:$0xff] }
  0x5f   : > { %5016 = vmatmul.mubr.bf16.gmra.mxu0 %v5258_v46  ;;  %v825_v46 = vld [vmem:[%s5727_s23 + $0x248] sm:$0xff] }
  0x60   : > { %5019 = vmatprep.mubr.bf16.mxu0 %v5259_v47  ;;  %v824_v47 = vld [vmem:[%s5727_s23 + $0x240] sm:$0xff] }
  0x61   : > { %1091 = vperm.xlu1 %5242, %v797_v44   ;;  %1086 = vperm.xlu0 %5241, %v796_v45  }
  0x65   : > { %1011 = vperm.xlu1 %5242, %v781_v48   ;;  %1006 = vperm.xlu0 %5241, %v780_v49   ;;  %v5278_v48 = vld [vmem:[%s7523_s30 + $0xd8] sm:$0xff]   ;;  %v5279_v49 = vld [vmem:[%s7523_s30 + $0xe0] sm:$0xff]  }
  0x67   : > { %5020 = vmatmul.mubr.bf16.gmra.mxu0 %v5260_v52  ;;  %v809_v52 = vld [vmem:[%s5727_s23 + $0x1c8] sm:$0xff] }
  0x68   : > { %5023 = vmatprep.mubr.bf16.mxu0 %v5261_v53  ;;  %v808_v53 = vld [vmem:[%s5727_s23 + $0x1c0] sm:$0xff] }
  0x69   : > { %1081 = vperm.xlu1 %5242, %v795_v50   ;;  %1076 = vperm.xlu0 %5241, %v794_v51  }
  0x6d   : > { %1001 = vperm.xlu1 %5242, %v779_v54   ;;  %996 = vperm.xlu0 %5241, %v778_v55  }
  0x6f   : > { %5024 = vmatmul.mubr.bf16.gmra.mxu0 %v5262_v58  ;;  %v5280_v58 = vld [vmem:[%s7523_s30 + $0xe8] sm:$0xff]  }
  0x70   : > { %5027 = vmatprep.mubr.bf16.mxu0 %v5263_v59  ;;  %v5281_v59 = vld [vmem:[%s7523_s30 + $0xf0] sm:$0xff]  }
  0x71   : > { %1071 = vperm.xlu1 %5242, %v793_v56   ;;  %1066 = vperm.xlu0 %5241, %v792_v57   ;;  %v823_v56 = vld [vmem:[%s5727_s23 + $0x238] sm:$0xff]  ;;  %v822_v57 = vld [vmem:[%s5727_s23 + $0x230] sm:$0xff] }
  0x75   : > { %991 = vperm.xlu1 %5242, %v777_v60   ;;  %986 = vperm.xlu0 %5241, %v776_v61  }
  0x77   : > { %5028 = vmatmul.mubr.bf16.gmra.mxu0 %v5264_v0 }
  0x78   : > { %5031 = vmatprep.mubr.bf16.mxu0 %v5265_v1 }
  0x79   : > { %1061 = vperm.xlu1 %5242, %v791_v62   ;;  %1056 = vperm.xlu0 %5241, %v790_v63   ;;  %v807_v62 = vld [vmem:[%s5727_s23 + $0x1b8] sm:$0xff]  ;;  %v806_v63 = vld [vmem:[%s5727_s23 + $0x1b0] sm:$0xff] }
  0x7d   : > { %981 = vperm.xlu1 %5242, %v775_v2   ;;  %976 = vperm.xlu0 %5241, %v774_v3   ;;  %v821_v2 = vld [vmem:[%s5727_s23 + $0x228] sm:$0xff]  ;;  %v820_v3 = vld [vmem:[%s5727_s23 + $0x220] sm:$0xff] }
  0x7f   : > { %5032 = vmatmul.mubr.bf16.gmra.mxu0 %v5266_v6 }
  0x80   : > { %5035 = vmatprep.mubr.bf16.mxu0 %v5267_v7 }
  0x81   : > { %1051 = vperm.xlu1 %5242, %v789_v4   ;;  %1046 = vperm.xlu0 %5241, %v788_v5   ;;  %v5282_v4 = vld [vmem:[%s7523_s30 + $0xf8] sm:$0xff]   ;;  %v5283_v5 = vld [vmem:[%s7523_s30 + $0x100] sm:$0xff]  }
  0x85   : > { %971 = vperm.xlu1 %5242, %v773_v8   ;;  %966 = vperm.xlu0 %5241, %v772_v9   ;;  %v805_v8 = vld [vmem:[%s5727_s23 + $0x1a8] sm:$0xff]  ;;  %v804_v9 = vld [vmem:[%s5727_s23 + $0x1a0] sm:$0xff] }
  0x87   : > { %5036 = vmatmul.mubr.bf16.gmra.mxu0 %v5268_v12  ;;  %v819_v12 = vld [vmem:[%s5727_s23 + $0x218] sm:$0xff] }
  0x88   : > { %5039 = vmatprep.mubr.bf16.mxu0 %v5269_v13  ;;  %v818_v13 = vld [vmem:[%s5727_s23 + $0x210] sm:$0xff] }
  0x89   : > { %1041 = vperm.xlu1 %5242, %v787_v10   ;;  %1036 = vperm.xlu0 %5241, %v786_v11  }
  0x8d   : > { %961 = vperm.xlu1 %5242, %v771_v14   ;;  %956 = vperm.xlu0 %5241, %v770_v15   ;;  %v5284_v14 = vld [vmem:[%s7523_s30 + $0x108] sm:$0xff]   ;;  %v5285_v15 = vld [vmem:[%s7523_s30 + $0x110] sm:$0xff]  }
  0x8f   : > { %5040 = vmatmul.mubr.bf16.gmra.mxu0 %v5270_v18  ;;  %v803_v18 = vld [vmem:[%s5727_s23 + $0x198] sm:$0xff] }
  0x90   : > { %5043 = vmatprep.mubr.bf16.mxu0 %v5271_v19  ;;  %v802_v19 = vld [vmem:[%s5727_s23 + $0x190] sm:$0xff] }
  0x91   : > { %1031 = vperm.xlu1 %5242, %v785_v16   ;;  %1026 = vperm.xlu0 %5241, %v784_v17  }
  0x95   : > { %951 = vperm.xlu1 %5242, %v769_v20   ;;  %946 = vperm.xlu0 %5241, %v768_v21   ;;  %v5307_v20 = vld [vmem:[%s7485_s3] sm:$0xff]  }
  0x96   : > { %5131 = vmatprep.mubr.bf16.mxu1 %v5307_v20  ;;  %v2759_v20 = vld [vmem:[%s7490_s8 + $0xc0] sm:$0xff] }
  0x97   : > { %5044 = vmatmul.mubr.bf16.gmra.mxu0 %v5272_v24  ;;  %v816_v24 = vld [vmem:[%s5727_s23 + $0x200] sm:$0xff] }
  0x98   : > { %5047 = vmatprep.mubr.bf16.mxu0 %v5273_v25  ;;  %v5286_v25 = vld [vmem:[%s7523_s30 + $0x118] sm:$0xff]  }
  0x99   : > { %1261 = vperm.xlu1 %5242, %v831_v22   ;;  %1256 = vperm.xlu0 %5241, %v830_v23   ;;  %v817_v23 = vld [vmem:[%s5727_s23 + $0x208] sm:$0xff] }
  0x9d   : > { %1181 = vperm.xlu1 %5242, %v815_v26   ;;  %1176 = vperm.xlu0 %5241, %v814_v27   ;;  %v5287_v26 = vld [vmem:[%s7523_s30 + $0x120] sm:$0xff]  }
  0x9f   : > { %5048 = vmatmul.mubr.bf16.gmra.mxu0 %v5274_v30  ;;  %v800_v30 = vld [vmem:[%s5727_s23 + $0x180] sm:$0xff] }
  0xa0   : > { %5051 = vmatprep.mubr.bf16.mxu0 %v5275_v31 }
  0xa1   : > { %1251 = vperm.xlu1 %5242, %v829_v28   ;;  %1246 = vperm.xlu0 %5241, %v828_v29   ;;  %v801_v29 = vld [vmem:[%s5727_s23 + $0x188] sm:$0xff] }
  0xa4   : > { %v5889_v34 = vpop.permute.xlu0 %936  ;;  %v5891_v35 = vpop.permute.xlu1 %926 }
  0xa5   : > { %1171 = vperm.xlu1 %5242, %v813_v32   ;;  %1166 = vperm.xlu0 %5241, %v812_v33   ;;  %v2766_v33 = vld [vmem:[%s7490_s8 + $0xf8] sm:$0xff] }
  0xa7   : > { %5052 = vmatmul.mubr.bf16.gmra.mxu0 %v5276_v38  ;;  %v5289_v38 = vld [vmem:[%s7523_s30 + $0x130] sm:$0xff]  }
  0xa8   : > { %v5901_v40 = vpop.permute.xlu0 %941  ;;  %v5903_v41 = vpop.permute.xlu1 %931  ;;  %5055 = vmatprep.mubr.bf16.mxu0 %v5277_v39 }
  0xa9   : > { %1241 = vperm.xlu1 %5242, %v827_v36   ;;  %1236 = vperm.xlu0 %5241, %v826_v37   ;;  %v2765_v36 = vld [vmem:[%s7490_s8 + $0xf0] sm:$0xff]  ;;  %v5288_v37 = vld [vmem:[%s7523_s30 + $0x128] sm:$0xff]  }
  0xac   : > { %v5907_v44 = vpop.permute.xlu1 %921  ;;  %v5909_v45 = vpop.permute.xlu0 %916 }
  0xad   : > { %1161 = vperm.xlu1 %5242, %v811_v42   ;;  %1156 = vperm.xlu0 %5241, %v810_v43   ;;  %v2750_v43 = vld [vmem:[%s7490_s8 + $0x78] sm:$0xff] }
  0xaf   : > { %5056 = vmatmul.mubr.bf16.gmra.mxu0 %v5278_v48 }
  0xb0   : > { %v5919_v50 = vpop.permute.xlu1 %911  ;;  %v5921_v51 = vpop.permute.xlu0 %906  ;;  %5059 = vmatprep.mubr.bf16.mxu0 %v5279_v49  ;;  %v2764_v49 = vld [vmem:[%s7490_s8 + $0xe8] sm:$0xff] }
  0xb1   : > { %1231 = vperm.xlu1 %5242, %v825_v46   ;;  %1226 = vperm.xlu0 %5241, %v824_v47   ;;  %v2749_v46 = vld [vmem:[%s7490_s8 + $0x70] sm:$0xff] }
  0xb4   : > { %v5925_v54 = vpop.permute.xlu1 %901  ;;  %v5927_v55 = vpop.permute.xlu0 %896 }
  0xb5   : > { %1151 = vperm.xlu1 %5242, %v809_v52   ;;  %1146 = vperm.xlu0 %5241, %v808_v53   ;;  %v2763_v52 = vld [vmem:[%s7490_s8 + $0xe0] sm:$0xff]  ;;  %v5290_v53 = vld [vmem:[%s7523_s30 + $0x138] sm:$0xff]  }
  0xb7   : > { %5060 = vmatmul.mubr.bf16.gmra.mxu0 %v5280_v58 }
  0xb8   : > { %v5937_v60 = vpop.permute.xlu1 %891  ;;  %v5939_v61 = vpop.permute.xlu0 %886  ;;  %5063 = vmatprep.mubr.bf16.mxu0 %v5281_v59  ;;  %v2748_v59 = vld [vmem:[%s7490_s8 + $0x68] sm:$0xff] }
  0xb9   : > { %1221 = vperm.xlu1 %5242, %v823_v56   ;;  %1216 = vperm.xlu0 %5241, %v822_v57   ;;  %v5291_v56 = vld [vmem:[%s7523_s30 + $0x140] sm:$0xff]  }
  0xbc   : > { %v5943_v0 = vpop.permute.xlu1 %881  ;;  %v5945_v1 = vpop.permute.xlu0 %876 }
  0xbd   : > { %1141 = vperm.xlu1 %5242, %v807_v62   ;;  %1136 = vperm.xlu0 %5241, %v806_v63   ;;  %v2747_v62 = vld [vmem:[%s7490_s8 + $0x60] sm:$0xff] }
  0xbf   : > { %5064 = vmatmul.mubr.bf16.gmra.mxu0 %v5282_v4  ;;  %v2761_v4 = vld [vmem:[%s7490_s8 + $0xd0] sm:$0xff] }
  0xc0   : > { %v5955_v6 = vpop.permute.xlu1 %871  ;;  %v5957_v7 = vpop.permute.xlu0 %866  ;;  %5067 = vmatprep.mubr.bf16.mxu0 %v5283_v5  ;;  %v5292_v5 = vld [vmem:[%s7523_s30 + $0x148] sm:$0xff]  }
  0xc1   : > { %1211 = vperm.xlu1 %5242, %v821_v2   ;;  %1206 = vperm.xlu0 %5241, %v820_v3   ;;  %v2762_v3 = vld [vmem:[%s7490_s8 + $0xd8] sm:$0xff] }
  0xc4   : > { %v5961_v10 = vpop.permute.xlu1 %2510  ;;  %v5963_v11 = vpop.permute.xlu0 %2505 }
  0xc5   : > { %1131 = vperm.xlu1 %5242, %v805_v8   ;;  %1126 = vperm.xlu0 %5241, %v804_v9   ;;  %v5293_v8 = vld [vmem:[%s7523_s30 + $0x150] sm:$0xff]  }
  0xc7   : > { %5068 = vmatmul.mubr.bf16.gmra.mxu0 %v5284_v14  ;;  %v2745_v14 = vld [vmem:[%s7490_s8 + $0x50] sm:$0xff] }
  0xc8   : > { %v5973_v16 = vpop.permute.xlu1 %2500  ;;  %v5975_v17 = vpop.permute.xlu0 %2495  ;;  %5071 = vmatprep.mubr.bf16.mxu0 %v5285_v15 }
  0xc9   : > { %1201 = vperm.xlu1 %5242, %v819_v12   ;;  %1196 = vperm.xlu0 %5241, %v818_v13   ;;  %v2746_v13 = vld [vmem:[%s7490_s8 + $0x58] sm:$0xff] }
  0xcc   : > { %v5982_v21 = vpop.permute.xlu1 %2490  ;;  %v5984_v22 = vpop.permute.xlu0 %2485 }
  0xcd   : > { %1121 = vperm.xlu1 %5242, %v803_v18   ;;  %1116 = vperm.xlu0 %5241, %v802_v19   ;;  %v2760_v19 = vld [vmem:[%s7490_s8 + $0xc8] sm:$0xff] }
  0xcf   : > { %5072 = vmatmul.mubr.bf16.gmra.mxu0 %v5286_v25 }
  0xd0   : > { %v5994_v27 = vpop.permute.xlu1 %2480  ;;  %v5996_v28 = vpop.permute.xlu0 %2475  ;;  %5075 = vmatprep.mubr.bf16.mxu0 %v5287_v26 }
  0xd1   : > { %7526 = vst [vmem:[#allocation15_spill] sm:$0xff] %v5994_v27  ;;  %7527 = vst [vmem:[#allocation16_spill] sm:$0xff] %v5996_v28  ;;  %1191 = vperm.xlu1 %5242, %v817_v23   ;;  %1186 = vperm.xlu0 %5241, %v816_v24   ;;  %v5294_v23 = vld [vmem:[%s7523_s30 + $0x158] sm:$0xff]   ;;  %v5295_v24 = vld [vmem:[%s7523_s30 + $0x160] sm:$0xff]  }
  0xd4   : > { %v6000_v31 = vpop.permute.xlu1 %1101  ;;  %v6002_v32 = vpop.permute.xlu0 %1096 }
  0xd5   : > { %7528 = vst [vmem:[#allocation17_spill] sm:$0xff] %v6000_v31  ;;  %7529 = vst [vmem:[#allocation18_spill] sm:$0xff] %v6002_v32  ;;  %1111 = vperm.xlu1 %5242, %v801_v29   ;;  %1106 = vperm.xlu0 %5241, %v800_v30   ;;  %v2744_v29 = vld [vmem:[%s7490_s8 + $0x48] sm:$0xff]  ;;  %v2743_v30 = vld [vmem:[%s7490_s8 + $0x40] sm:$0xff] }
  0xd6   : > { %v842_v31 = vld [vmem:[%s5727_s23 + $0x2d0] sm:$0xff] }
  0xd7   : > { %5076 = vmatmul.mubr.bf16.gmra.mxu0 %v5288_v37  ;;  %v2758_v37 = vld [vmem:[%s7490_s8 + $0xb8] sm:$0xff] }
  0xd8   : > { %v6016_v39 = vpop.permute.xlu1 %1021  ;;  %v6018_v42 = vpop.permute.xlu0 %1016  ;;  %5079 = vmatprep.mubr.bf16.mxu0 %v5289_v38  ;;  %v2757_v38 = vld [vmem:[%s7490_s8 + $0xb0] sm:$0xff] }
  0xd9   : > { %2924 = vperm.xlu1 %5242, %v2766_v33   ;;  %2919 = vperm.xlu0 %5241, %v2765_v36  }
  0xdc   : > { %v6026_v47 = vpop.permute.xlu1 %1091  ;;  %v6028_v48 = vpop.permute.xlu0 %1086 }
  0xdd   : > { %7530 = vst [vmem:[#allocation19_spill] sm:$0xff] %v6026_v47  ;;  %7531 = vst [vmem:[#allocation20_spill] sm:$0xff] %v6028_v48  ;;  %2844 = vperm.xlu1 %5242, %v2750_v43   ;;  %2839 = vperm.xlu0 %5241, %v2749_v46   ;;  %v5296_v43 = vld [vmem:[%s7523_s30 + $0x168] sm:$0xff]   ;;  %v5297_v46 = vld [vmem:[%s7523_s30 + $0x170] sm:$0xff]  }
  0xde   : > { %v859_v47 = vld [vmem:[%s5727_s23 + $0x358] sm:$0xff] }
  0xdf   : > { %5080 = vmatmul.mubr.bf16.gmra.mxu0 %v5290_v53  ;;  %v2742_v53 = vld [vmem:[%s7490_s8 + $0x38] sm:$0xff] }
  0xe0   : > { %v6042_v57 = vpop.permute.xlu1 %1011  ;;  %v6044_v58 = vpop.permute.xlu0 %1006  ;;  %5083 = vmatprep.mubr.bf16.mxu0 %v5291_v56  ;;  %v2741_v56 = vld [vmem:[%s7490_s8 + $0x30] sm:$0xff] }
  0xe1   : > { %7532 = vst [vmem:[#allocation21_spill] sm:$0xff] %v6042_v57  ;;  %7533 = vst [vmem:[#allocation22_spill] sm:$0xff] %v6044_v58  ;;  %2914 = vperm.xlu1 %5242, %v2764_v49   ;;  %2909 = vperm.xlu0 %5241, %v2763_v52  }
  0xe4   : > { %v6052_v63 = vpop.permute.xlu1 %1081  ;;  %v6054_v2 = vpop.permute.xlu0 %1076 }
  0xe5   : > { %7534 = vst [vmem:[#allocation23_spill] sm:$0xff] %v6052_v63  ;;  %7535 = vst [vmem:[#allocation24_spill] sm:$0xff] %v6054_v2  ;;  %2834 = vperm.xlu1 %5242, %v2748_v59   ;;  %2829 = vperm.xlu0 %5241, %v2747_v62  }
  0xe7   : > { %5084 = vmatmul.mubr.bf16.gmra.mxu0 %v5292_v5  ;;  %v5298_v5 = vld [vmem:[%s7523_s30 + $0x178] sm:$0xff]  }
  0xe8   : > { %v6068_v9 = vpop.permute.xlu1 %1001  ;;  %v6070_v12 = vpop.permute.xlu0 %996  ;;  %5087 = vmatprep.mubr.bf16.mxu0 %v5293_v8  ;;  %v5299_v8 = vld [vmem:[%s7523_s30 + $0x180] sm:$0xff]  }
  0xe9   : > { %2904 = vperm.xlu1 %5242, %v2762_v3   ;;  %2899 = vperm.xlu0 %5241, %v2761_v4   ;;  %v2756_v3 = vld [vmem:[%s7490_s8 + $0xa8] sm:$0xff]  ;;  %v2755_v4 = vld [vmem:[%s7490_s8 + $0xa0] sm:$0xff] }
  0xec   : > { %v6078_v15 = vpop.permute.xlu1 %1071  ;;  %v6080_v18 = vpop.permute.xlu0 %1066 }
  0xed   : > { %7536 = vst [vmem:[#allocation25_spill] sm:$0xff] %v6078_v15  ;;  %7537 = vst [vmem:[#allocation26_spill] sm:$0xff] %v6080_v18  ;;  %2824 = vperm.xlu1 %5242, %v2746_v13   ;;  %2819 = vperm.xlu0 %5241, %v2745_v14  }
  0xef   : > { %5088 = vmatmul.mubr.bf16.gmra.mxu0 %v5294_v23 }
  0xf0   : > { %v6094_v25 = vpop.permute.xlu1 %991  ;;  %v6096_v26 = vpop.permute.xlu0 %986  ;;  %5091 = vmatprep.mubr.bf16.mxu0 %v5295_v24 }
  0xf1   : > { %7538 = vst [vmem:[#allocation27_spill] sm:$0xff] %v6094_v25  ;;  %7539 = vst [vmem:[#allocation28_spill] sm:$0xff] %v6096_v26  ;;  %2894 = vperm.xlu1 %5242, %v2760_v19   ;;  %2889 = vperm.xlu0 %5241, %v2759_v20   ;;  %v2740_v19 = vld [vmem:[%s7490_s8 + $0x28] sm:$0xff]  ;;  %v2739_v20 = vld [vmem:[%s7490_s8 + $0x20] sm:$0xff] }
  0xf2   : > { %v846_v25 = vld [vmem:[%s5727_s23 + $0x2f0] sm:$0xff] }
  0xf4   : > { %v6104_v33 = vpop.permute.xlu1 %1061  ;;  %v6106_v36 = vpop.permute.xlu0 %1056 }
  0xf5   : > { %2814 = vperm.xlu1 %5242, %v2744_v29   ;;  %2809 = vperm.xlu0 %5241, %v2743_v30   ;;  %v2754_v29 = vld [vmem:[%s7490_s8 + $0x98] sm:$0xff]  ;;  %v2753_v30 = vld [vmem:[%s7490_s8 + $0x90] sm:$0xff] }
  0xf7   : > { %5092 = vmatmul.mubr.bf16.gmra.mxu0 %v5296_v43 }
  0xf8   : > { %v6120_v49 = vpop.permute.xlu1 %981  ;;  %v6122_v52 = vpop.permute.xlu0 %976  ;;  %5095 = vmatprep.mubr.bf16.mxu0 %v5297_v46 }
  0xf9   : > { %2884 = vperm.xlu1 %5242, %v2758_v37   ;;  %2879 = vperm.xlu0 %5241, %v2757_v38   ;;  %v5300_v37 = vld [vmem:[%s7523_s30 + $0x188] sm:$0xff]   ;;  %v5301_v38 = vld [vmem:[%s7523_s30 + $0x190] sm:$0xff]  }
  0xfc   : > { %v6130_v59 = vpop.permute.xlu1 %1051  ;;  %v6132_v62 = vpop.permute.xlu0 %1046 }
  0xfd   : > { %2804 = vperm.xlu1 %5242, %v2742_v53   ;;  %2799 = vperm.xlu0 %5241, %v2741_v56   ;;  %v2738_v56 = vld [vmem:[%s7490_s8 + $0x18] sm:$0xff] }
  0xff   : > { %5096 = vmatmul.mubr.bf16.gmra.mxu0 %v5298_v5 }
 0x100   : > { %v6146_v13 = vpop.permute.xlu1 %971  ;;  %v6148_v14 = vpop.permute.xlu0 %966  ;;  %5099 = vmatprep.mubr.bf16.mxu0 %v5299_v8 }
 0x101   : > { %7540 = vst [vmem:[#allocation29_spill] sm:$0xff] %v6146_v13  ;;  %7541 = vst [vmem:[#allocation30_spill] sm:$0xff] %v6148_v14  ;;  %2874 = vperm.xlu1 %5242, %v2756_v3   ;;  %2869 = vperm.xlu0 %5241, %v2755_v4   ;;  %v2737_v3 = vld [vmem:[%s7490_s8 + $0x10] sm:$0xff]  ;;  %v5304_v13 = vld [vmem:[%s7523_s30 + $0x1a8] sm:$0xff]  }
 0x104   : > { %v6156_v23 = vpop.permute.xlu1 %1041  ;;  %v6158_v24 = vpop.permute.xlu0 %1036 }
 0x105   : > { %2794 = vperm.xlu1 %5242, %v2740_v19   ;;  %2789 = vperm.xlu0 %5241, %v2739_v20   ;;  %v2752_v19 = vld [vmem:[%s7490_s8 + $0x88] sm:$0xff]  ;;  %v2751_v20 = vld [vmem:[%s7490_s8 + $0x80] sm:$0xff] }
 0x107   : > { %v6176_v53 = vpop.f32.mrf.mxu0  ;;  %5100 = vmatmul.mubr.bf16.gmra.mxu0 %v5300_v37  ;;  %v5303_v37 = vld [vmem:[%s7523_s30 + $0x1a0] sm:$0xff]  }
 0x108   : > { %v6172_v43 = vpop.permute.xlu1 %961  ;;  %v6174_v46 = vpop.permute.xlu0 %956  ;;  %5103 = vmatprep.mubr.bf16.mxu0 %v5301_v38 }
 0x109   : > { %2864 = vperm.xlu1 %5242, %v2754_v29   ;;  %2859 = vperm.xlu0 %5241, %v2753_v30   ;;  %v6188_v8 = vpop.f32.mrf.mxu0  ;;  %v5302_v29 = vld [vmem:[%s7523_s30 + $0x198] sm:$0xff]  }
 0x10b   : > { %v6199_v30 = vpop.f32.mrf.mxu0 }
 0x10c   : > { %v6184_v4 = vpop.permute.xlu1 %1031  ;;  %v6186_v5 = vpop.permute.xlu0 %1026 }
 0x10d   : > { %7542 = vst [vmem:[#allocation31_spill] sm:$0xff] %v6184_v4  ;;  %7543 = vst [vmem:[#allocation32_spill] sm:$0xff] %v6186_v5  ;;  %2784 = vperm.xlu1 %5242, %v2738_v56   ;;  %2779 = vperm.xlu0 %5241, %v2737_v3   ;;  %v6208_v3 = vpop.f32.mrf.mxu0  ;;  %v2736_v5 = vld [vmem:[%s7490_s8 + $0x8] sm:$0xff]  ;;  %v2735_v4 = vld [vmem:[%s7490_s8] sm:$0xff] }
 0x10f   : > { %5104 = vmatmul.mubr.bf16.gmra.mxu0 %v5302_v29  ;;  %v6216_v14 = vpop.f32.mrf.mxu0  ;;  %v862_v29 = vld [vmem:[%s5727_s23 + $0x370] sm:$0xff] }
 0x110   : > { %v6204_v38 = vpop.permute.xlu1 %951  ;;  %v6206_v56 = vpop.permute.xlu0 %946  ;;  %5107 = vmatprep.mubr.bf16.mxu0 %v5303_v37  ;;  %v5305_v37 = vld [vmem:[%s7523_s30 + $0x1b0] sm:$0xff]  }
 0x111   : > { %7544 = vst [vmem:[#allocation33_spill] sm:$0xff] %v6204_v38  ;;  %7545 = vst [vmem:[#allocation34_spill] sm:$0xff] %v6206_v56  ;;  %2854 = vperm.xlu1 %5242, %v2752_v19   ;;  %2849 = vperm.xlu0 %5241, %v2751_v20   ;;  %v6222_v19 = vpop.f32.mrf.mxu0  ;;  %v863_v20 = vld [vmem:[%s5727_s23 + $0x378] sm:$0xff] }
 0x113   : > { %v6229_v26 = vpop.f32.mrf.mxu0 }
 0x114   : > { %v6218_v38 = vpop.permute.xlu1 %1261  ;;  %v6220_v56 = vpop.permute.xlu0 %1256 }
 0x115   : > { %7546 = vst [vmem:[#allocation35_spill] sm:$0xff] %v6218_v38  ;;  %7547 = vst [vmem:[#allocation36_spill] sm:$0xff] %v6220_v56  ;;  %2774 = vperm.xlu1 %5242, %v2736_v5   ;;  %2769 = vperm.xlu0 %5241, %v2735_v4   ;;  %v6238_v5 = vpop.f32.mrf.mxu0  ;;  %v847_v4 = vld [vmem:[%s5727_s23 + $0x2f8] sm:$0xff] }
 0x117   : > { %5108 = vmatmul.mubr.bf16.gmra.mxu0 %v5304_v13  ;;  %v5013_v18 = vpop.f32.mrf.mxu0 }
 0x118   : > { %v6234_v38 = vpop.permute.xlu1 %1181  ;;  %v6236_v56 = vpop.permute.xlu0 %1176  ;;  %5111 = vmatprep.mubr.bf16.mxu0 %v5305_v37 }
 0x119   : > { %7548 = vst [vmem:[#allocation37_spill] sm:$0xff] %v6234_v38  ;;  %7549 = vst [vmem:[#allocation38_spill] sm:$0xff] %v6236_v56  ;;  %1421 = vperm.xlu1 %5242, %v863_v20   ;;  %1416 = vperm.xlu0 %5241, %v862_v29   ;;  %v1874_v58 = vpop.f32.mrf.mxu0  ;;  %v861_v38 = vld [vmem:[%s5727_s23 + $0x368] sm:$0xff]  ;;  %v860_v56 = vld [vmem:[%s5727_s23 + $0x360] sm:$0xff] }
 0x11a   : > { %v5306_v20 = vld [vmem:[%s7523_s30 + $0x1b8] sm:$0xff]  }
 0x11b   : > { %v5014_v13 = vpop.f32.mrf.mxu0 }
 0x11c   : > { %v6242_v15 = vpop.permute.xlu1 %1251  ;;  %v6244_v2 = vpop.permute.xlu0 %1246 }
 0x11d   : > { %7550 = vst [vmem:[#allocation39_spill] sm:$0xff] %v6242_v15  ;;  %7551 = vst [vmem:[#allocation40_spill] sm:$0xff] %v6244_v2  ;;  %1341 = vperm.xlu1 %5242, %v847_v4   ;;  %1336 = vperm.xlu0 %5241, %v846_v25   ;;  %v1877_v15 = vpop.f32.mrf.mxu0  ;;  %v845_v2 = vld [vmem:[%s5727_s23 + $0x2e8] sm:$0xff]  ;;  %v844_v4 = vld [vmem:[%s5727_s23 + $0x2e0] sm:$0xff] }
 0x11f   : > { %5112 = vmatmul.mubr.bf16.gmra.mxu0 %v5306_v20  ;;  %v5017_v25 = vpop.f32.mrf.mxu0 }
 0x120   : > { %v6251_v29 = vpop.permute.xlu1 %1171  ;;  %v6253_v37 = vpop.permute.xlu0 %1166 }
 0x121   : > { %7552 = vst [vmem:[#allocation41_spill] sm:$0xff] %v6251_v29  ;;  %7553 = vst [vmem:[#allocation42_spill] sm:$0xff] %v6253_v37  ;;  %1411 = vperm.xlu1 %5242, %v861_v38   ;;  %1406 = vperm.xlu0 %5241, %v860_v56   ;;  %v1890_v48 = vpop.f32.mrf.mxu0  ;;  %v1899_v29 = vadd.f32 %v5017_v25, %v5889_v34  ;;  %v858_v37 = vld [vmem:[%s5727_s23 + $0x350] sm:$0xff]  ;;  %v843_v25 = vld [vmem:[%s5727_s23 + $0x2d8] sm:$0xff] }
 0x122   : > { %v1891_v38 = vadd.f32 %v1890_v48, %v5891_v35  ;;  %v1883_v35 = vadd.f32 %v5013_v18, %v5909_v45  ;;  %v856_v45 = vld [vmem:[%s5727_s23 + $0x340] sm:$0xff] }
 0x123   : > { %v5018_v32 = vpop.f32.mrf.mxu0 }
 0x124   : > { %v6257_v63 = vpop.permute.xlu1 %1241  ;;  %v6259_v57 = vpop.permute.xlu0 %1236  ;;  %v1902_v56 = vadd.f32 %v5018_v32, %v5901_v40  ;;  %v2301_v40 = vmax.f32 %v1891_v38, 0.0  ;;  %v2299_v38 = vmax.f32 %v1883_v35, 0.0 }
 0x125   : > { %7554 = vst [vmem:[#allocation43_spill] sm:$0xff] %v6257_v63  ;;  %7555 = vst [vmem:[#allocation44_spill] sm:$0xff] %v6259_v57  ;;  %1331 = vperm.xlu1 %5242, %v845_v2   ;;  %1326 = vperm.xlu0 %5241, %v844_v4   ;;  %v1893_v63 = vpop.f32.mrf.mxu0  ;;  %v1886_v2 = vadd.f32 %v5014_v13, %v5907_v44  ;;  %v2303_v4 = vmax.f32 %v1899_v29, 0.0  ;;  %v857_v29 = vld [vmem:[%s5727_s23 + $0x348] sm:$0xff] }
 0x126   : > { %v2304_v57 = vmax.f32 %v1902_v56, 0.0  ;;  %v1894_v34 = vadd.f32 %v1893_v63, %v5903_v41  ;;  %v1878_v41 = vadd.f32 %v1877_v15, %v5919_v50  ;;  %v1870_v50 = vadd.f32 %v6229_v26, %v5925_v54 }
 0x127   : > { %v5021_v27 = vpop.f32.mrf.mxu0  ;;  %v2300_v44 = vmax.f32 %v1886_v2, 0.0 }
 0x128   : > { %v6266_v20 = vpop.permute.xlu1 %1161  ;;  %v6268_v28 = vpop.permute.xlu0 %1156  ;;  %v2302_v32 = vmax.f32 %v1894_v34, 0.0  ;;  %v1915_v63 = vadd.f32 %v5021_v27, %v6174_v46  ;;  %v2298_v46 = vmax.f32 %v1878_v41, 0.0 }
 0x129   : > { %7556 = vst [vmem:[#allocation45_spill] sm:$0xff] %v6266_v20  ;;  %7557 = vst [vmem:[#allocation46_spill] sm:$0xff] %v6268_v28  ;;  %1401 = vperm.xlu1 %5242, %v859_v47   ;;  %1396 = vperm.xlu0 %5241, %v858_v37   ;;  %v2408_v47 = vpack.c.bf16 %v2304_v57, %v2303_v4  ;;  %v6279_v37 = vpop.f32.mrf.mxu0  ;;  %v1875_v57 = vadd.f32 %v1874_v58, %v5921_v51  ;;  %v840_v51 = vld [vmem:[%s5727_s23 + $0x2c0] sm:$0xff] }
 0x12a   : > { %v2407_v13 = vpack.c.bf16 %v2302_v32, %v2301_v40  ;;  %v2406_v15 = vpack.c.bf16 %v2300_v44, %v2299_v38  ;;  %v2307_v4 = vmax.f32 %v1915_v63, 0.0  ;;  %v1862_v44 = vadd.f32 %v6238_v5, %v5937_v60 }
 0x12b   : > { %5115 = vmatprep.subr.bf16.mxu1 %v2408_v47  ;;  %v5022_v18 = vpop.f32.mrf.mxu0  ;;  %v2297_v35 = vmax.f32 %v1875_v57, 0.0  ;;  %v1854_v60 = vadd.f32 %v6199_v30, %v5943_v0 }
 0x12c   : > { %v6275_v48 = vpop.permute.xlu1 %1231  ;;  %v6277_v28 = vpop.permute.xlu0 %1226  ;;  %5116 = vmatpush3.bf16.msra.mxu1 %v2408_v47  ;;  %v1918_v56 = vadd.f32 %v5022_v18, %v6172_v43  ;;  %v1867_v43 = vadd.f32 %v6216_v14, %v5927_v55  ;;  %v2296_v47 = vmax.f32 %v1870_v50, 0.0  ;;  %v855_v55 = vld [vmem:[%s5727_s23 + $0x338] sm:$0xff]  ;;  %v854_v14 = vld [vmem:[%s5727_s23 + $0x330] sm:$0xff] }
 0x12d   : > { %7558 = vst [vmem:[#allocation47_spill] sm:$0xff] %v6275_v48  ;;  %7559 = vst [vmem:[#allocation48_spill] sm:$0xff] %v6277_v28  ;;  %1321 = vperm.xlu1 %5242, %v843_v25   ;;  %1316 = vperm.xlu0 %5241, %v842_v31   ;;  %v6293_v27 = vpop.f32.mrf.mxu0  ;;  %v841_v25 = vld [vmem:[%s5727_s23 + $0x2c8] sm:$0xff]  ;;  %v2405_v63 = vpack.c.bf16 %v2298_v46, %v2297_v35  ;;  %v839_v46 = vld [vmem:[%s5727_s23 + $0x2b8] sm:$0xff] }
 0x12e   : > { %5117 = vmatprep.subr.bf16.mxu1 %v2407_v13  ;;  %v2308_v34 = vmax.f32 %v1918_v56, 0.0  ;;  %v2294_v56 = vmax.f32 %v1862_v44, 0.0 }
 0x12f   : > { %v5025_v58 = vpop.f32.mrf.mxu0 }
 0x130   : > { %v6287_v31 = vpop.permute.xlu1 %1151  ;;  %v6289_v2 = vpop.permute.xlu0 %1146  ;;  %5118 = vmatpush3.bf16.msra.mxu1 %v2407_v13  ;;  %v6299_v40 = vpack.c.bf16 %v2308_v34, %v2307_v4  ;;  %v1931_v41 = vadd.f32 %v5025_v58, %v6122_v52  ;;  %v1846_v58 = vadd.f32 %v6208_v3, %v5955_v6 }
 0x131   : > { %7560 = vst [vmem:[#allocation49_spill] sm:$0xff] %v6287_v31  ;;  %7561 = vst [vmem:[#allocation50_spill] sm:$0xff] %v6289_v2  ;;  %1391 = vperm.xlu1 %5242, %v857_v29   ;;  %1386 = vperm.xlu0 %5241, %v856_v45   ;;  %v6305_v32 = vpop.f32.mrf.mxu0  ;;  %v2295_v29 = vmax.f32 %v1867_v43, 0.0  ;;  %v1859_v45 = vadd.f32 %v6222_v19, %v5939_v61  ;;  %v838_v61 = vld [vmem:[%s5727_s23 + $0x2b0] sm:$0xff]  ;;  %v1851_v19 = vadd.f32 %v6176_v53, %v5945_v1  ;;  %v853_v1 = vld [vmem:[%s5727_s23 + $0x328] sm:$0xff] }
 0x132   : > { %5119 = vmatprep.subr.bf16.mxu1 %v2406_v15  ;;  %v2311_v50 = vmax.f32 %v1931_v41, 0.0  ;;  %v852_v53 = vld [vmem:[%s5727_s23 + $0x320] sm:$0xff]  ;;  %v1843_v41 = vadd.f32 %v6188_v8, %v5957_v7  ;;  %v2290_v3 = vmax.f32 %v1846_v58, 0.0 }
 0x133   : > { %v5026_v13 = vpop.f32.mrf.mxu0  ;;  %v2404_v5 = vpack.c.bf16 %v2296_v47, %v2295_v29  ;;  %v2293_v4 = vmax.f32 %v1859_v45, 0.0  ;;  %v2291_v44 = vmax.f32 %v1851_v19, 0.0  ;;  %v837_v45 = vld [vmem:[%s5727_s23 + $0x2a8] sm:$0xff] }
 0x134   : > { %v6301_v54 = vpop.permute.xlu1 %1221  ;;  %v6303_v26 = vpop.permute.xlu0 %1216  ;;  %5120 = vmatpush3.bf16.msra.mxu1 %v2406_v15  ;;  %v1934_v18 = vadd.f32 %v5026_v13, %v6120_v49 }
 0x135   : > { %7562 = vst [vmem:[#allocation51_spill] sm:$0xff] %v6301_v54  ;;  %7563 = vst [vmem:[#allocation52_spill] sm:$0xff] %v6303_v26  ;;  %1311 = vperm.xlu1 %5242, %v841_v25   ;;  %1306 = vperm.xlu0 %5241, %v840_v51   ;;  %v6321_v52 = vpop.f32.mrf.mxu0  ;;  %v2292_v51 = vmax.f32 %v1854_v60, 0.0  ;;  %v2403_v35 = vpack.c.bf16 %v2294_v56, %v2293_v4 }
 0x136   : > { %5121 = vmatprep.subr.bf16.mxu1 %v2405_v63  ;;  %v2312_v15 = vmax.f32 %v1934_v18, 0.0  ;;  %v836_v18 = vld [vmem:[%s5727_s23 + $0x2a0] sm:$0xff] }
 0x137   : > { %v5029_v49 = vpop.f32.mrf.mxu0 }
 0x138   : > { %v6315_v38 = vpop.permute.xlu1 %1141  ;;  %v6317_v57 = vpop.permute.xlu0 %1136  ;;  %5122 = vmatpush3.bf16.msra.mxu1 %v2405_v63  ;;  %v6327_v34 = vpack.c.bf16 %v2312_v15, %v2311_v50  ;;  %v1947_v43 = vadd.f32 %v5029_v49, %v6070_v12  ;;  %v2402_v12 = vpack.c.bf16 %v2292_v51, %v2291_v44 }
 0x139   : > { %1381 = vperm.xlu1 %5242, %v855_v55   ;;  %1376 = vperm.xlu0 %5241, %v854_v14   ;;  %v6333_v25 = vpop.f32.mrf.mxu0 }
 0x13a   : > { %5123 = vmatprep.subr.bf16.mxu1 %v2404_v5  ;;  %v2315_v13 = vmax.f32 %v1947_v43, 0.0 }
 0x13b   : > { %v5030_v47 = vpop.f32.mrf.mxu0 }
 0x13c   : > { %v6329_v0 = vpop.permute.xlu1 %1211  ;;  %v6331_v30 = vpop.permute.xlu0 %1206  ;;  %5124 = vmatpush3.bf16.msra.mxu1 %v2404_v5  ;;  %v1950_v63 = vadd.f32 %v5030_v47, %v6068_v9  ;;  %v2289_v9 = vmax.f32 %v1843_v41, 0.0  ;;  %v5309_v47 = vld [vmem:[%s7485_s3 + $0x10] sm:$0xff]  }
 0x13d   : > { %7564 = vst [vmem:[#allocation53_spill] sm:$0xff] %v6329_v0  ;;  %7565 = vst [vmem:[#allocation54_spill] sm:$0xff] %v6331_v30  ;;  %1301 = vperm.xlu1 %5242, %v839_v46   ;;  %1296 = vperm.xlu0 %5241, %v838_v61   ;;  %v6347_v6 = vpop.f32.mrf.mxu0  ;;  %v851_v46 = vld [vmem:[%s5727_s23 + $0x318] sm:$0xff]  ;;  %v850_v61 = vld [vmem:[%s5727_s23 + $0x310] sm:$0xff] }
 0x13e   : > { %5125 = vmatprep.subr.bf16.mxu1 %v2403_v35  ;;  %v2316_v29 = vmax.f32 %v1950_v63, 0.0  ;;  %v2401_v15 = vpack.c.bf16 %v2290_v3, %v2289_v9 }
 0x13f   : > { %v5033_v7 = vpop.f32.mrf.mxu0 }
 0x140   : > { %v6343_v55 = vpop.permute.xlu1 %1131  ;;  %v6345_v14 = vpop.permute.xlu0 %1126  ;;  %5126 = vmatpush3.bf16.msra.mxu1 %v2403_v35  ;;  %v6351_v8 = vpack.c.bf16 %v2316_v29, %v2315_v13  ;;  %v1963_v50 = vadd.f32 %v5033_v7, %v6018_v42  ;;  %v835_v35 = vld [vmem:[%s5727_s23 + $0x298] sm:$0xff]  ;;  %v849_v13 = vld [vmem:[%s5727_s23 + $0x308] sm:$0xff]  ;;  %v848_v29 = vld [vmem:[%s5727_s23 + $0x300] sm:$0xff] }
 0x141   : > { %1371 = vperm.xlu1 %5242, %v853_v1   ;;  %1366 = vperm.xlu0 %5241, %v852_v53   ;;  %v6357_v56 = vpop.f32.mrf.mxu0  ;;  %v834_v1 = vld [vmem:[%s5727_s23 + $0x290] sm:$0xff]  ;;  %v5308_v53 = vld [vmem:[%s7485_s3 + $0x8] sm:$0xff]  }
 0x142   : > { %5127 = vmatprep.subr.bf16.mxu1 %v2402_v12  ;;  %v2319_v43 = vmax.f32 %v1963_v50, 0.0 }
 0x143   : > { %v5034_v49 = vpop.f32.mrf.mxu0 }
 0x144   : > { %v6353_v60 = vpop.permute.xlu1 %1201  ;;  %v6355_v5 = vpop.permute.xlu0 %1196  ;;  %5128 = vmatpush3.bf16.msra.mxu1 %v2402_v12  ;;  %v1966_v19 = vadd.f32 %v5034_v49, %v6016_v39  ;;  %v832_v49 = vld [vmem:[%s5727_s23 + $0x280] sm:$0xff] }
 0x145   : > { %7566 = vst [vmem:[#allocation55_spill] sm:$0xff] %v6353_v60  ;;  %7567 = vst [vmem:[#allocation56_spill] sm:$0xff] %v6355_v5  ;;  %1291 = vperm.xlu1 %5242, %v837_v45   ;;  %1286 = vperm.xlu0 %5241, %v836_v18   ;;  %v6367_v58 = vpop.f32.mrf.mxu0  ;;  %v7508_v5 = vmov 0.0  }
 0x146   : > { %5129 = vmatprep.subr.bf16.mxu1 %v2401_v15  ;;  %v2320_v42 = vmax.f32 %v1966_v19, 0.0 }
 0x147   : > { %v5037_v39 = vpop.f32.mrf.mxu0 }
 0x148   : > { %v6363_v4 = vpop.permute.xlu1 %1121  ;;  %v6365_v51 = vpop.permute.xlu0 %1116  ;;  %5130 = vmatpush3.bf16.msra.mxu1 %v2401_v15  ;;  %v6377_v44 = vpack.c.bf16 %v2320_v42, %v2319_v43  ;;  %v1979_v3 = vadd.f32 %v5037_v39, %v6158_v24  ;;  %v5310_v24 = vld [vmem:[%s7485_s3 + $0x18] sm:$0xff]   ;;  %v3738_v39 = vld [vmem:[%s7494_s12 + $0x70] sm:$0xff] }
 0x149   : > { %1361 = vperm.xlu1 %5242, %v851_v46   ;;  %1356 = vperm.xlu0 %5241, %v850_v61   ;;  %v6383_v12 = vpop.f32.mrf.mxu0  ;;  %v833_v61 = vld [vmem:[%s5727_s23 + $0x288] sm:$0xff]  ;;  %s7356_s23 = scalar_lea.vmem [#allocation2], %s4412_s19  ;;  %s7392_s19 = scalar_lea.hbm %s7498_s16, %s4582_s2 }
 0x14a   : > { %v2323_v15 = vmax.f32 %v1979_v3, 0.0  ;;  %5139 = vmatprep.subr.bf16.mxu1 %v7508_v5  ;;  %s4235_s24 = sshll.u32 %s7356_s23, 4  ;;  %s7395_s24 = int_to_ptr.vmem [resolvable:$true] %s4235_s24 }
 0x14b   : > { %5132 = vmatmul.mubr.bf16.vlgmr.msra.gmra.mxu1 %v5308_v53  ;;  %v5038_v45 = vpop.f32.mrf.mxu0  ;;  %v3739_v53 = vld [vmem:[%s7494_s12 + $0x78] sm:$0xff]  ;;  %s5450_s28 = scalar_lea.vmem %s7395_s24, 256 }
 0x14c   : > { %v6379_v41 = vpop.permute.xlu1 %1191  ;;  %v6381_v63 = vpop.permute.xlu0 %1186  ;;  %5135 = vmatprep.mubr.bf16.mxu1 %v5309_v47  ;;  %v1982_v18 = vadd.f32 %v5038_v45, %v6156_v23  ;;  %p5451_p12 = scmp.ne.s32.totalorder %s7395_s24, %s5450_s28 }
 0x14d   : > { %7568 = vst [vmem:[#allocation57_spill] sm:$0xff] %v6379_v41  ;;  %7569 = vst [vmem:[#allocation58_spill] sm:$0xff] %v6381_v63  ;;  %1281 = vperm.xlu1 %5242, %v835_v35   ;;  %1276 = vperm.xlu0 %5241, %v834_v1   ;;  %v6393_v50 = vpop.f32.mrf.mxu0  ;;  %v3725_v63 = vld [vmem:[%s7494_s12 + $0x8] sm:$0xff] }
 0x14e   : > { %v2324_v46 = vmax.f32 %v1982_v18, 0.0  ;;  %p5452_p13 = pnand %p5451_p12, %p5695_p4 }
 0x14f   : > { %v5041_v19 = vpop.f32.mrf.mxu0 }
 0x150   : > { %v6389_v7 = vpop.permute.xlu1 %1111  ;;  %v6391_v9 = vpop.permute.xlu0 %1106  ;;  %v6400_v43 = vpack.c.bf16 %v2324_v46, %v2323_v15  ;;  %v1995_v1 = vadd.f32 %v5041_v19, %v6106_v36  ;;  %p5453_p0 = pneg %p5452_p13 }
 0x151   : > { %1351 = vperm.xlu1 %5242, %v849_v13   ;;  %1346 = vperm.xlu0 %5241, %v848_v29   ;;  %v1986_v35 = vpop.f32.mrf.mxu0 }
 0x152   : > { %v1987_v3 = vadd.f32 %v1986_v35, %v6132_v62  ;;  %v2327_v36 = vmax.f32 %v1995_v1, 0.0  ;;  %v3736_v62 = vld [vmem:[%s7494_s12 + $0x60] sm:$0xff] }
 0x153   : > { %5136 = vmatmul.mubr.bf16.gmra.mxu1 %v5310_v24  ;;  %v5042_v47 = vpop.f32.mrf.mxu0 }
 0x154   : > { %v6402_v23 = vpop.permute.xlu1 %2924  ;;  %v6404_v42 = vpop.permute.xlu0 %2919  ;;  %v1998_v13 = vadd.f32 %v5042_v47, %v6104_v33  ;;  %v3734_v47 = vld [vmem:[%s7494_s12 + $0x50] sm:$0xff] }
 0x155   : > { %7570 = vst [vmem:[#allocation59_spill] sm:$0xff] %v6402_v23  ;;  %7571 = vst [vmem:[#allocation60_spill] sm:$0xff] %v6404_v42  ;;  %1271 = vperm.xlu1 %5242, %v833_v61   ;;  %1266 = vperm.xlu0 %5241, %v832_v49   ;;  %v1989_v18 = vpop.f32.mrf.mxu0  ;;  %v3737_v61 = vld [vmem:[%s7494_s12 + $0x68] sm:$0xff]  ;;  %v2325_v49 = vmax.f32 %v1987_v3, 0.0 }
 0x156   : > { %v2328_v15 = vmax.f32 %v1998_v13, 0.0  ;;  %v1990_v46 = vadd.f32 %v1989_v18, %v6130_v59 }
 0x157   : > { %v6426_v33 = vpop.f32.mrf.mxu0 }
 0x158   : > { %v6415_v29 = vpop.permute.xlu1 %2844  ;;  %v6417_v45 = vpop.permute.xlu0 %2839  ;;  %v6428_v24 = vpack.c.bf16 %v2328_v15, %v2327_v36  ;;  %v2326_v19 = vmax.f32 %v1990_v46, 0.0  ;;  %v3733_v15 = vld [vmem:[%s7494_s12 + $0x48] sm:$0xff]  ;;  %v3732_v46 = vld [vmem:[%s7494_s12 + $0x40] sm:$0xff] }
 0x159   : > { %7572 = vst [vmem:[#allocation61_spill] sm:$0xff] %v6415_v29  ;;  %7573 = vst [vmem:[#allocation62_spill] sm:$0xff] %v6417_v45  ;;  %3817 = vperm.xlu1 %5242, %v3739_v53   ;;  %3812 = vperm.xlu0 %5241, %v3738_v39   ;;  %v6434_v53 = vpop.f32.mrf.mxu0  ;;  %v3735_v39 = vld [vmem:[%s7494_s12 + $0x58] sm:$0xff] }
 0x15a   : > { %v6436_v59 = vpack.c.bf16 %v2326_v19, %v2325_v49 }
 0x15b   : > { %v6444_v3 = vpop.f32.mrf.mxu0 }
 0x15c   : > { %v6430_v35 = vpop.permute.xlu1 %2914  ;;  %v6432_v1 = vpop.permute.xlu0 %2909 }
 0x15d   : > { %7574 = vst [vmem:[#allocation63_spill] sm:$0xff] %v6430_v35  ;;  %7575 = vst [vmem:[#allocation64_spill] sm:$0xff] %v6432_v1  ;;  %3807 = vperm.xlu1 %5242, %v3737_v61   ;;  %3802 = vperm.xlu0 %5241, %v3736_v62   ;;  %v6450_v36 = vpop.f32.mrf.mxu0 }
 0x15f   : > { %v6458_v61 = vpop.f32.mrf.mxu0 }
 0x160   : > { %v6446_v13 = vpop.permute.xlu1 %2834  ;;  %v6448_v18 = vpop.permute.xlu0 %2829 }
 0x161   : > { %7576 = vst [vmem:[#allocation65_spill] sm:$0xff] %v6446_v13  ;;  %7577 = vst [vmem:[#allocation66_spill] sm:$0xff] %v6448_v18  ;;  %3797 = vperm.xlu1 %5242, %v3735_v39   ;;  %3792 = vperm.xlu0 %5241, %v3734_v47   ;;  %v6464_v19 = vpop.f32.mrf.mxu0  ;;  %v3731_v39 = vld [vmem:[%s7494_s12 + $0x38] sm:$0xff]  ;;  %v3730_v47 = vld [vmem:[%s7494_s12 + $0x30] sm:$0xff] }
 0x163   : > { %v6472_v23 = vpop.f32.mrf.mxu0 }
 0x164   : > { %v6460_v62 = vpop.permute.xlu1 %2904  ;;  %v6462_v49 = vpop.permute.xlu0 %2899 }
 0x165   : > { %7578 = vst [vmem:[#allocation67_spill] sm:$0xff] %v6460_v62  ;;  %7579 = vst [vmem:[#allocation68_spill] sm:$0xff] %v6462_v49  ;;  %3787 = vperm.xlu1 %5242, %v3733_v15   ;;  %3782 = vperm.xlu0 %5241, %v3732_v46   ;;  %v6478_v1 = vpop.f32.mrf.mxu0  ;;  %v3729_v15 = vld [vmem:[%s7494_s12 + $0x28] sm:$0xff]  ;;  %v3728_v46 = vld [vmem:[%s7494_s12 + $0x20] sm:$0xff] }
 0x167   : > { %v5053_v62 = vpop.f32.mrf.mxu0 }
 0x168   : > { %v6474_v42 = vpop.permute.xlu1 %2824  ;;  %v6476_v35 = vpop.permute.xlu0 %2819  ;;  %v2043_v13 = vadd.f32 %v5053_v62, %v6365_v51 }
 0x169   : > { %7580 = vst [vmem:[#allocation69_spill] sm:$0xff] %v6474_v42  ;;  %7581 = vst [vmem:[#allocation70_spill] sm:$0xff] %v6476_v35  ;;  %3777 = vperm.xlu1 %5242, %v3731_v39   ;;  %3772 = vperm.xlu0 %5241, %v3730_v47   ;;  %v2034_v45 = vpop.f32.mrf.mxu0  ;;  %v3727_v39 = vld [vmem:[%s7494_s12 + $0x18] sm:$0xff]  ;;  %v3726_v47 = vld [vmem:[%s7494_s12 + $0x10] sm:$0xff] }
 0x16a   : > { %v2035_v42 = vadd.f32 %v2034_v45, %v6391_v9  ;;  %v2339_v51 = vmax.f32 %v2043_v13, 0.0  ;;  %v3724_v9 = vld [vmem:[%s7494_s12] sm:$0xff] }
 0x16b   : > { %v5054_v18 = vpop.f32.mrf.mxu0 }
 0x16c   : > { %v6486_v49 = vpop.permute.xlu1 %2894  ;;  %v6488_v29 = vpop.permute.xlu0 %2889  ;;  %v2337_v45 = vmax.f32 %v2035_v42, 0.0  ;;  %v3619_v42 = vld [vmem:[%s7492_s10] sm:$0xff] }
 0x16d   : > { %7582 = vst [vmem:[#allocation71_spill] sm:$0xff] %v6486_v49  ;;  %7583 = vst [vmem:[#allocation72_spill] sm:$0xff] %v6488_v29  ;;  %3767 = vperm.xlu1 %5242, %v3729_v15   ;;  %3762 = vperm.xlu0 %5241, %v3728_v46   ;;  %v2046_v49 = vadd.f32 %v5054_v18, %v6363_v4  ;;  %v2037_v15 = vpop.f32.mrf.mxu0 }
 0x16e   : > { %v2038_v46 = vadd.f32 %v2037_v15, %v6389_v7 }
 0x16f   : > { %v2340_v62 = vmax.f32 %v2046_v49, 0.0  ;;  %v5057_v4 = vpop.f32.mrf.mxu0 }
 0x170   : > { %v6499_v35 = vpop.permute.xlu1 %2814  ;;  %v6501_v29 = vpop.permute.xlu0 %2809  ;;  %v2059_v49 = vadd.f32 %v5057_v4, %v6317_v57 }
 0x171   : > { %7584 = vst [vmem:[#allocation73_spill] sm:$0xff] %v6499_v35  ;;  %7585 = vst [vmem:[#allocation74_spill] sm:$0xff] %v6501_v29  ;;  %3757 = vperm.xlu1 %5242, %v3727_v39   ;;  %3752 = vperm.xlu0 %5241, %v3726_v47   ;;  %v6510_v18 = vpack.c.bf16 %v2340_v62, %v2339_v51  ;;  %v2338_v35 = vmax.f32 %v2038_v46, 0.0  ;;  %v2050_v13 = vpop.f32.mrf.mxu0  ;;  %v3620_v47 = vld [vmem:[%s7492_s10 + $0x8] sm:$0xff] }
 0x172   : > { %v2051_v51 = vadd.f32 %v2050_v13, %v6345_v14  ;;  %v2343_v57 = vmax.f32 %v2059_v49, 0.0  ;;  %v4029_v14 = vld [vmem:[%s7496_s14] sm:$0xff] }
 0x173   : > { %7586 = vst [vmem:[#allocation75_spill] sm:$0xff] %v6510_v18  ;;  %v6516_v7 = vpack.c.bf16 %v2338_v35, %v2337_v45  ;;  %v5058_v15 = vpop.f32.mrf.mxu0  ;;  %v4030_v45 = vld [vmem:[%s7496_s14 + $0x8] sm:$0xff] }
 0x174   : > { %v6512_v29 = vpop.permute.xlu1 %2884  ;;  %v6514_v39 = vpop.permute.xlu0 %2879  ;;  %v2062_v62 = vadd.f32 %v5058_v15, %v6315_v38  ;;  %v2341_v13 = vmax.f32 %v2051_v51, 0.0  ;;  %v4031_v51 = vld [vmem:[%s7496_s14 + $0x10] sm:$0xff] }
 0x175   : > { %7587 = vst [vmem:[#allocation76_spill] sm:$0xff] %v6512_v29  ;;  %7588 = vst [vmem:[#allocation77_spill] sm:$0xff] %v6514_v39  ;;  %3747 = vperm.xlu1 %5242, %v3725_v63   ;;  %3742 = vperm.xlu0 %5241, %v3724_v9   ;;  %v2053_v35 = vpop.f32.mrf.mxu0 }
 0x176   : > { %7589 = vst [vmem:[#allocation78_spill] sm:$0xff] %v6516_v7  ;;  %v2344_v9 = vmax.f32 %v2062_v62, 0.0  ;;  %v2054_v4 = vadd.f32 %v2053_v35, %v6343_v55  ;;  %v4032_v62 = vld [vmem:[%s7496_s14 + $0x18] sm:$0xff] }
 0x177   : > { %v6538_v38 = vpop.f32.mrf.mxu0 }
 0x178   : > { %v6527_v46 = vpop.permute.xlu1 %2804  ;;  %v6529_v63 = vpop.permute.xlu0 %2799  ;;  %7592 = vst [vmem:[#allocation81_spill] sm:$0xff] %v6538_v38  ;;  %v6540_v15 = vpack.c.bf16 %v2344_v9, %v2343_v57  ;;  %v2342_v29 = vmax.f32 %v2054_v4, 0.0 }
 0x179   : > { %7590 = vst [vmem:[#allocation79_spill] sm:$0xff] %v6527_v46  ;;  %7591 = vst [vmem:[#allocation80_spill] sm:$0xff] %v6529_v63  ;;  %3628 = vperm.xlu1 %5242, %v3620_v47   ;;  %3623 = vperm.xlu0 %5241, %v3619_v42   ;;  %v6546_v42 = vpop.f32.mrf.mxu0 }
 0x17a   : > { %7593 = vst [vmem:[#allocation82_spill] sm:$0xff] %v6540_v15  ;;  %7596 = vst [vmem:[#allocation85_spill] sm:$0xff] %v6546_v42  ;;  %v6548_v55 = vpack.c.bf16 %v2342_v29, %v2341_v13  ;;  %v4034_v29 = vld [vmem:[%s7496_s14 + $0x28] sm:$0xff] }
 0x17b   : > { %v6556_v35 = vpop.f32.mrf.mxu0 }
 0x17c   : > { %v6542_v47 = vpop.permute.xlu1 %2874  ;;  %v6544_v49 = vpop.permute.xlu0 %2869  ;;  %7597 = vst [vmem:[#allocation86_spill] sm:$0xff] %v6548_v55  ;;  %7598 = vst [vmem:[#allocation87_spill] sm:$0xff] %v6556_v35 }
 0x17d   : > { %7594 = vst [vmem:[#allocation83_spill] sm:$0xff] %v6542_v47  ;;  %7595 = vst [vmem:[#allocation84_spill] sm:$0xff] %v6544_v49  ;;  %4044 = vperm.xlu1 %5242, %v4030_v45   ;;  %4039 = vperm.xlu0 %5241, %v4029_v14   ;;  %v6562_v4 = vpop.f32.mrf.mxu0  ;;  %v4033_v45 = vld [vmem:[%s7496_s14 + $0x20] sm:$0xff] }
 0x17e   : > { %7601 = vst [vmem:[#allocation90_spill] sm:$0xff] %v6562_v4 }
 0x17f   : > { %v6570_v14 = vpop.f32.mrf.mxu0 }
 0x180   : > { %v6558_v57 = vpop.permute.xlu1 %2794  ;;  %v6560_v9 = vpop.permute.xlu0 %2789 }
 0x181   : > { %7599 = vst [vmem:[#allocation88_spill] sm:$0xff] %v6558_v57  ;;  %7600 = vst [vmem:[#allocation89_spill] sm:$0xff] %v6560_v9  ;;  %4054 = vperm.xlu1 %5242, %v4032_v62   ;;  %4049 = vperm.xlu0 %5241, %v4031_v51   ;;  %v6576_v47 = vpop.f32.mrf.mxu0  ;;  %v4036_v62 = vld [vmem:[%s7496_s14 + $0x38] sm:$0xff]  ;;  %v4035_v51 = vld [vmem:[%s7496_s14 + $0x30] sm:$0xff] }
 0x182   : > { %7604 = vst [vmem:[#allocation93_spill] sm:$0xff] %v6576_v47 }
 0x183   : > { %v6584_v49 = vpop.f32.mrf.mxu0 }
 0x184   : > { %v6572_v13 = vpop.permute.xlu1 %2864  ;;  %v6574_v39 = vpop.permute.xlu0 %2859 }
 0x185   : > { %7602 = vst [vmem:[#allocation91_spill] sm:$0xff] %v6572_v13  ;;  %7603 = vst [vmem:[#allocation92_spill] sm:$0xff] %v6574_v39  ;;  %4064 = vperm.xlu1 %5242, %v4034_v29   ;;  %4059 = vperm.xlu0 %5241, %v4033_v45   ;;  %v6590_v13 = vpop.f32.mrf.mxu0  ;;  %v2615_v29 = vld [vmem:[%s7488_s6] sm:$0xff] }
 0x187   : > { %v6595_v45 = vpop.f32.mrf.mxu0 }
 0x188   : > { %v6586_v46 = vpop.permute.xlu1 %2784  ;;  %v6588_v63 = vpop.permute.xlu0 %2779  ;;  %7607 = vst [vmem:[#allocation96_spill] sm:$0xff] %v6595_v45 }
 0x189   : > { %7605 = vst [vmem:[#allocation94_spill] sm:$0xff] %v6586_v46  ;;  %7606 = vst [vmem:[#allocation95_spill] sm:$0xff] %v6588_v63  ;;  %4074 = vperm.xlu1 %5242, %v4036_v62   ;;  %4069 = vperm.xlu0 %5241, %v4035_v51   ;;  %v6601_v9 = vpop.f32.mrf.mxu0 }
 0x18a   : > { %7610 = vst [vmem:[#allocation99_spill] sm:$0xff] %v6601_v9 }
 0x18b   : > { %v6603_v46 = vpop.f32.mrf.mxu0 }
 0x18c   : > { %v6597_v39 = vpop.permute.xlu1 %2854  ;;  %v6599_v57 = vpop.permute.xlu0 %2849  ;;  %7611 = vst [vmem:[#allocation100_spill] sm:$0xff] %v6603_v46 }
 0x18d   : > { %7608 = vst [vmem:[#allocation97_spill] sm:$0xff] %v6597_v39  ;;  %7609 = vst [vmem:[#allocation98_spill] sm:$0xff] %v6599_v57  ;;  %2618 = vperm.xlu0 %5241, %v2615_v29   ;;  %v6609_v62 = vpop.f32.mrf.mxu0 }
 0x18e   : > { %7614 = vst [vmem:[#allocation103_spill] sm:$0xff] %v6609_v62 }
 0x18f   : > { %v6611_v51 = vpop.f32.mrf.mxu0 }
 0x190   : > { %v6605_v63 = vpop.permute.xlu1 %2774  ;;  %v6607_v7 = vpop.permute.xlu0 %2769  ;;  %7615 = vst [vmem:[#allocation104_spill] sm:$0xff] %v6611_v51 }
 0x191   : > { %7612 = vst [vmem:[#allocation101_spill] sm:$0xff] %v6605_v63  ;;  %7613 = vst [vmem:[#allocation102_spill] sm:$0xff] %v6607_v7  ;;  %v6617_v39 = vpop.f32.mrf.mxu0 }
 0x192   : > { %7618 = vst [vmem:[#allocation107_spill] sm:$0xff] %v6617_v39 }
 0x193   : > { %v6619_v57 = vpop.f32.mrf.mxu0 }
 0x194   : > { %v6613_v18 = vpop.permute.xlu1 %1421  ;;  %v6615_v55 = vpop.permute.xlu0 %1416  ;;  %7619 = vst [vmem:[#allocation108_spill] sm:$0xff] %v6619_v57 }
 0x195   : > { %7616 = vst [vmem:[#allocation105_spill] sm:$0xff] %v6613_v18  ;;  %7617 = vst [vmem:[#allocation106_spill] sm:$0xff] %v6615_v55  ;;  %v6625_v15 = vpop.f32.mrf.mxu0 }
 0x196   : > { %7622 = vst [vmem:[#allocation111_spill] sm:$0xff] %v6625_v15 }
 0x197   : > { %v6627_v63 = vpop.f32.mrf.mxu0 }
 0x198   : > { %v6621_v9 = vpop.permute.xlu1 %1341  ;;  %v6623_v29 = vpop.permute.xlu0 %1336  ;;  %7623 = vst [vmem:[#allocation112_spill] sm:$0xff] %v6627_v63 }
 0x199   : > { %7620 = vst [vmem:[#allocation109_spill] sm:$0xff] %v6621_v9  ;;  %7621 = vst [vmem:[#allocation110_spill] sm:$0xff] %v6623_v29  ;;  %v6633_v41 = vpop.f32.mrf.mxu0 }
 0x19a   : > { %7626 = vst [vmem:[#allocation115_spill] sm:$0xff] %v6633_v41 }
 0x19b   : > { %v6635_v18 = vpop.f32.mrf.mxu0 }
 0x19c   : > { %v6629_v7 = vpop.permute.xlu1 %1411  ;;  %v6631_v62 = vpop.permute.xlu0 %1406  ;;  %7627 = vst [vmem:[#allocation116_spill] sm:$0xff] %v6635_v18 }
 0x19d   : > { %7624 = vst [vmem:[#allocation113_spill] sm:$0xff] %v6629_v7  ;;  %7625 = vst [vmem:[#allocation114_spill] sm:$0xff] %v6631_v62  ;;  %v6642_v29 = vpop.f32.mrf.mxu0 }
 0x19e   : > { %7630 = vst [vmem:[#allocation119_spill] sm:$0xff] %v6642_v29 }
 0x19f   : > { %v6644_v9 = vpop.f32.mrf.mxu0 }
 0x1a0   : > { %v6637_v55 = vpop.permute.xlu1 %1331  ;;  %v6639_v45 = vpop.permute.xlu0 %1326 }
 0x1a1   : > { %7628 = vst [vmem:[#allocation117_spill] sm:$0xff] %v6637_v55  ;;  %7629 = vst [vmem:[#allocation118_spill] sm:$0xff] %v6639_v45  ;;  %v6650_v62 = vpop.f32.mrf.mxu0 }
 0x1a3   : > { %v6652_v60 = vpop.f32.mrf.mxu0 }
 0x1a4   : > { %v6646_v46 = vpop.permute.xlu1 %1401  ;;  %v6648_v7 = vpop.permute.xlu0 %1396 }
 0x1a5   : > { %7631 = vst [vmem:[#allocation120_spill] sm:$0xff] %v6646_v46  ;;  %7632 = vst [vmem:[#allocation121_spill] sm:$0xff] %v6648_v7  ;;  %v6658_v45 = vpop.f32.mrf.mxu0  ;;  %v7637_v46 = vmov 0.0  }
 0x1a6   : > { %5147 = vmatprep.mubr.msk.bf16.mxu1 %vm5560_vm0, %v7637_v46 }
 0x1a7   : > { %v5085_v30 = vpop.f32.mrf.mxu0 }
 0x1a8   : > { %v6654_v39 = vpop.permute.xlu1 %1321  ;;  %v6656_v55 = vpop.permute.xlu0 %1316 }
 0x1a9   : > { %7633 = vst [vmem:[#allocation122_spill] sm:$0xff] %v6654_v39  ;;  %7634 = vst [vmem:[#allocation123_spill] sm:$0xff] %v6656_v55  ;;  %v2162_v0 = vpop.f32.mrf.mxu0 }
 0x1ab   : > { %v5086_v51 = vpop.f32.mrf.mxu0 }
 0x1ac   : > { %v6660_v5 = vpop.permute.xlu1 %1391  ;;  %v6662_v15 = vpop.permute.xlu0 %1386 }
 0x1ad   : > { %7635 = vst [vmem:[#allocation124_spill] sm:$0xff] %v6660_v5  ;;  %7636 = vst [vmem:[#allocation125_spill] sm:$0xff] %v6662_v15  ;;  %v2165_v42 = vpop.f32.mrf.mxu0 }
 0x1af   : > { %v5089_v39 = vpop.f32.mrf.mxu0 }
 0x1b0   : > { %v6665_v7 = vpop.permute.xlu1 %1311  ;;  %v6667_v26 = vpop.permute.xlu0 %1306 }
 0x1b1   : > { %7638 = vst [vmem:[#allocation126_spill] sm:$0xff] %v6665_v7  ;;  %7639 = vst [vmem:[#allocation127_spill] sm:$0xff] %v6667_v26  ;;  %v2178_v57 = vpop.f32.mrf.mxu0 }
 0x1b3   : > { %v5090_v54 = vpop.f32.mrf.mxu0 }
 0x1b4   : > { %v6669_v2 = vpop.permute.xlu1 %1381  ;;  %v6671_v55 = vpop.permute.xlu0 %1376 }
 0x1b5   : > { %7640 = vst [vmem:[#allocation128_spill] sm:$0xff] %v6669_v2  ;;  %7641 = vst [vmem:[#allocation129_spill] sm:$0xff] %v6671_v55  ;;  %v2181_v26 = vpop.f32.mrf.mxu0 }
 0x1b8   : > { %v1302_v5 = vpop.permute.xlu1 %1301  ;;  %v1297_v4 = vpop.permute.xlu0 %1296 }
 0x1b9   : > { %v2190_v15 = vadd.f32 %v5090_v54, %v1302_v5  ;;  %v2187_v31 = vadd.f32 %v5089_v39, %v1297_v4 }
 0x1bb   : > { %v2376_v41 = vmax.f32 %v2190_v15, 0.0  ;;  %v2375_v28 = vmax.f32 %v2187_v31, 0.0 }
 0x1bc   : > { %v6673_v38 = vpop.permute.xlu1 %1371  ;;  %v6675_v29 = vpop.permute.xlu0 %1366 }
 0x1bd   : > { %v6677_v7 = vpack.c.bf16 %v2376_v41, %v2375_v28 }
 0x1bf   : > { %7642 = vst [vmem:[#allocation130_spill] sm:$0xff] %v6677_v7 }
 0x1c0   : > { %v1292_v48 = vpop.permute.xlu1 %1291  ;;  %v1287_v35 = vpop.permute.xlu0 %1286 }
 0x1c1   : > { %v2182_v2 = vadd.f32 %v2181_v26, %v1292_v48  ;;  %v2179_v20 = vadd.f32 %v2178_v57, %v1287_v35 }
 0x1c3   : > { %v2374_v55 = vmax.f32 %v2182_v2, 0.0  ;;  %v2373_v63 = vmax.f32 %v2179_v20, 0.0 }
 0x1c4   : > { %v6679_v47 = vpop.permute.xlu1 %1361  ;;  %v6681_v18 = vpop.permute.xlu0 %1356 }
 0x1c5   : > { %7643 = vst [vmem:[#allocation131_spill] sm:$0xff] %v6681_v18  ;;  %v6683_v54 = vpack.c.bf16 %v2374_v55, %v2373_v63 }
 0x1c7   : > { %7644 = vst [vmem:[#allocation132_spill] sm:$0xff] %v6683_v54 }
 0x1c8   : > { %v1282_v31 = vpop.permute.xlu1 %1281  ;;  %v1277_v5 = vpop.permute.xlu0 %1276 }
 0x1c9   : > { %v2174_v39 = vadd.f32 %v5086_v51, %v1282_v31  ;;  %v2171_v15 = vadd.f32 %v5085_v30, %v1277_v5 }
 0x1cb   : > { %v2372_v4 = vmax.f32 %v2174_v39, 0.0  ;;  %v2371_v28 = vmax.f32 %v2171_v15, 0.0 }
 0x1cc   : > { %v6685_v41 = vpop.permute.xlu1 %1351  ;;  %v6687_v7 = vpop.permute.xlu0 %1346 }
 0x1cd   : > { %v6689_v48 = vpack.c.bf16 %v2372_v4, %v2371_v28 }
 0x1cf   : > { %7645 = vst [vmem:[#allocation133_spill] sm:$0xff] %v6689_v48 }
 0x1d0   : > { %v1272_v2 = vpop.permute.xlu1 %1271  ;;  %v1267_v20 = vpop.permute.xlu0 %1266 }
 0x1d1   : > { %v2166_v26 = vadd.f32 %v2165_v42, %v1272_v2  ;;  %v2163_v35 = vadd.f32 %v2162_v0, %v1267_v20 }
 0x1d3   : > { %v2370_v57 = vmax.f32 %v2166_v26, 0.0  ;;  %v2369_v18 = vmax.f32 %v2163_v35, 0.0 }
 0x1d5   : > { %v6691_v63 = vpack.c.bf16 %v2370_v57, %v2369_v18 }
 0x20b   : > { %v5133_v55 = vpop.f32.mrf.mxu1 }
 0x20c   : > { %v2580_v35 = vadd.f32 %v5133_v55, %v5984_v22 }
 0x20d   : > { %v2571_v54 = vpop.f32.mrf.mxu1 }
 0x20f   : > { %v5134_v51 = vpop.f32.mrf.mxu1 }
 0x210   : > { %v2583_v18 = vadd.f32 %v5134_v51, %v5982_v21  ;;  %v7649_v21 = vld [vmem:[#allocation18_spill] sm:$0xff] }
 0x211   : > { %v2574_v30 = vpop.f32.mrf.mxu1 }
 0x213   : > { %v5137_v31 = vpop.f32.mrf.mxu1 }
 0x214   : > { %v2596_v39 = vadd.f32 %v5137_v31, %v5963_v11  ;;  %v2605_v11 = vmax.f32 %v2583_v18, 0.0  ;;  %v7646_v31 = vld [vmem:[#allocation15_spill] sm:$0xff] }
 0x215   : > { %v2587_v5 = vpop.f32.mrf.mxu1 }
 0x216   : > { %v2608_v48 = vmax.f32 %v2596_v39, 0.0  ;;  %v2588_v42 = vadd.f32 %v2587_v5, %v5975_v17  ;;  %v7647_v39 = vld [vmem:[#allocation17_spill] sm:$0xff]  ;;  %v2604_v5 = vmax.f32 %v2580_v35, 0.0 }
 0x217   : > { %v5138_v15 = vpop.f32.mrf.mxu1  ;;  %v2030_v17 = vadd.f32 %v6472_v23, %v7647_v39  ;;  %v7656_v39 = vld [vmem:[#allocation25_spill] sm:$0xff] }
 0x218   : > { %v2599_v4 = vadd.f32 %v5138_v15, %v5961_v10  ;;  %v2606_v57 = vmax.f32 %v2588_v42, 0.0  ;;  %v2575_v10 = vadd.f32 %v2574_v30, %v7646_v31  ;;  %v2611_v22 = vpack.c.bf16 %v2605_v11, %v2604_v5  ;;  %v7654_v11 = vld [vmem:[#allocation22_spill] sm:$0xff]  ;;  %v2614_v31 = vld [vmem:[%s7487_s5] sm:$0xf] }
 0x219   : > { %v2590_v28 = vpop.f32.mrf.mxu1  ;;  %v2336_v51 = vmax.f32 %v2030_v17, 0.0 }
 0x21a   : > { %v2609_v0 = vmax.f32 %v2599_v4, 0.0  ;;  %v2591_v2 = vadd.f32 %v2590_v28, %v5973_v16  ;;  %v7648_v4 = vld [vmem:[#allocation16_spill] sm:$0xff]  ;;  %v2603_v55 = vmax.f32 %v2575_v10, 0.0  ;;  %v7650_v28 = vld [vmem:[#allocation19_spill] sm:$0xff] }
 0x21b   : > { %v2572_v16 = vadd.f32 %v2571_v54, %v7648_v4  ;;  %v2022_v42 = vadd.f32 %v6478_v1, %v7650_v28  ;;  %v7652_v54 = vld [vmem:[#allocation21_spill] sm:$0xff]  ;;  %v1955_v1 = vadd.f32 %v6357_v56, %v7654_v11  ;;  %v2006_v56 = vadd.f32 %v6450_v36, %v7656_v39  ;;  %v7659_v28 = vld [vmem:[#allocation28_spill] sm:$0xff]  ;;  %v7665_v11 = vld [vmem:[#allocation35_spill] sm:$0xff] }
 0x21c   : > { %v2613_v20 = vpack.c.bf16 %v2609_v0, %v2608_v48  ;;  %v2607_v26 = vmax.f32 %v2591_v2, 0.0  ;;  %v2027_v48 = vadd.f32 %v6458_v61, %v7649_v21  ;;  %v7651_v2 = vld [vmem:[#allocation20_spill] sm:$0xff]  ;;  %v1958_v18 = vadd.f32 %v6367_v58, %v7652_v54 }
 0x21d   : > { %v2602_v30 = vmax.f32 %v2572_v16, 0.0  ;;  %v2019_v23 = vadd.f32 %v6464_v19, %v7651_v2  ;;  %v5313_v19 = vld [vmem:[%s7489_s7 + $0x4] ss:$16 sps:$4 sm:$0xff]   ;;  %v7655_v58 = vld [vmem:[#allocation24_spill] sm:$0xff]  ;;  %v2317_v5 = vmax.f32 %v1955_v1, 0.0  ;;  %v7657_v16 = vld [vmem:[#allocation26_spill] sm:$0xff]  ;;  %v1939_v36 = vadd.f32 %v6333_v25, %v7659_v28 }
 0x21e   : > { %5140 = vmatpush3.bf16.msra.mxu1 %v2613_v20  ;;  %v2612_v15 = vpack.c.bf16 %v2607_v26, %v2606_v57  ;;  %v2335_v0 = vmax.f32 %v2027_v48, 0.0  ;;  %v7653_v20 = vld [vmem:[#allocation23_spill] sm:$0xff]  ;;  %v2334_v57 = vmax.f32 %v2022_v42, 0.0  ;;  %v2003_v21 = vadd.f32 %v6434_v53, %v7657_v16  ;;  %v7660_v53 = vld [vmem:[#allocation29_spill] sm:$0xff]  ;;  %v7666_v1 = vld [vmem:[#allocation34_spill] sm:$0xff] }
 0x21f   : > { %5141 = vmatprep.subr.bf16.mxu1 %v7637_v46  ;;  %v2610_v61 = vpack.c.bf16 %v2603_v55, %v2602_v30  ;;  %v2014_v26 = vadd.f32 %v6444_v3, %v7653_v20  ;;  %v2333_v10 = vmax.f32 %v2019_v23, 0.0  ;;  %v2318_v3 = vmax.f32 %v1958_v18, 0.0  ;;  %v7658_v48 = vld [vmem:[#allocation27_spill] sm:$0xff]  ;;  %v7674_v16 = vld [vmem:[#allocation116_spill] sm:$0xff] }
 0x220   : > { %v2424_v35 = vpack.c.bf16 %v2336_v51, %v2335_v0  ;;  %v2330_v51 = vmax.f32 %v2006_v56, 0.0  ;;  %v2329_v42 = vmax.f32 %v2003_v21, 0.0  ;;  %v2313_v0 = vmax.f32 %v1939_v36, 0.0  ;;  %v7662_v18 = vld [vmem:[#allocation31_spill] sm:$0xff]  ;;  %v7671_v56 = vld [vmem:[#allocation40_spill] sm:$0xff] }
 0x221   : > { %v2423_v17 = vpack.c.bf16 %v2334_v57, %v2333_v10  ;;  %v1926_v2 = vadd.f32 %v6321_v52, %v7660_v53  ;;  %v7664_v52 = vld [vmem:[#allocation33_spill] sm:$0xff] }
 0x222   : > { %5142 = vmatpush3.bf16.msra.mxu1 %v2612_v15  ;;  %v2332_v15 = vmax.f32 %v2014_v26, 0.0  ;;  %v7663_v26 = vld [vmem:[#allocation32_spill] sm:$0xff] }
 0x223   : > { %5143 = vmatprep.subr.bf16.mxu1 %v7637_v46  ;;  %v2310_v25 = vmax.f32 %v1926_v2, 0.0 }
 0x226   : > { %5144 = vmatpush3.bf16.msra.mxu1 %v2611_v22  ;;  %v2415_v22 = vpack.c.bf16 %v2318_v3, %v2317_v5  ;;  %v7672_v5 = vld [vmem:[#allocation41_spill] sm:$0xff] }
 0x227   : > { %5145 = vmatprep.subr.bf16.mxu1 %v7637_v46  ;;  %v2011_v46 = vadd.f32 %v6426_v33, %v7655_v58  ;;  %v1942_v33 = vadd.f32 %v6347_v6, %v7658_v48  ;;  %v7661_v6 = vld [vmem:[#allocation30_spill] sm:$0xff] }
 0x228   : > { %v1923_v54 = vadd.f32 %v6305_v32, %v7661_v6  ;;  %v7682_v6 = vld [vmem:[#allocation119_spill] sm:$0xff] }
 0x229   : > { %v2331_v4 = vmax.f32 %v2011_v46, 0.0  ;;  %v2314_v30 = vmax.f32 %v1942_v33, 0.0  ;;  %v7669_v46 = vld [vmem:[#allocation39_spill] sm:$0xff]  ;;  %v7675_v33 = vld [vmem:[#allocation42_spill] sm:$0xff] }
 0x22a   : > { %5146 = vmatpush3.bf16.msra.mxu1 %v2610_v61  ;;  %v1974_v61 = vadd.f32 %v6393_v50, %v7662_v18  ;;  %v2309_v20 = vmax.f32 %v1923_v54, 0.0  ;;  %v2150_v10 = vadd.f32 %v6658_v45, %v7669_v46  ;;  %v7683_v18 = vld [vmem:[#allocation46_spill] sm:$0xff] }
 0x22b   : > { %4665 = vmatprep.subr.bf16.mxu1 %v2424_v35  ;;  %v2422_v55 = vpack.c.bf16 %v2332_v15, %v2331_v4  ;;  %v2413_v23 = vpack.c.bf16 %v2314_v30, %v2313_v0  ;;  %v1910_v35 = vadd.f32 %v6293_v27, %v7664_v52  ;;  %v7670_v15 = vld [vmem:[#allocation38_spill] sm:$0xff]  ;;  %v7673_v4 = vld [vmem:[#allocation43_spill] sm:$0xff]  ;;  %v7685_v52 = vld [vmem:[#allocation48_spill] sm:$0xff] }
 0x22c   : > { %v2411_v57 = vpack.c.bf16 %v2310_v25, %v2309_v20  ;;  %v2322_v32 = vmax.f32 %v1974_v61, 0.0  ;;  %v2142_v45 = vadd.f32 %v7674_v16, %v7673_v4  ;;  %v2366_v48 = vmax.f32 %v2150_v10, 0.0  ;;  %v7680_v30 = vld [vmem:[#allocation87_spill] sm:$0xff]  ;;  %v7684_v61 = vld [vmem:[#allocation81_spill] sm:$0xff]  ;;  %v7691_v46 = vld [vmem:[#allocation50_spill] sm:$0xff] }
 0x22d   : > { %5148 = vmatmul.mubr.msk.bf16.vlgmr.msra.gmra.mxu1 %vm2621_vm1, %v2614_v31  ;;  %v1907_v31 = vadd.f32 %v6279_v37, %v7666_v1  ;;  %v2091_v37 = vadd.f32 %v6570_v14, %v7670_v15  ;;  %v5311_v14 = vld [vmem:[%s7489_s7] ss:$16 sps:$4 sm:$0xff]   ;;  %v2075_v20 = vadd.f32 %v7684_v61, %v7683_v18  ;;  %v7693_v15 = vld [vmem:[#allocation52_spill] sm:$0xff]  ;;  %v7706_v61 = vld [vmem:[#allocation58_spill] sm:$0xff] }
 0x22e   : > { %4666 = vmatpush3.bf16.msra.mxu1 %v6377_v44  ;;  %3279 = vmatprep.mubr.bf16.mxu1 %v5313_v19  ;;  %v2421_v44 = vpack.c.bf16 %v2330_v51, %v2329_v42  ;;  %v7667_v19 = vld [vmem:[#allocation36_spill] sm:$0xff]  ;;  %v7679_v42 = vld [vmem:[#allocation45_spill] sm:$0xff]  ;;  %v2364_v2 = vmax.f32 %v2142_v45, 0.0 }
 0x22f   : > { %4667 = vmatprep.subr.bf16.mxu1 %v2423_v17  ;;  %v7677_v51 = vld [vmem:[#allocation44_spill] sm:$0xff]  ;;  %v7692_v10 = vld [vmem:[#allocation85_spill] sm:$0xff] }
 0x232   : > { %4668 = vmatpush3.bf16.msra.mxu1 %v2415_v22  ;;  %v7676_v22 = vld [vmem:[#allocation93_spill] sm:$0xff] }
 0x233   : > { %4669 = vmatprep.subr.bf16.mxu1 %v2422_v55  ;;  %v2083_v55 = vadd.f32 %v7676_v22, %v7675_v33  ;;  %v7699_v22 = vld [vmem:[#allocation55_spill] sm:$0xff] }
 0x236   : > { %4670 = vmatpush3.bf16.msra.mxu1 %v6351_v8  ;;  %v1971_v8 = vadd.f32 %v6383_v12, %v7663_v26  ;;  %v2306_v12 = vmax.f32 %v1910_v35, 0.0  ;;  %v2349_v26 = vmax.f32 %v2083_v55, 0.0  ;;  %v7686_v35 = vld [vmem:[#allocation115_spill] sm:$0xff]  ;;  %v7700_v55 = vld [vmem:[#allocation100_spill] sm:$0xff] }
 0x237   : > { %4671 = vmatprep.subr.bf16.mxu1 %v2421_v44  ;;  %v2078_v44 = vadd.f32 %v7680_v30, %v7679_v42  ;;  %v7701_v42 = vld [vmem:[#allocation56_spill] sm:$0xff] }
 0x238   : > { %v2321_v50 = vmax.f32 %v1971_v8, 0.0  ;;  %v7702_v30 = vld [vmem:[#allocation96_spill] sm:$0xff] }
 0x23a   : > { %4672 = vmatpush3.bf16.msra.mxu1 %v2413_v23  ;;  %v2417_v3 = vpack.c.bf16 %v2322_v32, %v2321_v50  ;;  %v7681_v23 = vld [vmem:[#allocation47_spill] sm:$0xff]  ;;  %v2348_v32 = vmax.f32 %v2078_v44, 0.0  ;;  %v2107_v44 = vadd.f32 %v7702_v30, %v7701_v42  ;;  %v5364_v42 = vld [vmem:[%s7489_s7 + $0x28] ss:$16 sps:$4 sm:$0xff]   ;;  %v5365_v30 = vld [vmem:[%s7489_s7 + $0x4c] ss:$16 sps:$4 sm:$0xff]  }
 0x23b   : > { %4673 = vmatprep.subr.bf16.mxu1 %v6428_v24  ;;  %v2158_v24 = vadd.f32 %v6652_v60, %v7665_v11  ;;  %v2305_v60 = vmax.f32 %v1907_v31, 0.0  ;;  %v2134_v54 = vadd.f32 %v7682_v6, %v7681_v23  ;;  %v7687_v11 = vld [vmem:[#allocation49_spill] sm:$0xff]  ;;  %v7689_v50 = vld [vmem:[#allocation51_spill] sm:$0xff] }
 0x23c   : > { %v7704_v23 = vld [vmem:[#allocation103_spill] sm:$0xff]  ;;  %v2355_v18 = vmax.f32 %v2107_v44, 0.0 }
 0x23d   : > { %v2368_v27 = vmax.f32 %v2158_v24, 0.0  ;;  %v7688_v24 = vld [vmem:[#allocation90_spill] sm:$0xff] }
 0x23e   : > { %4674 = vmatpush3.bf16.msra.mxu1 %v6327_v34  ;;  %v2155_v34 = vadd.f32 %v6644_v9, %v7667_v19  ;;  %v2147_v9 = vadd.f32 %v6650_v62, %v7671_v56  ;;  %v5314_v62 = vld [vmem:[%s7489_s7 + $0x24] ss:$16 sps:$4 sm:$0xff]   ;;  %v2070_v1 = vadd.f32 %v7688_v24, %v7687_v11  ;;  %v7690_v19 = vld [vmem:[#allocation108_spill] sm:$0xff] }
 0x23f   : > { %4675 = vmatprep.subr.bf16.mxu1 %v6436_v59  ;;  %v7668_v59 = vld [vmem:[#allocation37_spill] sm:$0xff] }
 0x240   : > { %v2094_v58 = vadd.f32 %v6584_v49, %v7668_v59  ;;  %v2367_v39 = vmax.f32 %v2155_v34, 0.0  ;;  %v2086_v49 = vadd.f32 %v6590_v13, %v7672_v5  ;;  %v7678_v13 = vld [vmem:[#allocation112_spill] sm:$0xff]  ;;  %v2365_v36 = vmax.f32 %v2147_v9, 0.0  ;;  %v7695_v5 = vld [vmem:[#allocation53_spill] sm:$0xff] }
 0x241   : > { %v2139_v28 = vadd.f32 %v7678_v13, %v7677_v51  ;;  %v2126_v34 = vadd.f32 %v7690_v19, %v7689_v50  ;;  %v2362_v59 = vmax.f32 %v2134_v54, 0.0  ;;  %v7710_v50 = vld [vmem:[#allocation78_spill] sm:$0xff]  ;;  %v5326_v19 = vld [vmem:[%s7489_s7 + $0xa4] ss:$16 sps:$4 sm:$0xff]  }
 0x242   : > { %4676 = vmatpush3.bf16.msra.mxu1 %v2411_v57  ;;  %v2352_v17 = vmax.f32 %v2094_v58, 0.0  ;;  %v2440_v21 = vpack.c.bf16 %v2368_v27, %v2367_v39  ;;  %v2350_v53 = vmax.f32 %v2086_v49, 0.0  ;;  %v2439_v25 = vpack.c.bf16 %v2366_v48, %v2365_v36  ;;  %v5316_v58 = vld [vmem:[%s7489_s7 + $0x20] ss:$16 sps:$4 sm:$0xff]   ;;  %v7697_v48 = vld [vmem:[#allocation54_spill] sm:$0xff] }
 0x243   : > { %4677 = vmatprep.subr.bf16.mxu1 %v6400_v43  ;;  %v2409_v43 = vpack.c.bf16 %v2306_v12, %v2305_v60  ;;  %v2363_v8 = vmax.f32 %v2139_v28, 0.0  ;;  %v2131_v57 = vadd.f32 %v7686_v35, %v7685_v52  ;;  %v2347_v27 = vmax.f32 %v2075_v20, 0.0  ;;  %v5317_v60 = vld [vmem:[%s7489_s7 + $0x44] ss:$16 sps:$4 sm:$0xff]   ;;  %v5319_v28 = vld [vmem:[%s7489_s7 + $0x40] ss:$16 sps:$4 sm:$0xff]  }
 0x244   : > { %v2431_v31 = vpack.c.bf16 %v2350_v53, %v2349_v26  ;;  %v7696_v49 = vld [vmem:[#allocation111_spill] sm:$0xff] }
 0x245   : > { %v2438_v12 = vpack.c.bf16 %v2364_v2, %v2363_v8  ;;  %v2361_v56 = vmax.f32 %v2131_v57, 0.0  ;;  %v2430_v9 = vpack.c.bf16 %v2348_v32, %v2347_v27  ;;  %v2118_v4 = vadd.f32 %v7696_v49, %v7695_v5  ;;  %v5320_v36 = vld [vmem:[%s7489_s7 + $0x64] ss:$16 sps:$4 sm:$0xff]   ;;  %v5322_v35 = vld [vmem:[%s7489_s7 + $0x60] ss:$16 sps:$4 sm:$0xff]   ;;  %v7708_v57 = vld [vmem:[#allocation86_spill] sm:$0xff] }
 0x246   : > { %4678 = vmatpush3.bf16.msra.mxu1 %v6299_v40  ;;  %v2351_v40 = vmax.f32 %v2091_v37, 0.0  ;;  %v7694_v37 = vld [vmem:[#allocation104_spill] sm:$0xff]  ;;  %v7703_v2 = vld [vmem:[#allocation57_spill] sm:$0xff]  ;;  %v7707_v20 = vld [vmem:[#allocation99_spill] sm:$0xff] }
 0x247   : > { %4679 = vmatprep.subr.bf16.mxu1 %v2417_v3  ;;  %v2067_v3 = vadd.f32 %v7692_v10, %v7691_v46  ;;  %v2123_v39 = vadd.f32 %v7694_v37, %v7693_v15  ;;  %v2437_v16 = vpack.c.bf16 %v2362_v59, %v2361_v56  ;;  %v2358_v13 = vmax.f32 %v2118_v4, 0.0  ;;  %v5323_v32 = vld [vmem:[%s7489_s7 + $0x84] ss:$16 sps:$4 sm:$0xff]   ;;  %v5331_v59 = vld [vmem:[%s7489_s7 + $0xc0] ss:$16 sps:$4 sm:$0xff]   ;;  %v6871_v56 = vpop.permute.xlu0 %3812 }
 0x248   : > { %v2432_v0 = vpack.c.bf16 %v2352_v17, %v2351_v40  ;;  %v2360_v17 = vmax.f32 %v2126_v34, 0.0  ;;  %v2102_v6 = vadd.f32 %v7704_v23, %v7703_v2  ;;  %v2099_v26 = vadd.f32 %v7707_v20, %v7706_v61  ;;  %v5328_v34 = vld [vmem:[%s7489_s7 + $0xa0] ss:$16 sps:$4 sm:$0xff]   ;;  %v5335_v46 = vld [vmem:[%s7489_s7 + $0x104] ss:$16 sps:$4 sm:$0xff]   ;;  %7711 = vst [vmem:[#allocation15_spill] sm:$0xff] %v6871_v56 }
 0x249   : > { %v2345_v45 = vmax.f32 %v2067_v3, 0.0  ;;  %v5334_v27 = vld [vmem:[%s7489_s7 + $0xe0] ss:$16 sps:$4 sm:$0xff]   ;;  %v5338_v3 = vld [vmem:[%s7489_s7 + $0x124] ss:$16 sps:$4 sm:$0xff]  }
 0x24a   : > { %4680 = vmatpush3.bf16.msra.mxu1 %v2409_v43  ;;  %v2346_v43 = vmax.f32 %v2070_v1, 0.0  ;;  %v2354_v52 = vmax.f32 %v2102_v6, 0.0  ;;  %v2353_v11 = vmax.f32 %v2099_v26, 0.0  ;;  %v7709_v1 = vld [vmem:[#allocation75_spill] sm:$0xff]  ;;  %v5370_v6 = vld [vmem:[%s7489_s7 + $0x68] ss:$16 sps:$4 sm:$0xff]  }
 0x24b   : > { %4777 = vmatprep.subr.bf16.mxu1 %v2440_v21  ;;  %v2359_v21 = vmax.f32 %v2123_v39, 0.0  ;;  %v5337_v10 = vld [vmem:[%s7489_s7 + $0x100] ss:$16 sps:$4 sm:$0xff]   ;;  %v5341_v15 = vld [vmem:[%s7489_s7 + $0x144] ss:$16 sps:$4 sm:$0xff]  }
 0x24c   : > { %v2429_v33 = vpack.c.bf16 %v2346_v43, %v2345_v45  ;;  %v2433_v24 = vpack.c.bf16 %v2354_v52, %v2353_v11  ;;  %v5343_v37 = vld [vmem:[%s7489_s7 + $0x140] ss:$16 sps:$4 sm:$0xff]   ;;  %v5344_v39 = vld [vmem:[%s7489_s7 + $0x164] ss:$16 sps:$4 sm:$0xff]   ;;  %v5374_v61 = vld [vmem:[%s7489_s7 + $0xac] ss:$16 sps:$4 sm:$0xff]  }
 0x24d   : > { %3280 = vmatmul.mubr.bf16.vlgmr.msra.gmra.mxu1 %v5311_v14  ;;  %v7698_v14 = vld [vmem:[#allocation107_spill] sm:$0xff]  ;;  %v2436_v51 = vpack.c.bf16 %v2360_v17, %v2359_v21  ;;  %v6879_v17 = vpop.permute.xlu0 %3802 }
 0x24e   : > { %4778 = vmatpush3.bf16.msra.mxu1 %v2432_v0  ;;  %3287 = vmatprep.mubr.bf16.mxu1 %v5314_v62  ;;  %v2115_v40 = vadd.f32 %v7698_v14, %v7697_v48  ;;  %v2110_v62 = vadd.f32 %v7700_v55, %v7699_v22  ;;  %v5347_v43 = vld [vmem:[%s7489_s7 + $0x184] ss:$16 sps:$4 sm:$0xff]   ;;  %7712 = vst [vmem:[#allocation17_spill] sm:$0xff] %v6879_v17  ;;  %v5349_v5 = vld [vmem:[%s7489_s7 + $0x180] ss:$16 sps:$4 sm:$0xff]  }
 0x24f   : > { %4779 = vmatprep.subr.bf16.mxu1 %v2439_v25  ;;  %v7705_v25 = vld [vmem:[#allocation82_spill] sm:$0xff]  ;;  %v5350_v49 = vld [vmem:[%s7489_s7 + $0x1a4] ss:$16 sps:$4 sm:$0xff]   ;;  %v5352_v45 = vld [vmem:[%s7489_s7 + $0x1a0] ss:$16 sps:$4 sm:$0xff]  }
 0x250   : > { %v2357_v0 = vmax.f32 %v2115_v40, 0.0  ;;  %v2356_v53 = vmax.f32 %v2110_v62, 0.0  ;;  %v5353_v21 = vld [vmem:[%s7489_s7 + $0x1c4] ss:$16 sps:$4 sm:$0xff]   ;;  %v5355_v14 = vld [vmem:[%s7489_s7 + $0x1c0] ss:$16 sps:$4 sm:$0xff]  }
 0x251   : > { %v6887_v4 = vpop.permute.xlu0 %3792  ;;  %v5356_v40 = vld [vmem:[%s7489_s7 + $0x1e4] ss:$16 sps:$4 sm:$0xff]   ;;  %v5358_v22 = vld [vmem:[%s7489_s7 + $0x1e0] ss:$16 sps:$4 sm:$0xff]   ;;  %v5361_v55 = vld [vmem:[%s7489_s7 + $0xc] ss:$16 sps:$4 sm:$0xff]  }
 0x252   : > { %4780 = vmatpush3.bf16.msra.mxu1 %v2431_v31  ;;  %v2435_v54 = vpack.c.bf16 %v2358_v13, %v2357_v0  ;;  %v2434_v8 = vpack.c.bf16 %v2356_v53, %v2355_v18  ;;  %v5325_v31 = vld [vmem:[%s7489_s7 + $0x80] ss:$16 sps:$4 sm:$0xff]   ;;  %7713 = vst [vmem:[#allocation16_spill] sm:$0xff] %v6887_v4  ;;  %v5359_v13 = vld [vmem:[%s7489_s7 + $0x8] ss:$16 sps:$4 sm:$0xff]  }
 0x253   : > { %4781 = vmatprep.subr.bf16.mxu1 %v2438_v12  ;;  %v5329_v12 = vld [vmem:[%s7489_s7 + $0xc4] ss:$16 sps:$4 sm:$0xff]   ;;  %v5367_v0 = vld [vmem:[%s7489_s7 + $0x48] ss:$16 sps:$4 sm:$0xff]   ;;  %v5368_v53 = vld [vmem:[%s7489_s7 + $0x6c] ss:$16 sps:$4 sm:$0xff]  }
 0x254   : > { %v5373_v18 = vld [vmem:[%s7489_s7 + $0x88] ss:$16 sps:$4 sm:$0xff]  }
 0x255   : > { %3288 = vmatmul.mubr.bf16.gmra.mxu1 %v5316_v58  ;;  %v5332_v58 = vld [vmem:[%s7489_s7 + $0xe4] ss:$16 sps:$4 sm:$0xff]  }
 0x256   : > { %4782 = vmatpush3.bf16.msra.mxu1 %v2430_v9  ;;  %3295 = vmatprep.mubr.bf16.mxu1 %v5317_v60  ;;  %v5340_v60 = vld [vmem:[%s7489_s7 + $0x120] ss:$16 sps:$4 sm:$0xff]  }
 0x257   : > { %4783 = vmatprep.subr.bf16.mxu1 %v2437_v16  ;;  %v5346_v9 = vld [vmem:[%s7489_s7 + $0x160] ss:$16 sps:$4 sm:$0xff]   ;;  %v6889_v16 = vpop.permute.xlu0 %3782 }
 0x258   : > { %7714 = vst [vmem:[#allocation18_spill] sm:$0xff] %v6889_v16 }
 0x25a   : > { %4784 = vmatpush3.bf16.msra.mxu1 %v2429_v33 }
 0x25b   : > { %4785 = vmatprep.subr.bf16.mxu1 %v2436_v51  ;;  %v6897_v48 = vpop.permute.xlu0 %3772 }
 0x25c   : > { %7715 = vst [vmem:[#allocation19_spill] sm:$0xff] %v6897_v48  ;;  %v7723_v48 = vld [vmem:[#allocation95_spill] sm:$0xff] }
 0x25d   : > { %3296 = vmatmul.mubr.bf16.gmra.mxu1 %v5319_v28  ;;  %v5362_v28 = vld [vmem:[%s7489_s7 + $0x2c] ss:$16 sps:$4 sm:$0xff]  }
 0x25e   : > { %4786 = vmatpush3.bf16.msra.mxu1 %v7705_v25  ;;  %3303 = vmatprep.mubr.bf16.mxu1 %v5320_v36 }
 0x25f   : > { %4787 = vmatprep.subr.bf16.mxu1 %v2435_v54  ;;  %v6905_v33 = vpop.permute.xlu0 %3762  ;;  %v5371_v54 = vld [vmem:[%s7489_s7 + $0x8c] ss:$16 sps:$4 sm:$0xff]  }
 0x260   : > { %7716 = vst [vmem:[#allocation20_spill] sm:$0xff] %v6905_v33 }
 0x262   : > { %4788 = vmatpush3.bf16.msra.mxu1 %v7708_v57 }
 0x263   : > { %4789 = vmatprep.subr.bf16.mxu1 %v2434_v8  ;;  %v6913_v62 = vpop.permute.xlu0 %3752 }
 0x265   : > { %3304 = vmatmul.mubr.bf16.gmra.mxu1 %v5322_v35 }
 0x266   : > { %4790 = vmatpush3.bf16.msra.mxu1 %v7709_v1  ;;  %3311 = vmatprep.mubr.bf16.mxu1 %v5323_v32  ;;  %v5376_v32 = vld [vmem:[%s7489_s7 + $0xa8] ss:$16 sps:$4 sm:$0xff]  }
 0x267   : > { %4791 = vmatprep.subr.bf16.mxu1 %v2433_v24  ;;  %v6915_v51 = vpop.permute.xlu0 %3742  ;;  %v5377_v24 = vld [vmem:[%s7489_s7 + $0xcc] ss:$16 sps:$4 sm:$0xff]  }
 0x26a   : > { %4792 = vmatpush3.bf16.msra.mxu1 %v7710_v50  ;;  %v5380_v50 = vld [vmem:[%s7489_s7 + $0xec] ss:$16 sps:$4 sm:$0xff]  }
 0x26b   : > { %v6923_v36 = vpop.permute.xlu0 %3623 }
 0x26d   : > { %3312 = vmatmul.mubr.bf16.gmra.mxu1 %v5325_v31  ;;  %v5379_v31 = vld [vmem:[%s7489_s7 + $0xc8] ss:$16 sps:$4 sm:$0xff]  }
 0x26e   : > { %3319 = vmatprep.mubr.bf16.mxu1 %v5326_v19 }
 0x26f   : > { %v6931_v44 = vpop.permute.xlu0 %4039 }
 0x270   : > { %7717 = vst [vmem:[#allocation21_spill] sm:$0xff] %v6931_v44  ;;  %v7722_v44 = vld [vmem:[#allocation101_spill] sm:$0xff] }
 0x273   : > { %v6939_v2 = vpop.permute.xlu0 %4049 }
 0x274   : > { %7718 = vst [vmem:[#allocation23_spill] sm:$0xff] %v6939_v2 }
 0x275   : > { %3320 = vmatmul.mubr.bf16.gmra.mxu1 %v5328_v34  ;;  %v5382_v34 = vld [vmem:[%s7489_s7 + $0xe8] ss:$16 sps:$4 sm:$0xff]  }
 0x276   : > { %3327 = vmatprep.mubr.bf16.mxu1 %v5329_v12 }
 0x277   : > { %v6941_v23 = vpop.permute.xlu0 %4059 }
 0x278   : > { %7719 = vst [vmem:[#allocation22_spill] sm:$0xff] %v6941_v23 }
 0x27b   : > { %v6949_v25 = vpop.permute.xlu0 %4069 }
 0x27c   : > { %7720 = vst [vmem:[#allocation24_spill] sm:$0xff] %v6949_v25 }
 0x27d   : > { %3328 = vmatmul.mubr.bf16.gmra.mxu1 %v5331_v59  ;;  %v5383_v59 = vld [vmem:[%s7489_s7 + $0x10c] ss:$16 sps:$4 sm:$0xff]  }
 0x27e   : > { %3335 = vmatprep.mubr.bf16.mxu1 %v5332_v58  ;;  %v5385_v58 = vld [vmem:[%s7489_s7 + $0x108] ss:$16 sps:$4 sm:$0xff]  }
 0x27f   : > { %v2619_v20 = vpop.permute.xlu0 %2618 }
 0x285   : > { %3336 = vmatmul.mubr.bf16.gmra.mxu1 %v5334_v27  ;;  %v5388_v27 = vld [vmem:[%s7489_s7 + $0x12c] ss:$16 sps:$4 sm:$0xff]  }
 0x286   : > { %3343 = vmatprep.mubr.bf16.mxu1 %v5335_v46 }
 0x28d   : > { %3344 = vmatmul.mubr.bf16.gmra.mxu1 %v5337_v10 }
 0x28e   : > { %3351 = vmatprep.mubr.bf16.mxu1 %v5338_v3 }
 0x295   : > { %3352 = vmatmul.mubr.bf16.gmra.mxu1 %v5340_v60 }
 0x296   : > { %3359 = vmatprep.mubr.bf16.mxu1 %v5341_v15 }
 0x29d   : > { %3360 = vmatmul.mubr.bf16.gmra.mxu1 %v5343_v37  ;;  %v5386_v37 = vld [vmem:[%s7489_s7 + $0x128] ss:$16 sps:$4 sm:$0xff]  }
 0x29e   : > { %3367 = vmatprep.mubr.bf16.mxu1 %v5344_v39  ;;  %v5391_v39 = vld [vmem:[%s7489_s7 + $0x14c] ss:$16 sps:$4 sm:$0xff]  }
 0x2a5   : > { %3368 = vmatmul.mubr.bf16.gmra.mxu1 %v5346_v9 }
 0x2a6   : > { %3375 = vmatprep.mubr.bf16.mxu1 %v5347_v43 }
 0x2ad   : > { %3376 = vmatmul.mubr.bf16.gmra.mxu1 %v5349_v5 }
 0x2ae   : > { %3383 = vmatprep.mubr.bf16.mxu1 %v5350_v49 }
 0x2b5   : > { %3384 = vmatmul.mubr.bf16.gmra.mxu1 %v5352_v45 }
 0x2b6   : > { %3391 = vmatprep.mubr.bf16.mxu1 %v5353_v21 }
 0x2bd   : > { %3392 = vmatmul.mubr.bf16.gmra.mxu1 %v5355_v14  ;;  %v5389_v14 = vld [vmem:[%s7489_s7 + $0x148] ss:$16 sps:$4 sm:$0xff]  }
 0x2be   : > { %3399 = vmatprep.mubr.bf16.mxu1 %v5356_v40  ;;  %v5394_v40 = vld [vmem:[%s7489_s7 + $0x16c] ss:$16 sps:$4 sm:$0xff]  }
 0x2c5   : > { %3400 = vmatmul.mubr.bf16.gmra.mxu1 %v5358_v22 }
 0x2c6   : > { %3440 = vmatprep.mubr.bf16.mxu1 %v5361_v55 }
 0x2cd   : > { %3441 = vmatmul.mubr.bf16.vlgmr.msra.gmra.mxu1 %v5359_v13 }
 0x2ce   : > { %3448 = vmatprep.mubr.bf16.mxu1 %v5362_v28 }
 0x2d5   : > { %3449 = vmatmul.mubr.bf16.gmra.mxu1 %v5364_v42 }
 0x2d6   : > { %3456 = vmatprep.mubr.bf16.mxu1 %v5365_v30 }
 0x2dd   : > { %3457 = vmatmul.mubr.bf16.gmra.mxu1 %v5367_v0  ;;  %v5392_v0 = vld [vmem:[%s7489_s7 + $0x168] ss:$16 sps:$4 sm:$0xff]  }
 0x2de   : > { %3464 = vmatprep.mubr.bf16.mxu1 %v5368_v53  ;;  %v5397_v53 = vld [vmem:[%s7489_s7 + $0x18c] ss:$16 sps:$4 sm:$0xff]  }
 0x2e5   : > { %3465 = vmatmul.mubr.bf16.gmra.mxu1 %v5370_v6 }
 0x2e6   : > { %3472 = vmatprep.mubr.bf16.mxu1 %v5371_v54 }
 0x2ed   : > { %v2659_v26 = vpop.f32.mrf.mxu1  ;;  %3473 = vmatmul.mubr.bf16.gmra.mxu1 %v5373_v18 }
 0x2ee   : > { %v2660_v8 = vadd.f32 %v2659_v26, %v2619_v20  ;;  %3480 = vmatprep.mubr.bf16.mxu1 %v5374_v61 }
 0x2ef   : > { %v5149_v52 = vpop.f32.mrf.mxu1 }
 0x2f0   : > { %v2665_v35 = vsub.f32 0.0, %v2660_v8  ;;  %v5395_v8 = vld [vmem:[%s7489_s7 + $0x188] ss:$16 sps:$4 sm:$0xff]   ;;  %v5400_v52 = vld [vmem:[%s7489_s7 + $0x1ac] ss:$16 sps:$4 sm:$0xff]  }
 0x2f1   : > { %v2662_v57 = vpop.f32.mrf.mxu1 }
 0x2f2   : > { %v2666_v11 = vmul.f32 1.442695, %v2665_v35 }
 0x2f3   : > { %v5150_v1 = vpop.f32.mrf.mxu1 }
 0x2f4   : > { %5438 = vpow2.f32 %v2666_v11 }
 0x2f5   : > { %3481 = vmatmul.mubr.bf16.gmra.mxu1 %v5376_v32 }
 0x2f6   : > { %3488 = vmatprep.mubr.bf16.mxu1 %v5377_v24 }
 0x2fd   : > { %3489 = vmatmul.mubr.bf16.gmra.mxu1 %v5379_v31  ;;  %v5398_v31 = vld [vmem:[%s7489_s7 + $0x1a8] ss:$16 sps:$4 sm:$0xff]  }
 0x2fe   : > { %3496 = vmatprep.mubr.bf16.mxu1 %v5380_v50  ;;  %v5403_v50 = vld [vmem:[%s7489_s7 + $0x1cc] ss:$16 sps:$4 sm:$0xff]  }
 0x301   : > { %v5439_v19 = vpop.eup %5438 }
 0x302   : > { %v2668_v12 = vadd.f32 1.0, %v5439_v19 }
 0x304   : > { %5440 = vrcp.f32 %v2668_v12 }
 0x305   : > { %3497 = vmatmul.mubr.bf16.gmra.mxu1 %v5382_v34 }
 0x306   : > { %3504 = vmatprep.mubr.bf16.mxu1 %v5383_v59 }
 0x30d   : > { %v4681_v46 = vpop.f32.mrf.mxu1  ;;  %3505 = vmatmul.mubr.bf16.gmra.mxu1 %v5385_v58 }
 0x30e   : > { %3512 = vmatprep.mubr.bf16.mxu1 %v5388_v27  ;;  %v5401_v27 = vld [vmem:[%s7489_s7 + $0x1c8] ss:$16 sps:$4 sm:$0xff]  }
 0x30f   : > { %v4682_v10 = vpop.f32.mrf.mxu1 }
 0x310   : > { %v6985_v3 = vadd.f32 %v4682_v10, %v4681_v46  ;;  %v5406_v46 = vld [vmem:[%s7489_s7 + $0x1ec] ss:$16 sps:$4 sm:$0xff]  }
 0x311   : > { %v5441_v60 = vpop.eup %5440  ;;  %v4684_v15 = vpop.f32.mrf.mxu1 }
 0x312   : > { %2670 = vst [vmem:[%s622_s18] sm:$0xff] %v5441_v60  ;;  %s5454_s18 = sshll.u32 %s5561_s29, 4  ;;  %s5455_s18 = int_to_ptr.vmem [resolvable:$false] %s5454_s18 }
 0x313   : > { %v4685_v9 = vpop.f32.mrf.mxu1  ;;  %s5456_s22 = scalar_lea.vmem %s5455_s18, 512  ;;  %p5457_p1 = scmp.lt.s32.totalorder %s7395_s24, %s5455_s18 }
 0x314   : > { %v6993_v43 = vadd.f32 %v4685_v9, %v4684_v15  ;;  %v5404_v9 = vld [vmem:[%s7489_s7 + $0x1e8] ss:$16 sps:$4 sm:$0xff]   ;;  %p5458_p2 = scmp.lt.s32.totalorder %s5456_s22, %s5450_s28 }
 0x315   : > { %v4687_v5 = vpop.f32.mrf.mxu1  ;;  %3513 = vmatmul.mubr.bf16.gmra.mxu1 %v5386_v37 }
 0x316   : > { %3520 = vmatprep.mubr.bf16.mxu1 %v5391_v39  ;;  %p5459_p3 = por %p5458_p2, %p5457_p1 }
 0x317   : > { %v4688_v49 = vpop.f32.mrf.mxu1 }
 0x318   : > { %v6995_v45 = vadd.f32 %v4688_v49, %v4687_v5  ;;  %p5460_p5 = pnand %p5459_p3, %p5453_p0 }
 0x319   : > { %v4690_v21 = vpop.f32.mrf.mxu1 }
 0x31b   : > { %v4691_v22 = vpop.f32.mrf.mxu1 }
 0x31c   : > { %v7003_v55 = vadd.f32 %v4691_v22, %v4690_v21 }
 0x31d   : > { %v4693_v13 = vpop.f32.mrf.mxu1  ;;  %3521 = vmatmul.mubr.bf16.gmra.mxu1 %v5389_v14 }
 0x31e   : > { %3528 = vmatprep.mubr.bf16.mxu1 %v5394_v40 }
 0x31f   : > { %v4694_v28 = vpop.f32.mrf.mxu1 }
 0x320   : > { %v7005_v42 = vadd.f32 %v4694_v28, %v4693_v13 }
 0x321   : > { %v4696_v30 = vpop.f32.mrf.mxu1 }
 0x323   : > { %v4697_v6 = vpop.f32.mrf.mxu1 }
 0x324   : > { %v7013_v54 = vadd.f32 %v4697_v6, %v4696_v30 }
 0x325   : > { %v4699_v18 = vpop.f32.mrf.mxu1  ;;  %3529 = vmatmul.mubr.bf16.gmra.mxu1 %v5392_v0 }
 0x326   : > { %3536 = vmatprep.mubr.bf16.mxu1 %v5397_v53 }
 0x327   : > { %v4700_v61 = vpop.f32.mrf.mxu1 }
 0x328   : > { %v7015_v20 = vadd.f32 %v4700_v61, %v4699_v18 }
 0x329   : > { %v4702_v26 = vpop.f32.mrf.mxu1 }
 0x32b   : > { %v4703_v35 = vpop.f32.mrf.mxu1 }
 0x32c   : > { %v7023_v57 = vadd.f32 %v4703_v35, %v4702_v26 }
 0x32d   : > { %v4705_v32 = vpop.f32.mrf.mxu1  ;;  %3537 = vmatmul.mubr.bf16.gmra.mxu1 %v5395_v8 }
 0x32e   : > { %3544 = vmatprep.mubr.bf16.mxu1 %v5400_v52 }
 0x32f   : > { %v4706_v11 = vpop.f32.mrf.mxu1 }
 0x330   : > { %v7025_v24 = vadd.f32 %v4706_v11, %v4705_v32 }
 0x331   : > { %v7027_v1 = vpop.f32.mrf.mxu1 }
 0x333   : > { %v7035_v19 = vpop.f32.mrf.mxu1 }
 0x335   : > { %v4711_v34 = vpop.f32.mrf.mxu1  ;;  %3545 = vmatmul.mubr.bf16.gmra.mxu1 %v5398_v31 }
 0x336   : > { %3552 = vmatprep.mubr.bf16.mxu1 %v5403_v50 }
 0x337   : > { %v4712_v12 = vpop.f32.mrf.mxu1 }
 0x338   : > { %v7037_v59 = vadd.f32 %v4712_v12, %v4711_v34 }
 0x339   : > { %v7039_v58 = vpop.f32.mrf.mxu1 }
 0x33b   : > { %v7047_v10 = vpop.f32.mrf.mxu1 }
 0x33d   : > { %v4717_v60 = vpop.f32.mrf.mxu1  ;;  %3553 = vmatmul.mubr.bf16.gmra.mxu1 %v5401_v27 }
 0x33e   : > { %3560 = vmatprep.mubr.bf16.mxu1 %v5406_v46 }
 0x33f   : > { %v4718_v15 = vpop.f32.mrf.mxu1 }
 0x340   : > { %v7049_v37 = vadd.f32 %v4718_v15, %v4717_v60 }
 0x341   : > { %v4720_v39 = vpop.f32.mrf.mxu1 }
 0x343   : > { %v4721_v5 = vpop.f32.mrf.mxu1 }
 0x344   : > { %v7054_v49 = vadd.f32 %v4721_v5, %v4720_v39 }
 0x345   : > { %v4723_v21 = vpop.f32.mrf.mxu1  ;;  %3561 = vmatmul.mubr.bf16.gmra.mxu1 %v5404_v9 }
 0x347   : > { %v4724_v14 = vpop.f32.mrf.mxu1 }
 0x348   : > { %v7056_v40 = vadd.f32 %v4724_v14, %v4723_v21 }
 0x349   : > { %v4726_v22 = vpop.f32.mrf.mxu1 }
 0x34b   : > { %v4727_v13 = vpop.f32.mrf.mxu1 }
 0x34c   : > { %v7058_v28 = vadd.f32 %v4727_v13, %v4726_v22 }
 0x34d   : > { %v4729_v30 = vpop.f32.mrf.mxu1 }
 0x34f   : > { %v4730_v0 = vpop.f32.mrf.mxu1 }
 0x350   : > { %v7060_v53 = vadd.f32 %v4730_v0, %v4729_v30 }
 0x351   : > { %v4732_v6 = vpop.f32.mrf.mxu1 }
 0x353   : > { %v4733_v18 = vpop.f32.mrf.mxu1 }
 0x354   : > { %v7062_v61 = vadd.f32 %v4733_v18, %v4732_v6 }
 0x355   : > { %v4735_v26 = vpop.f32.mrf.mxu1 }
 0x357   : > { %v4736_v8 = vpop.f32.mrf.mxu1 }
 0x358   : > { %v7064_v52 = vadd.f32 %v4736_v8, %v4735_v26 }
 0x359   : > { %v4738_v35 = vpop.f32.mrf.mxu1 }
 0x35b   : > { %v4739_v32 = vpop.f32.mrf.mxu1 }
 0x35c   : > { %v7066_v11 = vadd.f32 %v4739_v32, %v4738_v35 }
 0x35d   : > { %v4741_v31 = vpop.f32.mrf.mxu1 }
 0x35f   : > { %v4742_v50 = vpop.f32.mrf.mxu1 }
 0x360   : > { %v7068_v34 = vadd.f32 %v4742_v50, %v4741_v31 }
 0x361   : > { %v4744_v12 = vpop.f32.mrf.mxu1 }
 0x363   : > { %v4745_v27 = vpop.f32.mrf.mxu1 }
 0x364   : > { %v7070_v46 = vadd.f32 %v4745_v27, %v4744_v12 }
 0x365   : > { %v4747_v60 = vpop.f32.mrf.mxu1 }
 0x367   : > { %v4748_v15 = vpop.f32.mrf.mxu1 }
 0x368   : > { %v7072_v39 = vadd.f32 %v4748_v15, %v4747_v60 }
 0x369   : > { %v4750_v9 = vpop.f32.mrf.mxu1 }
 0x36b   : > { %v4751_v5 = vpop.f32.mrf.mxu1 }
 0x36c   : > { %v7074_v21 = vadd.f32 %v4751_v5, %v4750_v9 }
 0x36d   : > { %v4753_v14 = vpop.f32.mrf.mxu1 }
 0x36f   : > { %v4754_v22 = vpop.f32.mrf.mxu1 }
 0x370   : > { %v7076_v13 = vadd.f32 %v4754_v22, %v4753_v14 }
 0x371   : > { %v4756_v30 = vpop.f32.mrf.mxu1 }
 0x373   : > { %v4757_v0 = vpop.f32.mrf.mxu1 }
 0x374   : > { %v7078_v6 = vadd.f32 %v4757_v0, %v4756_v30 }
 0x375   : > { %v4759_v18 = vpop.f32.mrf.mxu1 }
 0x377   : > { %v4760_v26 = vpop.f32.mrf.mxu1 }
 0x378   : > { %v7080_v8 = vadd.f32 %v4760_v26, %v4759_v18 }
 0x379   : > { %v4762_v35 = vpop.f32.mrf.mxu1 }
 0x37b   : > { %v4763_v32 = vpop.f32.mrf.mxu1 }
 0x37c   : > { %v7082_v31 = vadd.f32 %v4763_v32, %v4762_v35  ;;  %v7721_v35 = vld [vmem:[#allocation102_spill] sm:$0xff] }
 0x37d   : > { %v4765_v50 = vpop.f32.mrf.mxu1  ;;  %v3282_v32 = vadd.f32 %v6985_v3, %v7721_v35 }
 0x37f   : > { %v4766_v12 = vpop.f32.mrf.mxu1 }
 0x380   : > { %v7084_v27 = vadd.f32 %v4766_v12, %v4765_v50 }
 0x381   : > { %v4768_v60 = vpop.f32.mrf.mxu1 }
 0x383   : > { %v4769_v15 = vpop.f32.mrf.mxu1 }
 0x384   : > { %v7086_v9 = vadd.f32 %v4769_v15, %v4768_v60  ;;  %v3285_v60 = vadd.f32 %v6993_v43, %v7722_v44 }
 0x385   : > { %v4771_v5 = vpop.f32.mrf.mxu1 }
 0x387   : > { %v4772_v14 = vpop.f32.mrf.mxu1 }
 0x388   : > { %v7088_v22 = vadd.f32 %v4772_v14, %v4771_v5 }
 0x389   : > { %v4774_v30 = vpop.f32.mrf.mxu1 }
 0x38b   : > { %v4775_v0 = vpop.f32.mrf.mxu1 }
 0x38c   : > { %v7090_v18 = vadd.f32 %v4775_v0, %v4774_v30  ;;  %v3290_v30 = vadd.f32 %v6995_v45, %v7723_v48 }
 0x38d   : > { %v4793_v26 = vpop.f32.mrf.mxu1 }
 0x38f   : > { %v4794_v25 = vpop.f32.mrf.mxu1 }
 0x390   : > { %v4795_v23 = vadd.f32 %v4794_v25, %v4793_v26 }
 0x391   : > { %v4796_v50 = vpop.f32.mrf.mxu1 }
 0x392   : > { %v3443_v12 = vadd.f32 %v4795_v23, %v3282_v32  ;;  %v7724_v23 = vld [vmem:[#allocation94_spill] sm:$0xff]  ;;  %v7725_v32 = vld [vmem:[#allocation89_spill] sm:$0xff] }
 0x393   : > { %v4797_v2 = vpop.f32.mrf.mxu1  ;;  %v3293_v26 = vadd.f32 %v7003_v55, %v7724_v23 }
 0x394   : > { %v4798_v15 = vadd.f32 %v4797_v2, %v4796_v50  ;;  %v3569_v0 = vmax.f32 %v3443_v12, 0.0  ;;  %v3298_v50 = vadd.f32 %v7005_v42, %v7725_v32 }
 0x395   : > { %v4799_v33 = vpop.f32.mrf.mxu1 }
 0x396   : > { %v3446_v5 = vadd.f32 %v4798_v15, %v3285_v60 }
 0x397   : > { %v4800_v14 = vpop.f32.mrf.mxu1 }
 0x398   : > { %v3570_v16 = vmax.f32 %v3446_v5, 0.0  ;;  %v4801_v4 = vadd.f32 %v4800_v14, %v4799_v33 }
 0x399   : > { %v4802_v17 = vpop.f32.mrf.mxu1 }
 0x39a   : > { %v7098_v56 = vpack.c.bf16 %v3570_v16, %v3569_v0  ;;  %v3451_v25 = vadd.f32 %v4801_v4, %v3290_v30  ;;  %v7726_v4 = vld [vmem:[#allocation88_spill] sm:$0xff] }
 0x39b   : > { %v4803_v3 = vpop.f32.mrf.mxu1  ;;  %v3301_v5 = vadd.f32 %v7013_v54, %v7726_v4  ;;  %v7727_v0 = vld [vmem:[#allocation80_spill] sm:$0xff] }
 0x39c   : > { %v4804_v35 = vadd.f32 %v4803_v3, %v4802_v17  ;;  %v3571_v60 = vmax.f32 %v3451_v25, 0.0  ;;  %v3306_v3 = vadd.f32 %v7015_v20, %v7727_v0  ;;  %v4710_v20 = vadd.f32 %v7035_v19, %v7027_v1 }
 0x39d   : > { %v4805_v44 = vpop.f32.mrf.mxu1 }
 0x39e   : > { %v3454_v2 = vadd.f32 %v4804_v35, %v3293_v26 }
 0x39f   : > { %v4806_v43 = vpop.f32.mrf.mxu1 }
 0x3a0   : > { %v3572_v48 = vmax.f32 %v3454_v2, 0.0  ;;  %v4807_v45 = vadd.f32 %v4806_v43, %v4805_v44  ;;  %v7728_v43 = vld [vmem:[#allocation79_spill] sm:$0xff] }
 0x3a1   : > { %v4808_v12 = vpop.f32.mrf.mxu1  ;;  %v3309_v32 = vadd.f32 %v7023_v57, %v7728_v43 }
 0x3a2   : > { %v7104_v33 = vpack.c.bf16 %v3572_v48, %v3571_v60  ;;  %v3459_v16 = vadd.f32 %v4807_v45, %v3298_v50  ;;  %v7729_v48 = vld [vmem:[#allocation74_spill] sm:$0xff] }
 0x3a3   : > { %v4809_v15 = vpop.f32.mrf.mxu1  ;;  %v3314_v45 = vadd.f32 %v7025_v24, %v7729_v48 }
 0x3a4   : > { %v4810_v14 = vadd.f32 %v4809_v15, %v4808_v12  ;;  %v3573_v23 = vmax.f32 %v3459_v16, 0.0 }
 0x3a5   : > { %v4811_v55 = vpop.f32.mrf.mxu1 }
 0x3a6   : > { %v3462_v17 = vadd.f32 %v4810_v14, %v3301_v5  ;;  %v5409_v14 = vld [vmem:[%s7491_s9 + $0x4] ss:$8 sps:$4 sm:$0xff]  }
 0x3a7   : > { %v4812_v30 = vpop.f32.mrf.mxu1  ;;  %3673 = vmatprep.mubr.bf16.mxu0 %v5409_v14 }
 0x3a8   : > { %v3574_v42 = vmax.f32 %v3462_v17, 0.0  ;;  %v4813_v25 = vadd.f32 %v4812_v30, %v4811_v55  ;;  %v7730_v30 = vld [vmem:[#allocation73_spill] sm:$0xff] }
 0x3a9   : > { %v4814_v26 = vpop.f32.mrf.mxu1  ;;  %v3317_v0 = vadd.f32 %v4710_v20, %v7730_v30  ;;  %v7734_v30 = vld [vmem:[#allocation65_spill] sm:$0xff] }
 0x3aa   : > { %v7110_v35 = vpack.c.bf16 %v3574_v42, %v3573_v23  ;;  %v3467_v44 = vadd.f32 %v4813_v25, %v3306_v3  ;;  %v7731_v42 = vld [vmem:[#allocation70_spill] sm:$0xff]  ;;  %v4716_v25 = vadd.f32 %v7047_v10, %v7039_v58 }
 0x3ab   : > { %v4815_v2 = vpop.f32.mrf.mxu1  ;;  %v3322_v1 = vadd.f32 %v7037_v59, %v7731_v42 }
 0x3ac   : > { %v4816_v50 = vadd.f32 %v4815_v2, %v4814_v26  ;;  %v3575_v16 = vmax.f32 %v3467_v44, 0.0 }
 0x3ad   : > { %v4817_v54 = vpop.f32.mrf.mxu1 }
 0x3ae   : > { %v3470_v60 = vadd.f32 %v4816_v50, %v3309_v32 }
 0x3af   : > { %v4818_v12 = vpop.f32.mrf.mxu1 }
 0x3b0   : > { %v3576_v15 = vmax.f32 %v3470_v60, 0.0  ;;  %v4819_v4 = vadd.f32 %v4818_v12, %v4817_v54  ;;  %v7732_v60 = vld [vmem:[#allocation69_spill] sm:$0xff] }
 0x3b1   : > { %v4820_v5 = vpop.f32.mrf.mxu1  ;;  %v3325_v48 = vadd.f32 %v4716_v25, %v7732_v60 }
 0x3b2   : > { %v7121_v55 = vpack.c.bf16 %v3576_v15, %v3575_v16  ;;  %v3475_v57 = vadd.f32 %v4819_v4, %v3314_v45  ;;  %v7733_v15 = vld [vmem:[#allocation66_spill] sm:$0xff] }
 0x3b3   : > { %v4821_v17 = vpop.f32.mrf.mxu1  ;;  %v3330_v59 = vadd.f32 %v7049_v37, %v7733_v15 }
 0x3b4   : > { %v4822_v24 = vadd.f32 %v4821_v17, %v4820_v5  ;;  %v3577_v26 = vmax.f32 %v3475_v57, 0.0 }
 0x3b5   : > { %v4823_v3 = vpop.f32.mrf.mxu1 }
 0x3b6   : > { %v3478_v23 = vadd.f32 %v4822_v24, %v3317_v0  ;;  %v3333_v0 = vadd.f32 %v7054_v49, %v7734_v30  ;;  %v7143_v49 = vpop.f32.mrf.mxu0 }
 0x3b7   : > { %v4824_v19 = vpop.f32.mrf.mxu1 }
 0x3b8   : > { %v3578_v44 = vmax.f32 %v3478_v23, 0.0  ;;  %v4825_v2 = vadd.f32 %v4824_v19, %v4823_v3 }
 0x3b9   : > { %v4826_v43 = vpop.f32.mrf.mxu1 }
 0x3ba   : > { %v7128_v32 = vpack.c.bf16 %v3578_v44, %v3577_v26  ;;  %v3483_v50 = vadd.f32 %v4825_v2, %v3322_v1  ;;  %v7735_v1 = vld [vmem:[#allocation62_spill] sm:$0xff] }
 0x3bb   : > { %v4827_v54 = vpop.f32.mrf.mxu1  ;;  %v3338_v19 = vadd.f32 %v7056_v40, %v7735_v1 }
 0x3bc   : > { %v4828_v45 = vadd.f32 %v4827_v54, %v4826_v43  ;;  %v3579_v4 = vmax.f32 %v3483_v50, 0.0  ;;  %v7736_v54 = vld [vmem:[#allocation61_spill] sm:$0xff] }
 0x3bd   : > { %v4829_v12 = vpop.f32.mrf.mxu1  ;;  %v3341_v60 = vadd.f32 %v7058_v28, %v7736_v54  ;;  %v7738_v28 = vld [vmem:[#allocation97_spill] sm:$0xff] }
 0x3be   : > { %v3486_v20 = vadd.f32 %v4828_v45, %v3325_v48  ;;  %v3349_v30 = vadd.f32 %v7062_v61, %v7738_v28  ;;  %v7740_v61 = vld [vmem:[#allocation91_spill] sm:$0xff] }
 0x3bf   : > { %v4830_v16 = vpop.f32.mrf.mxu1 }
 0x3c0   : > { %v3580_v5 = vmax.f32 %v3486_v20, 0.0  ;;  %v4831_v58 = vadd.f32 %v4830_v16, %v4829_v12  ;;  %v7737_v16 = vld [vmem:[#allocation98_spill] sm:$0xff] }
 0x3c1   : > { %v4832_v10 = vpop.f32.mrf.mxu1  ;;  %v3346_v40 = vadd.f32 %v7060_v53, %v7737_v16  ;;  %v7739_v53 = vld [vmem:[#allocation92_spill] sm:$0xff] }
 0x3c2   : > { %v7133_v14 = vpack.c.bf16 %v3580_v5, %v3579_v4  ;;  %v3491_v57 = vadd.f32 %v4831_v58, %v3330_v59  ;;  %v7147_v5 = vpop.f32.mrf.mxu0  ;;  %v3354_v1 = vadd.f32 %v7064_v52, %v7739_v53  ;;  %v7741_v52 = vld [vmem:[#allocation84_spill] sm:$0xff] }
 0x3c3   : > { %v4833_v17 = vpop.f32.mrf.mxu1 }
 0x3c4   : > { %v4834_v24 = vadd.f32 %v4833_v17, %v4832_v10  ;;  %v3581_v25 = vmax.f32 %v3491_v57, 0.0 }
 0x3c5   : > { %v4835_v3 = vpop.f32.mrf.mxu1 }
 0x3c6   : > { %v3494_v23 = vadd.f32 %v4834_v24, %v3333_v0  ;;  %v7153_v24 = vpop.f32.mrf.mxu0 }
 0x3c7   : > { %v4836_v42 = vpop.f32.mrf.mxu1 }
 0x3c8   : > { %v3582_v37 = vmax.f32 %v3494_v23, 0.0  ;;  %v4837_v26 = vadd.f32 %v4836_v42, %v4835_v3 }
 0x3c9   : > { %v4838_v44 = vpop.f32.mrf.mxu1 }
 0x3ca   : > { %v7139_v2 = vpack.c.bf16 %v3582_v37, %v3581_v25  ;;  %v3499_v43 = vadd.f32 %v4837_v26, %v3338_v19  ;;  %v7157_v26 = vpop.f32.mrf.mxu0 }
 0x3cb   : > { %v4839_v50 = vpop.f32.mrf.mxu1 }
 0x3cc   : > { %v4840_v48 = vadd.f32 %v4839_v50, %v4838_v44  ;;  %v3583_v15 = vmax.f32 %v3499_v43, 0.0 }
 0x3cd   : > { %v4841_v45 = vpop.f32.mrf.mxu1 }
 0x3ce   : > { %v3502_v12 = vadd.f32 %v4840_v48, %v3341_v60  ;;  %v3357_v60 = vadd.f32 %v7066_v11, %v7740_v61  ;;  %v7742_v11 = vld [vmem:[#allocation83_spill] sm:$0xff] }
 0x3cf   : > { %v4842_v20 = vpop.f32.mrf.mxu1 }
 0x3d0   : > { %v3584_v59 = vmax.f32 %v3502_v12, 0.0  ;;  %v4843_v4 = vadd.f32 %v4842_v20, %v4841_v45  ;;  %v7163_v45 = vpop.f32.mrf.mxu0 }
 0x3d1   : > { %v4844_v58 = vpop.f32.mrf.mxu1 }
 0x3d2   : > { %v7149_v10 = vpack.c.bf16 %v3584_v59, %v3583_v15  ;;  %v3507_v57 = vadd.f32 %v4843_v4, %v3346_v40  ;;  %v3362_v40 = vadd.f32 %v7068_v34, %v7741_v52 }
 0x3d3   : > { %v4845_v17 = vpop.f32.mrf.mxu1 }
 0x3d4   : > { %v4846_v0 = vadd.f32 %v4845_v17, %v4844_v58  ;;  %v3585_v19 = vmax.f32 %v3507_v57, 0.0  ;;  %v7167_v58 = vpop.f32.mrf.mxu0 }
 0x3d5   : > { %v4847_v3 = vpop.f32.mrf.mxu1 }
 0x3d6   : > { %v3510_v23 = vadd.f32 %v4846_v0, %v3349_v30  ;;  %v3365_v0 = vadd.f32 %v7070_v46, %v7742_v11 }
 0x3d7   : > { %v4848_v42 = vpop.f32.mrf.mxu1 }
 0x3d8   : > { %v3586_v25 = vmax.f32 %v3510_v23, 0.0  ;;  %v4849_v37 = vadd.f32 %v4848_v42, %v4847_v3  ;;  %v7173_v23 = vpop.f32.mrf.mxu0 }
 0x3d9   : > { %v4850_v44 = vpop.f32.mrf.mxu1 }
 0x3da   : > { %v3515_v43 = vadd.f32 %v4849_v37, %v3354_v1  ;;  %v7159_v50 = vpack.c.bf16 %v3586_v25, %v3585_v19  ;;  %v7175_v37 = vpop.f32.mrf.mxu0 }
 0x3db   : > { %v4851_v54 = vpop.f32.mrf.mxu1 }
 0x3dc   : > { %v4852_v48 = vadd.f32 %v4851_v54, %v4850_v44  ;;  %v3587_v15 = vmax.f32 %v3515_v43, 0.0  ;;  %v7743_v43 = vld [vmem:[#allocation77_spill] sm:$0xff] }
 0x3dd   : > { %v4853_v12 = vpop.f32.mrf.mxu1  ;;  %v3370_v54 = vadd.f32 %v7072_v39, %v7743_v43  ;;  %v7745_v39 = vld [vmem:[#allocation72_spill] sm:$0xff] }
 0x3de   : > { %v3518_v20 = vadd.f32 %v4852_v48, %v3357_v60  ;;  %v7744_v48 = vld [vmem:[#allocation76_spill] sm:$0xff]  ;;  %v3378_v11 = vadd.f32 %v7076_v13, %v7745_v39 }
 0x3df   : > { %v4854_v16 = vpop.f32.mrf.mxu1  ;;  %v3373_v46 = vadd.f32 %v7074_v21, %v7744_v48  ;;  %v7746_v21 = vld [vmem:[#allocation71_spill] sm:$0xff]  ;;  %v7747_v13 = vld [vmem:[#allocation68_spill] sm:$0xff] }
 0x3e0   : > { %v3588_v59 = vmax.f32 %v3518_v20, 0.0  ;;  %v4855_v4 = vadd.f32 %v4854_v16, %v4853_v12  ;;  %v7183_v16 = vpop.f32.mrf.mxu0 }
 0x3e1   : > { %v4856_v57 = vpop.f32.mrf.mxu1 }
 0x3e2   : > { %v3523_v17 = vadd.f32 %v4855_v4, %v3362_v40  ;;  %v7169_v28 = vpack.c.bf16 %v3588_v59, %v3587_v15 }
 0x3e3   : > { %v4857_v30 = vpop.f32.mrf.mxu1 }
 0x3e4   : > { %v4858_v3 = vadd.f32 %v4857_v30, %v4856_v57  ;;  %v3589_v34 = vmax.f32 %v3523_v17, 0.0  ;;  %v7185_v17 = vpop.f32.mrf.mxu0 }
 0x3e5   : > { %v4859_v42 = vpop.f32.mrf.mxu1 }
 0x3e6   : > { %v3526_v53 = vadd.f32 %v4858_v3, %v3365_v0 }
 0x3e7   : > { %v4860_v1 = vpop.f32.mrf.mxu1 }
 0x3e8   : > { %v3590_v19 = vmax.f32 %v3526_v53, 0.0  ;;  %v4861_v25 = vadd.f32 %v4860_v1, %v4859_v42  ;;  %v3381_v42 = vadd.f32 %v7078_v6, %v7746_v21 }
 0x3e9   : > { %v4862_v44 = vpop.f32.mrf.mxu1 }
 0x3ea   : > { %v7179_v61 = vpack.c.bf16 %v3590_v19, %v3589_v34  ;;  %v3531_v12 = vadd.f32 %v4861_v25, %v3370_v54  ;;  %v7193_v34 = vpop.f32.mrf.mxu0 }
 0x3eb   : > { %v4863_v60 = vpop.f32.mrf.mxu1 }
 0x3ec   : > { %v4864_v20 = vadd.f32 %v4863_v60, %v4862_v44  ;;  %v3591_v59 = vmax.f32 %v3531_v12, 0.0  ;;  %v7195_v48 = vpop.f32.mrf.mxu0  ;;  %v3386_v12 = vadd.f32 %v7080_v8, %v7747_v13 }
 0x3ed   : > { %v4865_v52 = vpop.f32.mrf.mxu1 }
 0x3ee   : > { %v3534_v40 = vadd.f32 %v4864_v20, %v3373_v46 }
 0x3ef   : > { %v4866_v15 = vpop.f32.mrf.mxu1 }
 0x3f0   : > { %v3592_v4 = vmax.f32 %v3534_v40, 0.0  ;;  %v4867_v57 = vadd.f32 %v4866_v15, %v4865_v52  ;;  %v7748_v40 = vld [vmem:[#allocation67_spill] sm:$0xff] }
 0x3f1   : > { %v4868_v30 = vpop.f32.mrf.mxu1  ;;  %v3389_v6 = vadd.f32 %v7082_v31, %v7748_v40 }
 0x3f2   : > { %v7189_v0 = vpack.c.bf16 %v3592_v4, %v3591_v59  ;;  %v3539_v53 = vadd.f32 %v4867_v57, %v3378_v11  ;;  %v7201_v4 = vpop.f32.mrf.mxu0 }
 0x3f3   : > { %v4869_v3 = vpop.f32.mrf.mxu1 }
 0x3f4   : > { %v4870_v1 = vadd.f32 %v4869_v3, %v4868_v30  ;;  %v3593_v43 = vmax.f32 %v3539_v53, 0.0 }
 0x3f5   : > { %v4871_v19 = vpop.f32.mrf.mxu1 }
 0x3f6   : > { %v3542_v25 = vadd.f32 %v4870_v1, %v3381_v42  ;;  %v7203_v42 = vpop.f32.mrf.mxu0  ;;  %v7749_v1 = vld [vmem:[#allocation64_spill] sm:$0xff] }
 0x3f7   : > { %v4872_v44 = vpop.f32.mrf.mxu1  ;;  %v3394_v8 = vadd.f32 %v7084_v27, %v7749_v1 }
 0x3f8   : > { %v3594_v54 = vmax.f32 %v3542_v25, 0.0  ;;  %v4873_v60 = vadd.f32 %v4872_v44, %v4871_v19  ;;  %v7750_v44 = vld [vmem:[#allocation63_spill] sm:$0xff] }
 0x3f9   : > { %v4874_v46 = vpop.f32.mrf.mxu1  ;;  %v3397_v31 = vadd.f32 %v7086_v9, %v7750_v44 }
 0x3fa   : > { %v3613_v20 = vpack.c.bf16 %v3594_v54, %v3593_v43  ;;  %v3547_v15 = vadd.f32 %v4873_v60, %v3386_v12  ;;  %v7209_v60 = vpop.f32.mrf.mxu0 }
 0x3fb   : > { %v4875_v52 = vpop.f32.mrf.mxu1 }
 0x3fc   : > { %v4876_v59 = vadd.f32 %v4875_v52, %v4874_v46  ;;  %v3595_v11 = vmax.f32 %v3547_v15, 0.0  ;;  %v7211_v15 = vpop.f32.mrf.mxu0 }
 0x3fd   : > { %v4877_v57 = vpop.f32.mrf.mxu1 }
 0x3fe   : > { %v3550_v30 = vadd.f32 %v4876_v59, %v3389_v6 }
 0x3ff   : > { %v4878_v39 = vpop.f32.mrf.mxu1 }
 0x400   : > { %v3596_v3 = vmax.f32 %v3550_v30, 0.0  ;;  %v4879_v21 = vadd.f32 %v4878_v39, %v4877_v57  ;;  %v7751_v57 = vld [vmem:[#allocation60_spill] sm:$0xff] }
 0x401   : > { %v4880_v53 = vpop.f32.mrf.mxu1  ;;  %v3402_v27 = vadd.f32 %v7088_v22, %v7751_v57  ;;  %v7759_v57 = vld [vmem:[#allocation117_spill] sm:$0xff] }
 0x402   : > { %v3614_v19 = vpack.c.bf16 %v3596_v3, %v3595_v11  ;;  %v3555_v43 = vadd.f32 %v4879_v21, %v3394_v8  ;;  %v7752_v11 = vld [vmem:[#allocation59_spill] sm:$0xff] }
 0x403   : > { %v4881_v25 = vpop.f32.mrf.mxu1  ;;  %v3405_v9 = vadd.f32 %v7090_v18, %v7752_v11  ;;  %v5407_v11 = vld [vmem:[%s7491_s9] ss:$8 sps:$4 sm:$0xff]  }
 0x404   : > { %v4882_v54 = vadd.f32 %v4881_v25, %v4880_v53  ;;  %v3597_v52 = vmax.f32 %v3555_v43, 0.0  ;;  %v5109_v53 = vpop.f32.mrf.mxu0 }
 0x405   : > { %v4883_v46 = vpop.f32.mrf.mxu1 }
 0x406   : > { %v3558_v13 = vadd.f32 %v4882_v54, %v3397_v31  ;;  %v2258_v44 = vpop.f32.mrf.mxu0 }
 0x407   : > { %v4884_v12 = vpop.f32.mrf.mxu1 }
 0x408   : > { %v3598_v40 = vmax.f32 %v3558_v13, 0.0  ;;  %v4885_v6 = vadd.f32 %v4884_v12, %v4883_v46  ;;  %v5110_v43 = vpop.f32.mrf.mxu0 }
 0x409   : > { %v4886_v59 = vpop.f32.mrf.mxu1 }
 0x40a   : > { %v3615_v30 = vpack.c.bf16 %v3598_v40, %v3597_v52  ;;  %v3563_v3 = vadd.f32 %v4885_v6, %v3402_v27  ;;  %v2261_v54 = vpop.f32.mrf.mxu0  ;;  %v7756_v52 = vld [vmem:[#allocation113_spill] sm:$0xff]  ;;  %v7757_v40 = vld [vmem:[#allocation110_spill] sm:$0xff]  ;;  %v7760_v27 = vld [vmem:[#allocation120_spill] sm:$0xff] }
 0x40b   : > { %v4887_v39 = vpop.f32.mrf.mxu1  ;;  %v7758_v6 = vld [vmem:[#allocation114_spill] sm:$0xff] }
 0x40c   : > { %v4888_v21 = vadd.f32 %v4887_v39, %v4886_v59  ;;  %v3599_v8 = vmax.f32 %v3563_v3, 0.0  ;;  %v5113_v22 = vpop.f32.mrf.mxu0  ;;  %v7762_v3 = vld [vmem:[#allocation121_spill] sm:$0xff] }
 0x40e   : > { %v3566_v1 = vadd.f32 %v4888_v21, %v3405_v9  ;;  %v2274_v18 = vpop.f32.mrf.mxu0  ;;  %v7761_v9 = vld [vmem:[#allocation118_spill] sm:$0xff] }
 0x40f   : > { %v2275_v59 = vadd.f32 %v2274_v18, %v7758_v6 }
 0x410   : > { %v3600_v25 = vmax.f32 %v3566_v1, 0.0  ;;  %v5114_v46 = vpop.f32.mrf.mxu0  ;;  %v7763_v1 = vld [vmem:[#allocation122_spill] sm:$0xff] }
 0x411   : > { %v2397_v21 = vmax.f32 %v2275_v59, 0.0 }
 0x412   : > { %v3616_v31 = vpack.c.bf16 %v3600_v25, %v3599_v8  ;;  %v2277_v12 = vpop.f32.mrf.mxu0  ;;  %v2206_v8 = vadd.f32 %v7153_v24, %v7763_v1  ;;  %v5419_v1 = vld [vmem:[%s7493_s11 + $0x30] ss:$8 sps:$4 sm:$0xff]  }
 0x414   : > { %4889 = vmatprep.subr.bf16.mxu0 %v3616_v31 }
 0x415   : > { %4890 = vmatpush3.bf16.msra.mxu0 %v7149_v10  ;;  %v7753_v10 = vld [vmem:[#allocation105_spill] sm:$0xff] }
 0x416   : > { %4891 = vmatprep.subr.bf16.mxu0 %v3615_v30  ;;  %v2286_v13 = vadd.f32 %v5114_v46, %v7753_v10  ;;  %v2270_v30 = vadd.f32 %v5110_v43, %v7760_v27  ;;  %v2243_v27 = vadd.f32 %v7203_v42, %v6675_v29  ;;  %v2227_v42 = vadd.f32 %v7185_v17, %v6687_v7  ;;  %v5415_v7 = vld [vmem:[%s7493_s11 + $0x14] ss:$8 sps:$4 sm:$0xff]   ;;  %v5413_v17 = vld [vmem:[%s7493_s11 + $0x10] ss:$8 sps:$4 sm:$0xff]  }
 0x418   : > { %v2396_v43 = vmax.f32 %v2270_v30, 0.0 }
 0x419   : > { %4892 = vmatpush3.bf16.msra.mxu0 %v7139_v2  ;;  %v7754_v2 = vld [vmem:[#allocation106_spill] sm:$0xff] }
 0x41a   : > { %4893 = vmatprep.subr.bf16.mxu0 %v3614_v19  ;;  %v2283_v19 = vadd.f32 %v5113_v22, %v7754_v2  ;;  %v7764_v22 = vld [vmem:[#allocation124_spill] sm:$0xff]  ;;  %v2380_v2 = vmax.f32 %v2206_v8, 0.0 }
 0x41b   : > { %v2262_v18 = vadd.f32 %v2261_v54, %v7764_v22  ;;  %v5424_v8 = vld [vmem:[%s7493_s11 + $0x44] ss:$8 sps:$4 sm:$0xff]  }
 0x41c   : > { %v5430_v22 = vld [vmem:[%s7493_s11 + $0x64] ss:$8 sps:$4 sm:$0xff]  }
 0x41d   : > { %4894 = vmatpush3.bf16.msra.mxu0 %v7133_v14  ;;  %v7755_v14 = vld [vmem:[#allocation109_spill] sm:$0xff] }
 0x41e   : > { %4895 = vmatprep.subr.bf16.mxu0 %v3613_v20  ;;  %v2222_v20 = vadd.f32 %v7173_v23, %v7755_v14 }
 0x421   : > { %4896 = vmatpush3.bf16.msra.mxu0 %v7128_v32  ;;  %v2400_v32 = vmax.f32 %v2286_v13, 0.0 }
 0x422   : > { %4897 = vmatprep.subr.bf16.mxu0 %v7189_v0  ;;  %v2278_v0 = vadd.f32 %v2277_v12, %v7756_v52  ;;  %v2394_v52 = vmax.f32 %v2262_v18, 0.0  ;;  %v5428_v18 = vld [vmem:[%s7493_s11 + $0x60] ss:$8 sps:$4 sm:$0xff]  }
 0x424   : > { %v2398_v39 = vmax.f32 %v2278_v0, 0.0 }
 0x425   : > { %4898 = vmatpush3.bf16.msra.mxu0 %v7121_v55  ;;  %v2219_v55 = vadd.f32 %v7163_v45, %v7757_v40  ;;  %v7769_v40 = vld [vmem:[#allocation127_spill] sm:$0xff] }
 0x426   : > { %4899 = vmatprep.subr.bf16.mxu0 %v7179_v61  ;;  %v2399_v61 = vmax.f32 %v2283_v19, 0.0  ;;  %v2455_v46 = vpack.c.bf16 %v2398_v39, %v2397_v21  ;;  %v7767_v19 = vld [vmem:[#allocation126_spill] sm:$0xff]  ;;  %v7771_v39 = vld [vmem:[#allocation131_spill] sm:$0xff] }
 0x427   : > { %v2383_v45 = vmax.f32 %v2219_v55, 0.0  ;;  %v2198_v24 = vadd.f32 %v7157_v26, %v7767_v19  ;;  %v7770_v55 = vld [vmem:[#allocation129_spill] sm:$0xff]  ;;  %v2246_v26 = vadd.f32 %v7211_v15, %v6673_v38  ;;  %v2230_v15 = vadd.f32 %v7195_v48, %v6685_v41  ;;  %v5410_v41 = vld [vmem:[%s7493_s11] ss:$8 sps:$4 sm:$0xff]   ;;  %v5418_v48 = vld [vmem:[%s7493_s11 + $0x24] ss:$8 sps:$4 sm:$0xff]  }
 0x428   : > { %v2456_v23 = vpack.c.bf16 %v2400_v32, %v2399_v61  ;;  %v2251_v61 = vadd.f32 %v7201_v4, %v7770_v55  ;;  %v2238_v4 = vadd.f32 %v7193_v34, %v6679_v47  ;;  %v5421_v21 = vld [vmem:[%s7493_s11 + $0x34] ss:$8 sps:$4 sm:$0xff]  }
 0x429   : > { %4900 = vmatpush3.bf16.msra.mxu0 %v7110_v35  ;;  %v2384_v35 = vmax.f32 %v2222_v20, 0.0  ;;  %v7768_v20 = vld [vmem:[#allocation128_spill] sm:$0xff]  ;;  %v2378_v59 = vmax.f32 %v2198_v24, 0.0  ;;  %v2386_v34 = vmax.f32 %v2230_v15, 0.0 }
 0x42a   : > { %4901 = vmatprep.subr.bf16.mxu0 %v7169_v28  ;;  %v2214_v28 = vadd.f32 %v7175_v37, %v7759_v57  ;;  %v2267_v37 = vadd.f32 %v5109_v53, %v7762_v3  ;;  %v7766_v53 = vld [vmem:[#allocation125_spill] sm:$0xff]  ;;  %v2254_v54 = vadd.f32 %v7209_v60, %v7768_v20  ;;  %v2388_v38 = vmax.f32 %v2238_v4, 0.0 }
 0x42b   : > { %v2448_v25 = vpack.c.bf16 %v2384_v35, %v2383_v45  ;;  %v2259_v12 = vadd.f32 %v2258_v44, %v7766_v53  ;;  %v2389_v45 = vmax.f32 %v2243_v27, 0.0  ;;  %v2385_v3 = vmax.f32 %v2227_v42, 0.0 }
 0x42c   : > { %v2382_v31 = vmax.f32 %v2214_v28, 0.0  ;;  %v2395_v13 = vmax.f32 %v2267_v37, 0.0  ;;  %v2392_v35 = vmax.f32 %v2254_v54, 0.0  ;;  %v2391_v28 = vmax.f32 %v2251_v61, 0.0  ;;  %v7774_v37 = vld [vmem:[#allocation133_spill] sm:$0xff] }
 0x42d   : > { %4902 = vmatpush3.bf16.msra.mxu0 %v7104_v33  ;;  %v2211_v33 = vadd.f32 %v7167_v58, %v7761_v9  ;;  %v7765_v58 = vld [vmem:[#allocation123_spill] sm:$0xff]  ;;  %v2393_v44 = vmax.f32 %v2259_v12, 0.0 }
 0x42e   : > { %4903 = vmatprep.subr.bf16.mxu0 %v7159_v50  ;;  %v5412_v50 = vld [vmem:[%s7493_s11 + $0x4] ss:$8 sps:$4 sm:$0xff]   ;;  %v2454_v32 = vpack.c.bf16 %v2396_v43, %v2395_v13  ;;  %v2452_v30 = vpack.c.bf16 %v2392_v35, %v2391_v28  ;;  %v5425_v43 = vld [vmem:[%s7493_s11 + $0x50] ss:$8 sps:$4 sm:$0xff]  }
 0x42f   : > { %v2381_v10 = vmax.f32 %v2211_v33, 0.0  ;;  %v2453_v57 = vpack.c.bf16 %v2394_v52, %v2393_v44  ;;  %v7772_v33 = vld [vmem:[#allocation130_spill] sm:$0xff] }
 0x431   : > { %4904 = vmatpush3.bf16.msra.mxu0 %v7098_v56  ;;  %v2203_v56 = vadd.f32 %v7143_v49, %v7765_v58  ;;  %v2447_v14 = vpack.c.bf16 %v2382_v31, %v2381_v10  ;;  %v2195_v49 = vadd.f32 %v7147_v5, %v7769_v40  ;;  %v5427_v31 = vld [vmem:[%s7493_s11 + $0x54] ss:$8 sps:$4 sm:$0xff]   ;;  %v5431_v58 = vld [vmem:[%s7493_s11 + $0x70] ss:$8 sps:$4 sm:$0xff]  }
 0x432   : > { %4911 = vmatprep.subr.bf16.mxu0 %v2456_v23  ;;  %v2390_v23 = vmax.f32 %v2246_v26, 0.0 }
 0x433   : > { %v2379_v0 = vmax.f32 %v2203_v56, 0.0  ;;  %v2377_v60 = vmax.f32 %v2195_v49, 0.0  ;;  %v7324_v56 = vpop.permute.xlu1 %3817 }
 0x434   : > { %3674 = vmatmul.mubr.bf16.vlgmr.msra.gmra.mxu0 %v5407_v11  ;;  %v2235_v11 = vadd.f32 %v7183_v16, %v7771_v39  ;;  %v2451_v9 = vpack.c.bf16 %v2390_v23, %v2389_v45  ;;  %v2449_v16 = vpack.c.bf16 %v2386_v34, %v2385_v3 }
 0x435   : > { %4912 = vmatpush3.bf16.msra.mxu0 %v2448_v25  ;;  %3932 = vmatprep.mubr.bf16.mxu0 %v5412_v50  ;;  %v2446_v6 = vpack.c.bf16 %v2380_v2, %v2379_v0  ;;  %v2445_v5 = vpack.c.bf16 %v2378_v59, %v2377_v60  ;;  %v7773_v50 = vld [vmem:[#allocation132_spill] sm:$0xff] }
 0x436   : > { %4913 = vmatprep.subr.bf16.mxu0 %v2455_v46  ;;  %v2387_v29 = vmax.f32 %v2235_v11, 0.0  ;;  %v5422_v25 = vld [vmem:[%s7493_s11 + $0x40] ss:$8 sps:$4 sm:$0xff]   ;;  %v5433_v46 = vld [vmem:[%s7493_s11 + $0x74] ss:$8 sps:$4 sm:$0xff]  }
 0x437   : > { %v7326_v10 = vpop.permute.xlu1 %3807 }
 0x438   : > { %v2450_v47 = vpack.c.bf16 %v2388_v38, %v2387_v29 }
 0x439   : > { %4914 = vmatpush3.bf16.msra.mxu0 %v2447_v14 }
 0x43a   : > { %4915 = vmatprep.subr.bf16.mxu0 %v2454_v32  ;;  %v5434_v32 = vld [vmem:[%s7495_s13] sm:$0xff]  }
 0x43b   : > { %v7328_v13 = vpop.permute.xlu1 %3797  ;;  %5167 = vmatprep.mubr.bf16.mxu1 %v5434_v32 }
 0x43d   : > { %4916 = vmatpush3.bf16.msra.mxu0 %v2446_v6 }
 0x43e   : > { %4917 = vmatprep.subr.bf16.mxu0 %v2453_v57 }
 0x43f   : > { %v7330_v53 = vpop.permute.xlu1 %3787 }
 0x441   : > { %4918 = vmatpush3.bf16.msra.mxu0 %v2445_v5 }
 0x442   : > { %4919 = vmatprep.subr.bf16.mxu0 %v2452_v30 }
 0x443   : > { %v7332_v12 = vpop.permute.xlu1 %3777 }
 0x445   : > { %4920 = vmatpush3.bf16.msra.mxu0 %v7772_v33 }
 0x446   : > { %4921 = vmatprep.subr.bf16.mxu0 %v2451_v9 }
 0x447   : > { %v7334_v2 = vpop.permute.xlu1 %3767 }
 0x449   : > { %4922 = vmatpush3.bf16.msra.mxu0 %v7773_v50 }
 0x44a   : > { %4923 = vmatprep.subr.bf16.mxu0 %v2450_v47 }
 0x44b   : > { %v3758_v19 = vpop.permute.xlu1 %3757 }
 0x44d   : > { %4924 = vmatpush3.bf16.msra.mxu0 %v7774_v37 }
 0x44e   : > { %4925 = vmatprep.subr.bf16.mxu0 %v2449_v16 }
 0x44f   : > { %v3748_v14 = vpop.permute.xlu1 %3747 }
 0x451   : > { %4926 = vmatpush3.bf16.msra.mxu0 %v6691_v63  ;;  %v5416_v63 = vld [vmem:[%s7493_s11 + $0x20] ss:$8 sps:$4 sm:$0xff]  }
 0x453   : > { %v3629_v49 = vpop.permute.xlu1 %3628 }
 0x454   : > { %3933 = vmatmul.mubr.bf16.vlgmr.msra.gmra.mxu0 %v5410_v41 }
 0x455   : > { %3940 = vmatprep.mubr.bf16.mxu0 %v5415_v7 }
 0x45c   : > { %3941 = vmatmul.mubr.bf16.gmra.mxu0 %v5413_v17 }
 0x45d   : > { %3948 = vmatprep.mubr.bf16.mxu0 %v5418_v48 }
 0x464   : > { %3949 = vmatmul.mubr.bf16.gmra.mxu0 %v5416_v63 }
 0x465   : > { %3956 = vmatprep.mubr.bf16.mxu0 %v5421_v21 }
 0x46c   : > { %3957 = vmatmul.mubr.bf16.gmra.mxu0 %v5419_v1 }
 0x46d   : > { %3964 = vmatprep.mubr.bf16.mxu0 %v5424_v8 }
 0x474   : > { %3965 = vmatmul.mubr.bf16.gmra.mxu0 %v5422_v25 }
 0x475   : > { %3972 = vmatprep.mubr.bf16.mxu0 %v5427_v31 }
 0x47c   : > { %3973 = vmatmul.mubr.bf16.gmra.mxu0 %v5425_v43 }
 0x47d   : > { %3980 = vmatprep.mubr.bf16.mxu0 %v5430_v22 }
 0x484   : > { %3981 = vmatmul.mubr.bf16.gmra.mxu0 %v5428_v18 }
 0x485   : > { %3988 = vmatprep.mubr.bf16.mxu0 %v5433_v46 }
 0x48c   : > { %3989 = vmatmul.mubr.bf16.gmra.mxu0 %v5431_v58 }
 0x4f4   : > { %v4905_v24 = vpop.f32.mrf.mxu0 }
 0x4f6   : > { %v4906_v20 = vpop.f32.mrf.mxu0 }
 0x4f7   : > { %v4907_v52 = vadd.f32 %v4906_v20, %v4905_v24 }
 0x4f8   : > { %v4908_v54 = vpop.f32.mrf.mxu0 }
 0x4f9   : > { %v3676_v55 = vadd.f32 %v4907_v52, %v6923_v36 }
 0x4fa   : > { %v4909_v0 = vpop.f32.mrf.mxu0 }
 0x4fb   : > { %v4910_v40 = vadd.f32 %v4909_v0, %v4908_v54 }
 0x4fd   : > { %v3679_v61 = vadd.f32 %v4910_v40, %v3629_v49 }
 0x4ff   : > { %v3682_v44 = vmax.f32 %v3676_v55, %v3679_v61 }
 0x501   : > { %v3683_v6 = vrot.slane %v3682_v44, 4 }
 0x503   : > { %v3684_v59 = vmax.f32 %v3682_v44, %v3683_v6 }
 0x505   : > { %v3685_v35 = vrot.slane %v3684_v59, 2 }
 0x507   : > { %v3686_v26 = vmax.f32 %v3684_v59, %v3685_v35 }
 0x509   : > { %v3687_v57 = vrot.slane %v3686_v26, 1 }
 0x50b   : > { %v3688_v60 = vmax.f32 %v3686_v26, %v3687_v57 }
 0x50d   : > { %v3689_v28 = vsub.f32 %v3676_v55, %v3688_v60  ;;  %v3690_v27 = vsub.f32 %v3679_v61, %v3688_v60 }
 0x50f   : > { %v3691_v5 = vmul.f32 1.442695, %v3689_v28  ;;  %v3693_v4 = vmul.f32 1.442695, %v3690_v27 }
 0x511   : > { %5442 = vpow2.f32 %v3691_v5 }
 0x512   : > { %5444 = vpow2.f32 %v3693_v4 }
 0x514   : > { %v4927_v30 = vpop.f32.mrf.mxu0 }
 0x516   : > { %v4928_v23 = vpop.f32.mrf.mxu0 }
 0x517   : > { %v4929_v39 = vadd.f32 %v4928_v23, %v4927_v30 }
 0x518   : > { %v4930_v11 = vpop.f32.mrf.mxu0 }
 0x519   : > { %v3935_v36 = vadd.f32 %v4929_v39, %v6915_v51 }
 0x51a   : > { %v4931_v45 = vpop.f32.mrf.mxu0 }
 0x51b   : > { %v4932_v38 = vadd.f32 %v4931_v45, %v4930_v11  ;;  %v3997_v47 = vmax.f32 %v3935_v36, 0.0 }
 0x51c   : > { %v4933_v15 = vpop.f32.mrf.mxu0 }
 0x51d   : > { %v3938_v9 = vadd.f32 %v4932_v38, %v3748_v14  ;;  %v7775_v38 = vld [vmem:[#allocation15_spill] sm:$0xff] }
 0x51e   : > { %v5443_v33 = vpop.eup %5442  ;;  %v4934_v29 = vpop.f32.mrf.mxu0 }
 0x51f   : > { %v5445_v42 = vpop.eup %5444  ;;  %v3998_v34 = vmax.f32 %v3938_v9, 0.0  ;;  %v4935_v50 = vadd.f32 %v4934_v29, %v4933_v15  ;;  %v7776_v29 = vld [vmem:[#allocation17_spill] sm:$0xff] }
 0x520   : > { %v3695_v3 = vadd.f32 %v5445_v42, %v5443_v33  ;;  %v4936_v16 = vpop.f32.mrf.mxu0 }
 0x521   : > { %v7341_v37 = vpack.c.bf16 %v3998_v34, %v3997_v47  ;;  %v3943_v17 = vadd.f32 %v4935_v50, %v6913_v62 }
 0x522   : > { %v3696_v41 = vrot.slane %v3695_v3, 4  ;;  %v4937_v7 = vpop.f32.mrf.mxu0 }
 0x523   : > { %v4938_v48 = vadd.f32 %v4937_v7, %v4936_v16  ;;  %v3999_v25 = vmax.f32 %v3943_v17, 0.0  ;;  %v7777_v17 = vld [vmem:[#allocation16_spill] sm:$0xff] }
 0x524   : > { %v3697_v63 = vadd.f32 %v3696_v41, %v3695_v3  ;;  %v7344_v51 = vpop.f32.mrf.mxu0 }
 0x525   : > { %v3946_v21 = vadd.f32 %v4938_v48, %v3758_v19 }
 0x526   : > { %v3698_v1 = vrot.slane %v3697_v63, 2  ;;  %v7346_v8 = vpop.f32.mrf.mxu0 }
 0x527   : > { %v4000_v31 = vmax.f32 %v3946_v21, 0.0 }
 0x528   : > { %v3699_v43 = vadd.f32 %v3698_v1, %v3697_v63  ;;  %v7348_v22 = vpop.f32.mrf.mxu0 }
 0x529   : > { %v7350_v18 = vpack.c.bf16 %v4000_v31, %v3999_v25 }
 0x52a   : > { %v3700_v46 = vrot.slane %v3699_v43, 1  ;;  %v4943_v58 = vpop.f32.mrf.mxu0 }
 0x52c   : > { %v3701_v24 = vadd.f32 %v3700_v46, %v3699_v43  ;;  %v4945_v62 = vpop.f32.mrf.mxu0 }
 0x52e   : > { %5446 = vlog2.f32 %v3701_v24  ;;  %v4946_v14 = vpop.f32.mrf.mxu0 }
 0x52f   : > { %v4947_v43 = vadd.f32 %v4946_v14, %v4945_v62 }
 0x530   : > { %v4948_v20 = vpop.f32.mrf.mxu0 }
 0x532   : > { %v4949_v54 = vpop.f32.mrf.mxu0 }
 0x534   : > { %v4951_v19 = vpop.f32.mrf.mxu0 }
 0x536   : > { %v4952_v32 = vpop.f32.mrf.mxu0 }
 0x537   : > { %v4953_v7 = vadd.f32 %v4952_v32, %v4951_v19 }
 0x538   : > { %v4954_v52 = vpop.f32.mrf.mxu0 }
 0x53a   : > { %v4955_v0 = vpop.f32.mrf.mxu0 }
 0x53b   : > { %v5447_v40 = vpop.eup %5446  ;;  %v4956_v34 = vadd.f32 %v4955_v0, %v4954_v52 }
 0x53c   : > { %v3703_v49 = vmul.f32 0.6931472, %v5447_v40  ;;  %v4957_v55 = vpop.f32.mrf.mxu0 }
 0x53d   : > { %v3970_v1 = vadd.f32 %v4956_v34, %v7330_v53  ;;  %v7779_v53 = vld [vmem:[#allocation19_spill] sm:$0xff] }
 0x53e   : > { %v3704_v61 = vsub.f32 %v3689_v28, %v3703_v49  ;;  %v3705_v44 = vsub.f32 %v3690_v27, %v3703_v49  ;;  %v4958_v6 = vpop.f32.mrf.mxu0  ;;  %v7780_v49 = vld [vmem:[#allocation20_spill] sm:$0xff] }
 0x53f   : > { %v4959_v33 = vadd.f32 %v4958_v6, %v4957_v55  ;;  %v4006_v32 = vmax.f32 %v3970_v1, 0.0 }
 0x540   : > { %3707 = vst [vmem:[%s7356_s23 + $0x8] sm:$0xff] %v3705_v44  ;;  %3706 = vst [vmem:[%s7356_s23] sm:$0xff] %v3704_v61  ;;  %v4960_v59 = vpop.f32.mrf.mxu0  ;;  %v5437_v44 = vld [vmem:[%s7495_s13 + $0x18] sm:$0xff]  }
 0x541   : > { %v3975_v48 = vadd.f32 %v4959_v33, %v7777_v17 }
 0x542   : > { %v4961_v35 = vpop.f32.mrf.mxu0 }
 0x543   : > { %v4962_v45 = vadd.f32 %v4961_v35, %v4960_v59  ;;  %v4007_v24 = vmax.f32 %v3975_v48, 0.0 }
 0x544   : > { %v4963_v26 = vpop.f32.mrf.mxu0 }
 0x545   : > { %v3978_v50 = vadd.f32 %v4962_v45, %v7328_v13  ;;  %v4944_v13 = vadd.f32 %v4943_v58, %v7348_v22 }
 0x546   : > { %v4964_v57 = vpop.f32.mrf.mxu0 }
 0x547   : > { %v4965_v28 = vadd.f32 %v4964_v57, %v4963_v26  ;;  %v4008_v25 = vmax.f32 %v3978_v50, 0.0  ;;  %v3954_v62 = vadd.f32 %v4944_v13, %v7334_v2  ;;  %v5435_v2 = vld [vmem:[%s7495_s13 + $0x8] sm:$0xff]  }
 0x548   : > { %v4966_v60 = vpop.f32.mrf.mxu0 }
 0x549   : > { %v3983_v42 = vadd.f32 %v4965_v28, %v7776_v29  ;;  %v4018_v52 = vpack.c.bf16 %v4008_v25, %v4007_v24 }
 0x54a   : > { %v4967_v5 = vpop.f32.mrf.mxu0 }
 0x54b   : > { %v4968_v23 = vadd.f32 %v4967_v5, %v4966_v60  ;;  %v4009_v63 = vmax.f32 %v3983_v42, 0.0 }
 0x54c   : > { %v4969_v4 = vpop.f32.mrf.mxu0 }
 0x54d   : > { %v3986_v36 = vadd.f32 %v4968_v23, %v7326_v10  ;;  %v4950_v10 = vadd.f32 %v4949_v54, %v4948_v20  ;;  %v4941_v20 = vadd.f32 %v7346_v8, %v7344_v51  ;;  %v3959_v54 = vadd.f32 %v4947_v43, %v7779_v53  ;;  %v5436_v8 = vld [vmem:[%s7495_s13 + $0x10] sm:$0xff]  }
 0x54e   : > { %v4970_v30 = vpop.f32.mrf.mxu0 }
 0x54f   : > { %v4971_v39 = vadd.f32 %v4970_v30, %v4969_v4  ;;  %v4010_v3 = vmax.f32 %v3986_v36, 0.0  ;;  %v3962_v19 = vadd.f32 %v4950_v10, %v7332_v12  ;;  %v3951_v55 = vadd.f32 %v4941_v20, %v7780_v49 }
 0x550   : > { %v4972_v11 = vpop.f32.mrf.mxu0  ;;  %v4003_v22 = vmax.f32 %v3959_v54, 0.0  ;;  %v4002_v12 = vmax.f32 %v3954_v62, 0.0 }
 0x551   : > { %v3991_v15 = vadd.f32 %v4971_v39, %v7775_v38  ;;  %v4019_v31 = vpack.c.bf16 %v4010_v3, %v4009_v63  ;;  %v4004_v14 = vmax.f32 %v3962_v19, 0.0  ;;  %v4001_v61 = vmax.f32 %v3951_v55, 0.0 }
 0x552   : > { %v4973_v27 = vpop.f32.mrf.mxu0 }
 0x553   : > { %v4974_v9 = vadd.f32 %v4973_v27, %v4972_v11  ;;  %v4011_v16 = vmax.f32 %v3991_v15, 0.0  ;;  %v4016_v58 = vpack.c.bf16 %v4004_v14, %v4003_v22  ;;  %v4015_v51 = vpack.c.bf16 %v4002_v12, %v4001_v61 }
 0x555   : > { %v3994_v47 = vadd.f32 %v4974_v9, %v7324_v56  ;;  %v7778_v56 = vld [vmem:[#allocation18_spill] sm:$0xff] }
 0x556   : > { %v3967_v46 = vadd.f32 %v4953_v7, %v7778_v56 }
 0x557   : > { %v4012_v41 = vmax.f32 %v3994_v47, 0.0 }
 0x558   : > { %v4005_v0 = vmax.f32 %v3967_v46, 0.0 }
 0x559   : > { %v4020_v21 = vpack.c.bf16 %v4012_v41, %v4011_v16 }
 0x55a   : > { %v4017_v40 = vpack.c.bf16 %v4006_v32, %v4005_v0 }
 0x55b   : > { %5151 = vmatprep.subr.bf16.mxu1 %v4020_v21 }
 0x55c   : > { %5152 = vmatpush3.bf16.msra.mxu1 %v4020_v21 }
 0x55d   : > { %5153 = vmatprep.subr.bf16.mxu1 %v4019_v31 }
 0x560   : > { %5154 = vmatpush3.bf16.msra.mxu1 %v4019_v31 }
 0x561   : > { %5155 = vmatprep.subr.bf16.mxu1 %v4018_v52 }
 0x564   : > { %5156 = vmatpush3.bf16.msra.mxu1 %v4018_v52 }
 0x565   : > { %5157 = vmatprep.subr.bf16.mxu1 %v4017_v40 }
 0x568   : > { %5158 = vmatpush3.bf16.msra.mxu1 %v4017_v40 }
 0x569   : > { %5159 = vmatprep.subr.bf16.mxu1 %v4016_v58 }
 0x56c   : > { %5160 = vmatpush3.bf16.msra.mxu1 %v4016_v58 }
 0x56d   : > { %5161 = vmatprep.subr.bf16.mxu1 %v4015_v51 }
 0x570   : > { %5162 = vmatpush3.bf16.msra.mxu1 %v4015_v51 }
 0x571   : > { %5163 = vmatprep.subr.bf16.mxu1 %v7350_v18 }
 0x574   : > { %5164 = vmatpush3.bf16.msra.mxu1 %v7350_v18 }
 0x575   : > { %5165 = vmatprep.subr.bf16.mxu1 %v7341_v37 }
 0x578   : > { %5166 = vmatpush3.bf16.msra.mxu1 %v7341_v37 }
 0x57b   : > { %5168 = vmatmul.mubr.bf16.vlgmr.msra.gmra.mxu1 %v5435_v2 }
 0x57c   : > { %5171 = vmatprep.mubr.bf16.mxu1 %v5436_v8 }
 0x583   : > { %5172 = vmatmul.mubr.bf16.gmra.mxu1 %v5437_v44 }
 0x584   : > { %5463 = shalt.err (!%p5460_p5)
}
 0x585   : > { %s5464_s23 = scalar_lea.hbm %s7392_s19, 256  ;;  %s5468_s0 = scalar_lea.hbm %s7498_s16, 512 }
 0x586   : > { %p5465_p6 = scmp.ne.s32.totalorder %s7392_s19, %s5464_s23  ;;  %p5469_p10 = scmp.lt.s32.totalorder %s7392_s19, %s7498_s16 }
 0x587   : > { %p5470_p11 = scmp.lt.s32.totalorder %s5468_s0, %s5464_s23 }
 0x588   : > { %p5466_p7 = pnand %p5465_p6, %p5695_p4 }
 0x589   : > { %p5471_p12 = por %p5470_p11, %p5469_p10 }
 0x58a   : > { %p5467_p9 = pneg %p5466_p7 }
 0x58c   : > { %p5472_p13 = pnand %p5471_p12, %p5467_p9 }
 0x58e   : > { %5475 = shalt.err (!%p5472_p13)
}
 0x58f   : > { %s7510_s28 = smov 128   ;;  %s5563_s18 = smov 8   ;;  %v4045_v37 = vpop.permute.xlu1 %4044  ;;  %v7782_v26 = vld [vmem:[#allocation21_spill] sm:$0xff]  ;;  %v7783_v5 = vld [vmem:[#allocation23_spill] sm:$0xff]  ;;  %v7784_v15 = vld [vmem:[#allocation22_spill] sm:$0xff] }
 0x590   : > { %s7781_s22 = scalar_lea.sflag [#allocation3], %s7353_s20  ;;  %v7785_v34 = vld [vmem:[#allocation24_spill] sm:$0xff]  ;;  %s4583_s23 = sshll.u32 %s5548_s27, 10 }
 0x591   : > { %5176 = dma.vmem_to_hbm [thread:$0]  (%p5695_p4), %s7395_s24, 256, %s7392_s19, %s7781_s22, %s7510_s28, %s7510_s28, %s5563_s18  }
 0x592   : > { %s4413_s19 = sshll.u32 %s7353_s20, 6  ;;  %s7434_s0 = scalar_lea.hbm %s7499_s17, %s4583_s23 }
 0x593   : > { %v4055_v59 = vpop.permute.xlu1 %4054  ;;  %s602_s24 = scalar_lea.vmem [#allocation4], %s4413_s19  ;;  %s4218_s27 = scalar_lea.sflag [#allocation5], %s7353_s20 }
 0x594   : > { %s4252_s26 = sshll.u32 %s602_s24, 4  ;;  %s5564_s22 = smov [#allocation4]   ;;  %s7429_s26 = int_to_ptr.vmem [resolvable:$true] %s4252_s26 }
 0x595   : > { %s5476_s29 = scalar_lea.vmem %s7429_s26, 1024  ;;  %s5480_s19 = sshll.u32 %s5564_s22, 4  ;;  %s5481_s19 = int_to_ptr.vmem [resolvable:$false] %s5480_s19 }
 0x596   : > { %p5477_p0 = scmp.ne.s32.totalorder %s7429_s26, %s5476_s29  ;;  %s5482_s23 = scalar_lea.vmem %s5481_s19, 2048 }
 0x597   : > { %v4065_v27 = vpop.permute.xlu1 %4064  ;;  %p5483_p3 = scmp.lt.s32.totalorder %s7429_s26, %s5481_s19  ;;  %p5484_p5 = scmp.lt.s32.totalorder %s5482_s23, %s5476_s29 }
 0x598   : > { %p5478_p1 = pnand %p5477_p0, %p5695_p4 }
 0x599   : > { %p5485_p6 = por %p5484_p5, %p5483_p3 }
 0x59a   : > { %p5479_p2 = pneg %p5478_p1 }
 0x59b   : > { %v4075_v7 = vpop.permute.xlu1 %4074 }
 0x59c   : > { %p5486_p7 = pnand %p5485_p6, %p5479_p2 }
 0x63b   : > { %v5169_v18 = vpop.f32.mrf.mxu1 }
 0x63c   : > { %v4144_v4 = vadd.f32 %v5169_v18, %v7783_v5 }
 0x63d   : > { %v4135_v6 = vpop.f32.mrf.mxu1 }
 0x63e   : > { %v4136_v57 = vadd.f32 %v4135_v6, %v7782_v26  ;;  %v4168_v36 = vmul.f32 %v4144_v4, %v4144_v4 }
 0x63f   : > { %v5170_v35 = vpop.f32.mrf.mxu1 }
 0x640   : > { %v4166_v39 = vmul.f32 %v4136_v57, %v4136_v57  ;;  %v4147_v11 = vadd.f32 %v5170_v35, %v4055_v59 }
 0x641   : > { %v4138_v60 = vpop.f32.mrf.mxu1 }
 0x642   : > { %v4139_v30 = vadd.f32 %v4138_v60, %v4045_v37  ;;  %v4169_v29 = vmul.f32 %v4147_v11, %v4147_v11 }
 0x643   : > { %v5173_v23 = vpop.f32.mrf.mxu1 }
 0x644   : > { %v4167_v28 = vmul.f32 %v4139_v30, %v4139_v30  ;;  %v4160_v50 = vadd.f32 %v5173_v23, %v7785_v34 }
 0x645   : > { %v4151_v45 = vpop.f32.mrf.mxu1 }
 0x646   : > { %v4174_v38 = vadd.f32 %v4167_v28, %v4166_v39  ;;  %v4152_v9 = vadd.f32 %v4151_v45, %v7784_v15  ;;  %v4172_v21 = vmul.f32 %v4160_v50, %v4160_v50 }
 0x647   : > { %v5174_v33 = vpop.f32.mrf.mxu1 }
 0x648   : > { %v4175_v42 = vadd.f32 %v4174_v38, %v4168_v36  ;;  %v4170_v3 = vmul.f32 %v4152_v9, %v4152_v9  ;;  %v4163_v48 = vadd.f32 %v5174_v33, %v4075_v7 }
 0x649   : > { %v4154_v47 = vpop.f32.mrf.mxu1 }
 0x64a   : > { %v4176_v16 = vadd.f32 %v4175_v42, %v4169_v29  ;;  %v4155_v41 = vadd.f32 %v4154_v47, %v4065_v27  ;;  %v4173_v1 = vmul.f32 %v4163_v48, %v4163_v48 }
 0x64c   : > { %v4177_v17 = vadd.f32 %v4176_v16, %v4170_v3  ;;  %v4171_v63 = vmul.f32 %v4155_v41, %v4155_v41 }
 0x64e   : > { %v4178_v10 = vadd.f32 %v4177_v17, %v4171_v63 }
 0x650   : > { %v4179_v25 = vadd.f32 %v4178_v10, %v4172_v21 }
 0x652   : > { %v4180_v31 = vadd.f32 %v4179_v25, %v4173_v1 }
 0x654   : > { %v4181_v43 = vrot.slane %v4180_v31, 4 }
 0x656   : > { %v4182_v56 = vadd.f32 %v4181_v43, %v4180_v31 }
 0x658   : > { %v4183_v46 = vrot.slane %v4182_v56, 2 }
 0x65a   : > { %v4184_v24 = vadd.f32 %v4183_v46, %v4182_v56 }
 0x65c   : > { %v4185_v13 = vrot.slane %v4184_v24, 1 }
 0x65e   : > { %v4186_v19 = vadd.f32 %v4185_v13, %v4184_v24 }
 0x660   : > { %v4187_v32 = vmax.f32 %v4186_v19, 1e-24 }
 0x662   : > { %5448 = vrsqrt.f32 %v4187_v32 }
 0x66f   : > { %v5449_v52 = vpop.eup %5448 }
 0x670   : > { %v4194_v20 = vmul.f32 %v5449_v52, %v4155_v41  ;;  %v4189_v53 = vmul.f32 %v5449_v52, %v4136_v57  ;;  %v4190_v54 = vmul.f32 %v5449_v52, %v4139_v30  ;;  %v4191_v0 = vmul.f32 %v5449_v52, %v4144_v4 }
 0x671   : > { %v4192_v62 = vmul.f32 %v5449_v52, %v4147_v11  ;;  %v4193_v14 = vmul.f32 %v5449_v52, %v4152_v9  ;;  %v4195_v40 = vmul.f32 %v5449_v52, %v4160_v50  ;;  %v4196_v49 = vmul.f32 %v5449_v52, %v4163_v48 }
 0x672   : > { %4202 = vst [vmem:[%s602_s24 + $0x28] sm:$0xff] %v4194_v20  ;;  %4197 = vst [vmem:[%s602_s24] sm:$0xff] %v4189_v53 }
 0x673   : > { %4198 = vst [vmem:[%s602_s24 + $0x8] sm:$0xff] %v4190_v54  ;;  %4199 = vst [vmem:[%s602_s24 + $0x10] sm:$0xff] %v4191_v0 }
 0x674   : > { %4200 = vst [vmem:[%s602_s24 + $0x18] sm:$0xff] %v4192_v62  ;;  %4201 = vst [vmem:[%s602_s24 + $0x20] sm:$0xff] %v4193_v14 }
 0x675   : > { %4203 = vst [vmem:[%s602_s24 + $0x30] sm:$0xff] %v4195_v40  ;;  %4204 = vst [vmem:[%s602_s24 + $0x38] sm:$0xff] %v4196_v49 }
 0x676   : > { %5489 = shalt.err (!%p5486_p7)
}
 0x677   : > { %s5490_s24 = scalar_lea.hbm %s7434_s0, 1024  ;;  %s5494_s21 = scalar_lea.hbm %s7499_s17, 2048 }
 0x678   : > { %p5491_p9 = scmp.ne.s32.totalorder %s7434_s0, %s5490_s24  ;;  %p5495_p12 = scmp.lt.s32.totalorder %s7434_s0, %s7499_s17 }
 0x679   : > { %p5496_p13 = scmp.lt.s32.totalorder %s5494_s21, %s5490_s24 }
 0x67a   : > { %p5492_p10 = pnand %p5491_p9, %p5695_p4 }
 0x67b   : > { %p5497_p0 = por %p5496_p13, %p5495_p12 }
 0x67c   : > { %p5493_p11 = pneg %p5492_p10 }
 0x67e   : > { %p5498_p1 = pnand %p5497_p0, %p5493_p11 }
 0x680   : > { %5501 = shalt.err (!%p5498_p1)
}
 0x681   : > { %s7786_s29 = smov 128  }
 0x682   : > { %5177 = dma.vmem_to_hbm [thread:$0]  (%p5695_p4), %s7429_s26, 1024, %s7434_s0, %s4218_s27, %s7786_s29, %s7786_s29, %s5563_s18  }
 0x683 PF: > { %s7787_s19 = sld [smem:[#allocation11_spill]] }
 0x684   : > { %s7788_s23 = sld [smem:[#allocation8_spill]] }
 0x689   : > { %p5187_p2 = scmp.ge.s32.totalorder %s7787_s19, 2 }
 0x68a   : > { %s4277_s2 = sand.u32 1, %s7788_s23  }
 0x68b   : > { %p5181_p3 = pnand %p5187_p2, %p5702_p8  ;;  %s4278_s28 = scalar_lea.sflag [#allocation3], %s4277_s2 }
 0x68d   : > { %p5182_p5 = pneg %p5181_p3 }
 0x68f   : > { %5527 = dma.done.wait (%p5182_p5), %s4278_s28, 256  }
 0x690   : > { %5529 = vsyncadd (%p5182_p5), %s4278_s28, 4294967040  ;;  %s4287_s24 = scalar_lea.sflag [#allocation5], %s4277_s2 }
 0x691   : > { %5531 = dma.done.wait (%p5182_p5), %s4287_s24, 1024  }
 0x692   : > { %5533 = vsyncadd (%p5182_p5), %s4287_s24, 4294966272  ;;  %s34_s29 = sadd.s32 1, %s7787_s19   ;;  %s7790_s1 = sld [smem:[#allocation9_spill]] }
 0x693   : > { %p31_p6 = scmp.ge.s32.totalorder %s34_s29, 4   ;;  %s7791_s26 = sld [smem:[#allocation14_spill]] }
 0x694   : > { %s7792_s27 = sld [smem:[#allocation10_spill]]  ;;  %s7794_s24 = smov %s5540_s25 }
 0x695   : > { %s7793_s28 = sld [smem:[#allocation12_spill]]  ;;  %33 = sbr.rel (!%p31_p6) target bundleno = 10 (0xa), region = 147 }
 0x698   : > { %s7795_s25 = smov %s7790_s1 }
 0x69a   :  { %4292 = vsyncpa [#allocation3], 1 }
 0x69b   :  { %4294 = vsyncpa [#allocation3 + $0x1], 1 }
 0x69c   :  { %4295 = vsyncpa [#allocation5], 1 }
 0x69d   :  { %4297 = vsyncpa [#allocation5 + $0x1], 1 }

</bundles_post_ra>
